<compile_context>
chip_gen: v5e
topology: v5e:2x2
jax: 0.10.0
libtpu: 0.0.40
codegen_flags: <defaults>
</compile_context>

<pallas_src>
import functools

import jax
import jax.numpy as jnp
from jax import lax
from jax.experimental import pallas as pl
from jax.experimental.pallas import tpu as pltpu


def _round_up(x, m):
    return ((x + m - 1) // m) * m


def _vmem_budget():
    """(tile-sizing budget, vmem_limit_bytes), generation-aware."""
    try:
        phys = pltpu.get_tpu_info().vmem_capacity_bytes
    except Exception:  # pragma: no cover - conservative fallback works everywhere
        phys = 64 * 1024 * 1024
    if phys >= 100 * 1024 * 1024:          # v5e / v6e: 128 MiB VMEM per core
        return 64 * 1024 * 1024, 100 * 1024 * 1024
    return 24 * 1024 * 1024, 40 * 1024 * 1024   # v7x: 64 MiB physical per core


def _pick_tile_n(n, d, k, budget_bytes):
    """Largest N-tile (multiple of 128) whose *padded* working set fits budget.

    Lanes pad to 128 and sublanes to 8, so footprints use round_up(d,128) /
    round_up(k,128).  Fixed cost charges the (still double-buffered) resident
    codebook, ||e||^2/2 and the per-tile stat output buffers.
    """
    d_pad = _round_up(d, 128)
    k_pad = _round_up(k, 128)
    fixed = 2 * _round_up(k, 8) * d_pad * 4      # codebook (K,D), 2 buffers
    fixed += 2 * 8 * k_pad * 4                   # e2_half (1,K)
    fixed += 2 * 8 * k_pad * 4                   # counts partial out (1,K)
    fixed += 2 * 8 * d_pad * 4                   # sse partial out (1,D)
    avail = max(budget_bytes - fixed, 2 * 1024 * 1024)
    # Per row: x in (2 bufs) + quant out (2 bufs) + live x/quant/diff vregs
    # (~3*d_pad), (T,K) intermediates score/where/one-hot (~3*k_pad), idx row
    # (2 bufs of int32).
    bytes_per_row = 4 * (7 * d_pad + 3 * k_pad) + 2 * 4
    tile = avail // max(bytes_per_row, 1)
    tile = int(max(128, min(tile, 8192)))
    tile = (tile // 128) * 128
    tile = min(tile, _round_up(n, 128))
    return max(tile, 128)


def _vq_kernel(x_ref, emb_ref, e2h_ref,                 # inputs
               quant_ref, idx_ref, counts_ref, sse_ref,  # outputs (per-tile)
               *, n_valid, tile_n, num_embeddings):
    i = pl.program_id(0)
    k = num_embeddings

    x = x_ref[...]            # (T, D) f32 tile (streamed)
    e = emb_ref[...]          # (K, D) codebook (VMEM-resident)
    e2h = e2h_ref[...]        # (1, K) 0.5*||e||^2 (precomputed in wrapper)

    # argmax(x.e^T - 0.5||e||^2) == argmin(||x - e||^2); the per-row x^2 term
    # is invariant under the argmin so we never compute it.
    xe = lax.dot_general(x, e, (((1,), (1,)), ((), ())),
                         preferred_element_type=jnp.float32)       # (T, K)
    score = xe - e2h                                               # (T, K)

    # argmax with first-index tie-break (matches torch.argmin of the distance).
    max_s = jnp.max(score, axis=1, keepdims=True)                  # (T, 1)
    iota_k = lax.broadcasted_iota(jnp.int32, score.shape, 1)       # (T, K)
    idx_col = jnp.min(jnp.where(score == max_s, iota_k, jnp.int32(k)),
                      axis=1, keepdims=True)                       # (T, 1)
    enc = (iota_k == idx_col).astype(jnp.float32)                  # (T, K) one-hot

    # Quantized rows via the (nearly idle) MXU.
    quant = jnp.dot(enc, e, preferred_element_type=jnp.float32)    # (T, D)
    quant_ref[...] = quant

    # Lane-dense (1, T) index row: one-hot @ iota on the MXU instead of a
    # (T,1)->(1,T) relayout; values are exact small integers in f32.
    iota_row = lax.broadcasted_iota(jnp.int32, (1, k), 1).astype(jnp.float32)
    idx_row = lax.dot_general(iota_row, enc, (((1,), (1,)), ((), ())),
                              preferred_element_type=jnp.float32)  # (1, T)
    idx_ref[0] = idx_row.astype(jnp.int32)

    # Per-tile partial statistics (reduced fully in the wrapper).
    diff = quant - x
    counts_ref[0] = jnp.sum(enc, axis=0, keepdims=True)            # (1, K)
    sse_ref[0] = jnp.sum(diff * diff, axis=0, keepdims=True)       # (1, D)

    # Ragged last tile only: overwrite stats with padded rows masked out.
    rem = n_valid % tile_n
    if rem != 0:
        @pl.when(i == pl.num_programs(0) - 1)
        def _mask_stats():
            row = lax.broadcasted_iota(jnp.int32, (tile_n, 1), 0)
            valid = (row < rem).astype(jnp.float32)                # (T, 1)
            encv = enc * valid
            diffv = diff * valid
            counts_ref[0] = jnp.sum(encv, axis=0, keepdims=True)
            sse_ref[0] = jnp.sum(diffv * diffv, axis=0, keepdims=True)


def vector_quantizer(x_nchw, embedding, commitment_cost, *, tile_n=None,
                     return_encodings=True, encodings_dtype=jnp.float32):
    """Forward pass of VectorQuantizer.

    Returns (loss, quantized_nchw, perplexity, encodings); same forward values
    as the PyTorch module.  Set return_encodings=False (or a narrow
    encodings_dtype) to skip the N*K one-hot write-back entirely.
    """
    b, c, h, w = x_nchw.shape
    k, d = embedding.shape
    assert c == d, "channel dim must equal embedding_dim"

    # glue: NCHW -> NHWC -> (B*H*W, D)
    x_nhwc = jnp.transpose(x_nchw, (0, 2, 3, 1)).astype(jnp.float32)
    flat = x_nhwc.reshape(-1, d)
    n = flat.shape[0]

    emb = embedding.astype(jnp.float32)
    e2_half = 0.5 * jnp.sum(emb * emb, axis=1)[None, :]      # (1, K), hoisted

    budget, vmem_limit = _vmem_budget()
    if tile_n is None:
        tile_n = _pick_tile_n(n, d, k, budget)
    tile_n = max(8, _round_up(int(tile_n), 8))
    num_tiles = (n + tile_n - 1) // tile_n
    n_pad = num_tiles * tile_n
    if n_pad != n:
        flat = jnp.pad(flat, ((0, n_pad - n), (0, 0)))

    kernel = functools.partial(
        _vq_kernel, n_valid=n, tile_n=tile_n, num_embeddings=k)

    quant_flat, idx_tiles, counts_part, sse_part = pl.pallas_call(
        kernel,
        out_shape=(
            jax.ShapeDtypeStruct((n_pad, d), jnp.float32),          # quantized
            jax.ShapeDtypeStruct((num_tiles, 1, tile_n), jnp.int32),  # indices
            jax.ShapeDtypeStruct((num_tiles, 1, k), jnp.float32),   # counts part.
            jax.ShapeDtypeStruct((num_tiles, 1, d), jnp.float32),   # sse partials
        ),
        grid_spec=pltpu.PrefetchScalarGridSpec(
            num_scalar_prefetch=0,
            grid=(num_tiles,),
            in_specs=[
                pl.BlockSpec((tile_n, d), lambda i: (i, 0)),   # x tile (streamed)
                pl.BlockSpec((k, d), lambda i: (0, 0)),        # codebook, resident
                pl.BlockSpec((1, k), lambda i: (0, 0)),        # 0.5*||e||^2, resident
            ],
            out_specs=(
                pl.BlockSpec((tile_n, d), lambda i: (i, 0)),        # quant tile
                pl.BlockSpec((1, 1, tile_n), lambda i: (i, 0, 0)),  # idx row (lane-dense)
                pl.BlockSpec((1, 1, k), lambda i: (i, 0, 0)),       # counts partial
                pl.BlockSpec((1, 1, d), lambda i: (i, 0, 0)),       # sse partial
            ),
        ),
        compiler_params=pltpu.CompilerParams(
            dimension_semantics=("parallel",),   # no cross-tile state -> megacore OK
            vmem_limit_bytes=vmem_limit,
        ),
    )(flat, emb, e2_half)

    # Tiny wrapper-side reductions (num_tiles*K / num_tiles*D elements).
    counts = jnp.sum(counts_part, axis=(0, 1))                   # (K,)
    sse = jnp.sum(sse_part)
    n_f = jnp.float32(n)
    mse = sse / (n_f * jnp.float32(d))
    # Forward value: e_latent_loss == q_latent_loss == mse(quantized, inputs).
    loss = (1.0 + float(commitment_cost)) * mse
    avg = counts / n_f
    perp = jnp.exp(-jnp.sum(avg * jnp.log(avg + 1e-10)))

    quant_nchw = jnp.transpose(quant_flat[:n].reshape(b, h, w, d), (0, 3, 1, 2))
    idx_flat = idx_tiles.reshape(-1)[:n]
    enc = (jax.nn.one_hot(idx_flat, k, dtype=encodings_dtype)
           if return_encodings else None)
    return loss, quant_nchw, perp, enc


def _reference(x_nchw, embedding, commitment_cost):
    """Pure-JAX reference matching the PyTorch forward semantics."""
    b, c, h, w = x_nchw.shape
    k, d = embedding.shape
    x = jnp.transpose(x_nchw, (0, 2, 3, 1)).astype(jnp.float32)
    flat = x.reshape(-1, d)
    dist = (jnp.sum(flat ** 2, axis=1, keepdims=True)
            + jnp.sum(embedding ** 2, axis=1)
            - 2.0 * flat @ embedding.T)
    idx = jnp.argmin(dist, axis=1)
    enc = jax.nn.one_hot(idx, k, dtype=jnp.float32)
    quant = (enc @ embedding).reshape(x.shape)
    mse = jnp.mean((quant - x) ** 2)
    loss = (1.0 + commitment_cost) * mse
    avg_probs = jnp.mean(enc, axis=0)
    perp = jnp.exp(-jnp.sum(avg_probs * jnp.log(avg_probs + 1e-10)))
    quant_nchw = jnp.transpose(quant, (0, 3, 1, 2))
    return loss, quant_nchw, perp, enc


def _check(x, embedding, commitment_cost, **kw):
    out = vector_quantizer(x, embedding, commitment_cost, **kw)
    jax.block_until_ready(out)
    loss, quant, perp, enc = out
    r_loss, r_quant, r_perp, r_enc = _reference(x, embedding, commitment_cost)
    assert jnp.allclose(loss, r_loss, atol=1e-5, rtol=1e-5), (loss, r_loss)
    assert jnp.allclose(quant, r_quant, atol=1e-5, rtol=1e-5)
    assert jnp.allclose(perp, r_perp, atol=1e-4, rtol=1e-4), (perp, r_perp)
    assert jnp.array_equal(enc, r_enc)


if __name__ == "__main__":
    # small shapes consistent with the module: B=2, C=embedding_dim=4, H=W=16
    num_embeddings = 16
    embedding_dim = 4
    commitment_cost = 0.25

    key = jax.random.PRNGKey(0)
    kx, ke, kx2 = jax.random.split(key, 3)
    x = jax.random.normal(kx, (2, embedding_dim, 16, 16), dtype=jnp.float32)
    # deterministic init: uniform(-1/K, 1/K), same as nn.Embedding init in the module
    embedding = jax.random.uniform(
        ke, (num_embeddings, embedding_dim), dtype=jnp.float32,
        minval=-1.0 / num_embeddings, maxval=1.0 / num_embeddings)

    # 1) default (auto-sized tile) path
    _check(x, embedding, commitment_cost)

    # 2) multi-tile path with a ragged last tile (N=320 not a multiple of 128)
    #    exercises the per-tile partial stats and the padded-row masking.
    x_ragged = jax.random.normal(kx2, (2, embedding_dim, 16, 10), dtype=jnp.float32)
    _check(x_ragged, embedding, commitment_cost, tile_n=128)

    print("KERNEL_OK")
</pallas_src>

<mosaic_0001>
module attributes {stable_mosaic.version = 11 : i64} {
  func.func @_vq_kernel(%arg0: i32, %arg1: memref<512x4xf32, #tpu.memory_space<vmem>>, %arg2: memref<16x4xf32, #tpu.memory_space<vmem>>, %arg3: memref<1x16xf32, #tpu.memory_space<vmem>>, %arg4: memref<512x4xf32, #tpu.memory_space<vmem>>, %arg5: memref<1x1x512xi32, #tpu.memory_space<vmem>>, %arg6: memref<1x1x16xf32, #tpu.memory_space<vmem>>, %arg7: memref<1x1x4xf32, #tpu.memory_space<vmem>>) attributes {dimension_semantics = [#tpu.dimension_semantics<parallel>], iteration_bounds = array<i64: 1>, scalar_prefetch = 0 : i64, scratch_operands = 0 : i64, tpu.core_type = #tpu.core_type<tc>, window_params = [{transform_indices = @transform_0, window_bounds = array<i64: 512, 4>}, {pipeline_mode = #tpu.pipeline_mode<synchronous>, transform_indices = @transform_1, window_bounds = array<i64: 16, 4>}, {pipeline_mode = #tpu.pipeline_mode<synchronous>, transform_indices = @transform_2, window_bounds = array<i64: 1, 16>}, {transform_indices = @transform_3, window_bounds = array<i64: 512, 4>}, {transform_indices = @transform_4, window_bounds = array<i64: 1, 1, 512>}, {transform_indices = @transform_5, window_bounds = array<i64: 1, 1, 16>}, {transform_indices = @transform_6, window_bounds = array<i64: 1, 1, 4>}]} {
    %c0 = arith.constant 0 : index
    %c0_0 = arith.constant 0 : index
    %0 = vector.load %arg1[%c0, %c0_0] : memref<512x4xf32, #tpu.memory_space<vmem>>, vector<512x4xf32>
    %c0_1 = arith.constant 0 : index
    %c0_2 = arith.constant 0 : index
    %1 = vector.load %arg2[%c0_1, %c0_2] : memref<16x4xf32, #tpu.memory_space<vmem>>, vector<16x4xf32>
    %c0_3 = arith.constant 0 : index
    %c0_4 = arith.constant 0 : index
    %2 = vector.load %arg3[%c0_3, %c0_4] : memref<1x16xf32, #tpu.memory_space<vmem>>, vector<1x16xf32>
    %cst = arith.constant dense<0.000000e+00> : vector<512x16xf32>
    %3 = tpu.matmul %0, %1, %cst {dimension_numbers = #tpu.dot_dimension_numbers<[1], [1], [0], [0], [0, 0, 1, 0], [], []>} : vector<512x4xf32>, vector<16x4xf32>, vector<512x16xf32> -> vector<512x16xf32>
    %4 = vector.broadcast %2 : vector<1x16xf32> to vector<512x16xf32>
    %5 = arith.subf %3, %4 : vector<512x16xf32>
    %cst_5 = arith.constant dense<0xFF800000> : vector<512xf32>
    %6 = vector.multi_reduction <maximumf>, %5, %cst_5 [1] : vector<512x16xf32> to vector<512xf32>
    %7 = vector.shape_cast %6 : vector<512xf32> to vector<512x1xf32>
    %8 = tpu.iota {dimensions = array<i32: 1>} : vector<512x16xi32>
    %9 = vector.broadcast %7 : vector<512x1xf32> to vector<512x16xf32>
    %10 = arith.cmpf oeq, %5, %9 : vector<512x16xf32>
    %c16_i32 = arith.constant 16 : i32
    %11 = vector.broadcast %c16_i32 : i32 to vector<512x16xi32>
    %12 = arith.select %10, %8, %11 : vector<512x16xi1>, vector<512x16xi32>
    %cst_6 = arith.constant dense<2147483647> : vector<512xi32>
    %13 = vector.multi_reduction <minsi>, %12, %cst_6 [1] : vector<512x16xi32> to vector<512xi32>
    %14 = vector.shape_cast %13 : vector<512xi32> to vector<512x1xi32>
    %15 = vector.broadcast %14 : vector<512x1xi32> to vector<512x16xi32>
    %16 = arith.cmpi eq, %8, %15 : vector<512x16xi32>
    %17 = arith.extui %16 : vector<512x16xi1> to vector<512x16xi32>
    %18 = arith.sitofp %17 : vector<512x16xi32> to vector<512x16xf32>
    %cst_7 = arith.constant dense<0.000000e+00> : vector<512x4xf32>
    %19 = tpu.matmul %18, %1, %cst_7 {dimension_numbers = #tpu.dot_dimension_numbers<[1], [0], [0], [1], [0, 0, 1, 1], [], []>} : vector<512x16xf32>, vector<16x4xf32>, vector<512x4xf32> -> vector<512x4xf32>
    %c0_8 = arith.constant 0 : index
    %c0_9 = arith.constant 0 : index
    %20 = vector.load %arg4[%c0_8, %c0_9] : memref<512x4xf32, #tpu.memory_space<vmem>>, vector<512x4xf32>
    tpu.vector_store %arg4[%c0_8, %c0_9], %19 {strides = array<i32>} : memref<512x4xf32, #tpu.memory_space<vmem>>, vector<512x4xf32>,
    %21 = tpu.iota {dimensions = array<i32: 1>} : vector<1x16xi32>
    %22 = arith.sitofp %21 : vector<1x16xi32> to vector<1x16xf32>
    %cst_10 = arith.constant dense<0.000000e+00> : vector<1x512xf32>
    %23 = tpu.matmul %22, %18, %cst_10 {dimension_numbers = #tpu.dot_dimension_numbers<[1], [1], [0], [0], [0, 0, 1, 0], [], []>} : vector<1x16xf32>, vector<512x16xf32>, vector<1x512xf32> -> vector<1x512xf32>
    %24 = arith.fptosi %23 : vector<1x512xf32> to vector<1x512xi32>
    %c0_11 = arith.constant 0 : index
    %c0_12 = arith.constant 0 : index
    %c0_13 = arith.constant 0 : index
    %25 = vector.load %arg5[%c0_11, %c0_12, %c0_13] : memref<1x1x512xi32, #tpu.memory_space<vmem>>, vector<1x1x512xi32>
    %26 = vector.shape_cast %25 : vector<1x1x512xi32> to vector<1x512xi32>
    %27 = vector.shape_cast %24 : vector<1x512xi32> to vector<1x1x512xi32>
    tpu.vector_store %arg5[%c0_11, %c0_12, %c0_13], %27 {strides = array<i32>} : memref<1x1x512xi32, #tpu.memory_space<vmem>>, vector<1x1x512xi32>,
    %28 = arith.subf %19, %0 : vector<512x4xf32>
    %cst_14 = arith.constant dense<0.000000e+00> : vector<16xf32>
    %29 = vector.multi_reduction <add>, %18, %cst_14 [0] : vector<512x16xf32> to vector<16xf32>
    %30 = vector.shape_cast %29 : vector<16xf32> to vector<1x16xf32>
    %c0_15 = arith.constant 0 : index
    %c0_16 = arith.constant 0 : index
    %c0_17 = arith.constant 0 : index
    %31 = vector.load %arg6[%c0_15, %c0_16, %c0_17] : memref<1x1x16xf32, #tpu.memory_space<vmem>>, vector<1x1x16xf32>
    %32 = vector.shape_cast %31 : vector<1x1x16xf32> to vector<1x16xf32>
    %33 = vector.shape_cast %30 : vector<1x16xf32> to vector<1x1x16xf32>
    tpu.vector_store %arg6[%c0_15, %c0_16, %c0_17], %33 {strides = array<i32>} : memref<1x1x16xf32, #tpu.memory_space<vmem>>, vector<1x1x16xf32>,
    %34 = arith.mulf %28, %28 : vector<512x4xf32>
    %cst_18 = arith.constant dense<0.000000e+00> : vector<4xf32>
    %35 = vector.multi_reduction <add>, %34, %cst_18 [0] : vector<512x4xf32> to vector<4xf32>
    %36 = vector.shape_cast %35 : vector<4xf32> to vector<1x4xf32>
    %c0_19 = arith.constant 0 : index
    %c0_20 = arith.constant 0 : index
    %c0_21 = arith.constant 0 : index
    %37 = vector.load %arg7[%c0_19, %c0_20, %c0_21] : memref<1x1x4xf32, #tpu.memory_space<vmem>>, vector<1x1x4xf32>
    %38 = vector.shape_cast %37 : vector<1x1x4xf32> to vector<1x4xf32>
    %39 = vector.shape_cast %36 : vector<1x4xf32> to vector<1x1x4xf32>
    tpu.vector_store %arg7[%c0_19, %c0_20, %c0_21], %39 {strides = array<i32>} : memref<1x1x4xf32, #tpu.memory_space<vmem>>, vector<1x1x4xf32>,
    return
  }
  func.func @transform_0(%arg0: i32) -> (i32, i32) {
    %c0_i32 = arith.constant 0 : i32
    %c0_i32_0 = arith.constant 0 : i32
    return %arg0, %c0_i32 : i32, i32
  }
  func.func @transform_1(%arg0: i32) -> (i32, i32) {
    %c0_i32 = arith.constant 0 : i32
    %c0_i32_0 = arith.constant 0 : i32
    %c0_i32_1 = arith.constant 0 : i32
    return %c0_i32, %c0_i32_0 : i32, i32
  }
  func.func @transform_2(%arg0: i32) -> (i32, i32) {
    %c0_i32 = arith.constant 0 : i32
    %c0_i32_0 = arith.constant 0 : i32
    %c0_i32_1 = arith.constant 0 : i32
    return %c0_i32, %c0_i32_0 : i32, i32
  }
  func.func @transform_3(%arg0: i32) -> (i32, i32) {
    %c0_i32 = arith.constant 0 : i32
    %c0_i32_0 = arith.constant 0 : i32
    return %arg0, %c0_i32 : i32, i32
  }
  func.func @transform_4(%arg0: i32) -> (i32, i32, i32) {
    %c0_i32 = arith.constant 0 : i32
    %c0_i32_0 = arith.constant 0 : i32
    %c0_i32_1 = arith.constant 0 : i32
    return %arg0, %c0_i32, %c0_i32_0 : i32, i32, i32
  }
  func.func @transform_5(%arg0: i32) -> (i32, i32, i32) {
    %c0_i32 = arith.constant 0 : i32
    %c0_i32_0 = arith.constant 0 : i32
    %c0_i32_1 = arith.constant 0 : i32
    return %arg0, %c0_i32, %c0_i32_0 : i32, i32, i32
  }
  func.func @transform_6(%arg0: i32) -> (i32, i32, i32) {
    %c0_i32 = arith.constant 0 : i32
    %c0_i32_0 = arith.constant 0 : i32
    %c0_i32_1 = arith.constant 0 : i32
    return %arg0, %c0_i32, %c0_i32_0 : i32, i32, i32
  }
}

</mosaic_0001>

<bundles_post_ra>
// kernel: tpu_custom_call.1
= control target key start
LH: loop header
LB: loop body
LE: loop exit
PB: predicated region body
PF: predicated region fallthrough
CT: control target
= control target key end

     0   :  { %12 = vsyncpa [#allocation3], 0  ;;  %vm87_vm0 = vcmask 31744   ;;  %s6529_s0 = inlined_call_operand.vmem [shape: f32[512,4], index: 0, kind: input, shape index: {}]   ;;  %s6530_s1 = inlined_call_operand.vmem [shape: f32[16,4], index: 1, kind: input, shape index: {}]   ;;  %s6531_s2 = inlined_call_operand.vmem [shape: f32[1,16], index: 2, kind: input, shape index: {}]   ;;  %s6532_s3 = inlined_call_operand.vmem [shape: f32[512,4], index: 3, kind: output, shape index: {0}]   ;;  %s6533_s4 = inlined_call_operand.hbm [shape: s32[1,1,512], index: 4, kind: output, shape index: {1}]   ;;  %s6534_s5 = inlined_call_operand.hbm [shape: f32[1,1,16], index: 5, kind: output, shape index: {2}]   ;;  %s6535_s6 = inlined_call_operand.hbm [shape: f32[1,1,4], index: 6, kind: output, shape index: {3}]  }
   0x1   :  { %v85_v0 = vld [vmem:[%s6530_s1 + $0x8] sm:$0xff]  ;;  %v84_v1 = vld [vmem:[%s6530_s1] sm:$0xff] }
   0x2   :  { %3053 = vmatpush.xpose.msk.msra.mxu0 %vm87_vm0, %v85_v0  ;;  %3315 = vmatpush.xpose.msk.msra.mxu2 %vm87_vm0, %v85_v0 }
   0x3   :  { %2243 = vmatpush.msra.mxu1 %v85_v0  ;;  %3317 = vmatpush.msra.mxu3 %v85_v0 }
   0x5   :  { %2244 = vmatpush.msra.mxu1 %v84_v1  ;;  %3318 = vmatpush.msra.mxu3 %v84_v1 }
   0x6   :  { %13 = vsyncpa [#allocation5], 0  ;;  %3054 = vmatpush.xpose.msk.msra.mxu0 %vm87_vm0, %v84_v1  ;;  %3316 = vmatpush.xpose.msk.msra.mxu2 %vm87_vm0, %v84_v1  ;;  %v20_v2 = vld [vmem:[%s6529_s0] sm:$0xff]  ;;  %v59_v3 = vld [vmem:[%s6529_s0 + $0x138] sm:$0xff]  ;;  %vm562_vm1 = vcmask 130048   ;;  %s3022_s14 = sshll.u32 %s6534_s5, 4  ;;  %s3023_s14 = int_to_ptr.hbm [resolvable:$true] %s3022_s14 }
   0x7   :  { %v21_v4 = vld [vmem:[%s6529_s0 + $0x8] sm:$0xff]  ;;  %v60_v5 = vld [vmem:[%s6529_s0 + $0x140] sm:$0xff]  ;;  %v22_v6 = vld [vmem:[%s6529_s0 + $0x10] sm:$0xff]  ;;  %s3487_s15 = smov [#allocation4]   ;;  %s3033_s9 = sshll.u32 %s6535_s6, 4  ;;  %s3034_s9 = int_to_ptr.hbm [resolvable:$true] %s3033_s9 }
   0x8   :  { %v61_v7 = vld [vmem:[%s6529_s0 + $0x148] sm:$0xff]  ;;  %v23_v8 = vld [vmem:[%s6529_s0 + $0x18] sm:$0xff]  ;;  %v62_v9 = vld [vmem:[%s6529_s0 + $0x150] sm:$0xff]  ;;  %s3020_s16 = sshll.u32 %s3487_s15, 4  ;;  %s3489_s10 = smov [#allocation2]   ;;  %s3021_s16 = int_to_ptr.vmem [resolvable:$true] %s3020_s16 }
   0x9   :  { %3055 = vmatmul.msk.f32.vlgmr.msra.gmra.mxu0 %vm87_vm0, %v20_v2  ;;  %3094 = vmatmul.msk.f32.vlgmr.msra.gmra.mxu2 %vm87_vm0, %v59_v3  ;;  %v24_v10 = vld [vmem:[%s6529_s0 + $0x20] sm:$0xff]  ;;  %v63_v11 = vld [vmem:[%s6529_s0 + $0x158] sm:$0xff]  ;;  %v25_v12 = vld [vmem:[%s6529_s0 + $0x28] sm:$0xff]  ;;  %s3011_s12 = sshll.u32 %s6533_s4, 4  ;;  %s3012_s12 = int_to_ptr.hbm [resolvable:$true] %s3011_s12 }
   0xa   :  { %v64_v13 = vld [vmem:[%s6529_s0 + $0x160] sm:$0xff]  ;;  %v26_v14 = vld [vmem:[%s6529_s0 + $0x30] sm:$0xff]  ;;  %v65_v15 = vld [vmem:[%s6529_s0 + $0x168] sm:$0xff] }
   0xb   :  { %v27_v16 = vld [vmem:[%s6529_s0 + $0x38] sm:$0xff]  ;;  %v66_v17 = vld [vmem:[%s6529_s0 + $0x170] sm:$0xff]  ;;  %v28_v18 = vld [vmem:[%s6529_s0 + $0x40] sm:$0xff] }
   0xc   :  { %v67_v19 = vld [vmem:[%s6529_s0 + $0x178] sm:$0xff]  ;;  %v29_v20 = vld [vmem:[%s6529_s0 + $0x48] sm:$0xff]  ;;  %v68_v21 = vld [vmem:[%s6529_s0 + $0x180] sm:$0xff] }
   0xd   :  { %v30_v22 = vld [vmem:[%s6529_s0 + $0x50] sm:$0xff]  ;;  %v69_v23 = vld [vmem:[%s6529_s0 + $0x188] sm:$0xff]  ;;  %v31_v24 = vld [vmem:[%s6529_s0 + $0x58] sm:$0xff] }
   0xe   :  { %v70_v25 = vld [vmem:[%s6529_s0 + $0x190] sm:$0xff]  ;;  %v32_v26 = vld [vmem:[%s6529_s0 + $0x60] sm:$0xff]  ;;  %v71_v27 = vld [vmem:[%s6529_s0 + $0x198] sm:$0xff] }
   0xf   :  { %v33_v28 = vld [vmem:[%s6529_s0 + $0x68] sm:$0xff]  ;;  %v72_v29 = vld [vmem:[%s6529_s0 + $0x1a0] sm:$0xff]  ;;  %v34_v30 = vld [vmem:[%s6529_s0 + $0x70] sm:$0xff] }
  0x10   :  { %v35_v31 = vld [vmem:[%s6529_s0 + $0x78] sm:$0xff]  ;;  %v3658_v32 = vld [vmem:[%s6531_s2] ss:$0 sm:$0xff]  ;;  %v37_v40 = vld [vmem:[%s6529_s0 + $0x88] sm:$0xff] }
  0x11   :  { %3056 = vmatmul.msk.f32.gmra.mxu0 %vm87_vm0, %v21_v4  ;;  %3095 = vmatmul.msk.f32.gmra.mxu2 %vm87_vm0, %v60_v5  ;;  %v36_v34 = vld [vmem:[%s6529_s0 + $0x80] sm:$0xff]  ;;  %v38_v46 = vld [vmem:[%s6529_s0 + $0x90] sm:$0xff]  ;;  %v39_v53 = vld [vmem:[%s6529_s0 + $0x98] sm:$0xff] }
  0x12   :  { %v40_v60 = vld [vmem:[%s6529_s0 + $0xa0] sm:$0xff]  ;;  %v41_v4 = vld [vmem:[%s6529_s0 + $0xa8] sm:$0xff] }
  0x19   :  { %3057 = vmatmul.msk.f32.gmra.mxu0 %vm87_vm0, %v22_v6  ;;  %3096 = vmatmul.msk.f32.gmra.mxu2 %vm87_vm0, %v61_v7 }
  0x21   :  { %3058 = vmatmul.msk.f32.gmra.mxu0 %vm87_vm0, %v23_v8  ;;  %3097 = vmatmul.msk.f32.gmra.mxu2 %vm87_vm0, %v62_v9 }
  0x29   :  { %3059 = vmatmul.msk.f32.gmra.mxu0 %vm87_vm0, %v24_v10  ;;  %3098 = vmatmul.msk.f32.gmra.mxu2 %vm87_vm0, %v63_v11  ;;  %v42_v10 = vld [vmem:[%s6529_s0 + $0xb0] sm:$0xff] }
  0x31   :  { %3060 = vmatmul.msk.f32.gmra.mxu0 %vm87_vm0, %v25_v12  ;;  %3099 = vmatmul.msk.f32.gmra.mxu2 %vm87_vm0, %v64_v13 }
  0x39   :  { %3061 = vmatmul.msk.f32.gmra.mxu0 %vm87_vm0, %v26_v14  ;;  %3100 = vmatmul.msk.f32.gmra.mxu2 %vm87_vm0, %v65_v15 }
  0x41   :  { %3062 = vmatmul.msk.f32.gmra.mxu0 %vm87_vm0, %v27_v16  ;;  %3101 = vmatmul.msk.f32.gmra.mxu2 %vm87_vm0, %v66_v17  ;;  %v43_v17 = vld [vmem:[%s6529_s0 + $0xb8] sm:$0xff] }
  0x49   :  { %3063 = vmatmul.msk.f32.gmra.mxu0 %vm87_vm0, %v28_v18  ;;  %3102 = vmatmul.msk.f32.gmra.mxu2 %vm87_vm0, %v67_v19 }
  0x51   :  { %3064 = vmatmul.msk.f32.gmra.mxu0 %vm87_vm0, %v29_v20  ;;  %3103 = vmatmul.msk.f32.gmra.mxu2 %vm87_vm0, %v68_v21 }
  0x59   :  { %3065 = vmatmul.msk.f32.gmra.mxu0 %vm87_vm0, %v30_v22  ;;  %3104 = vmatmul.msk.f32.gmra.mxu2 %vm87_vm0, %v69_v23 }
  0x61   :  { %3066 = vmatmul.msk.f32.gmra.mxu0 %vm87_vm0, %v31_v24  ;;  %3105 = vmatmul.msk.f32.gmra.mxu2 %vm87_vm0, %v70_v25  ;;  %v44_v24 = vld [vmem:[%s6529_s0 + $0xc0] sm:$0xff] }
  0x69   :  { %3067 = vmatmul.msk.f32.gmra.mxu0 %vm87_vm0, %v32_v26  ;;  %3106 = vmatmul.msk.f32.gmra.mxu2 %vm87_vm0, %v71_v27 }
  0x71   :  { %3068 = vmatmul.msk.f32.gmra.mxu0 %vm87_vm0, %v33_v28  ;;  %3107 = vmatmul.msk.f32.gmra.mxu2 %vm87_vm0, %v72_v29 }
  0x79   :  { %3069 = vmatmul.msk.f32.gmra.mxu0 %vm87_vm0, %v34_v30 }
  0x81   :  { %3070 = vmatmul.msk.f32.gmra.mxu0 %vm87_vm0, %v35_v31  ;;  %v45_v31 = vld [vmem:[%s6529_s0 + $0xc8] sm:$0xff] }
  0x86   :  { %v303_v33 = vpop.f32.mrf.mxu0 }
  0x87   :  { %v3664_v35 = vsub.f32 %v303_v33, %v3658_v32 }
  0x89   :  { %3071 = vmatmul.msk.f32.gmra.mxu0 %vm87_vm0, %v36_v34  ;;  %v563_v36 = vsel %vm562_vm1, %v3664_v35, -inf }
  0x8a   :  { %564 = vmax.xlane.f32.xlu0 %v563_v36 }
  0x8c   :  { %v420_v37 = vpop.f32.mrf.mxu2 }
  0x8d   :  { %v3670_v38 = vsub.f32 %v420_v37, %v3658_v32 }
  0x8e   :  { %v306_v39 = vpop.f32.mrf.mxu0 }
  0x8f   :  { %v680_v41 = vsel %vm562_vm1, %v3670_v38, -inf  ;;  %v3679_v43 = vsub.f32 %v306_v39, %v3658_v32 }
  0x91   :  { %3072 = vmatmul.msk.f32.gmra.mxu0 %vm87_vm0, %v37_v40  ;;  %v566_v48 = vsel %vm562_vm1, %v3679_v43, -inf }
  0x92   :  { %681 = vmax.xlane.f32.xlu0 %v680_v41  ;;  %v46_v41 = vld [vmem:[%s6529_s0 + $0xd0] sm:$0xff] }
  0x94   :  { %v423_v42 = vpop.f32.mrf.mxu2 }
  0x95   :  { %v3682_v44 = vsub.f32 %v423_v42, %v3658_v32 }
  0x96   :  { %v309_v45 = vpop.f32.mrf.mxu0 }
  0x97   :  { %v683_v47 = vsel %vm562_vm1, %v3682_v44, -inf  ;;  %v3693_v49 = vsub.f32 %v309_v45, %v3658_v32 }
  0x98   :  { %684 = vmax.xlane.f32.xlu1 %v683_v47 }
  0x99   :  { %3073 = vmatmul.msk.f32.gmra.mxu0 %vm87_vm0, %v38_v46  ;;  %v569_v55 = vsel %vm562_vm1, %v3693_v49, -inf }
  0x9a   :  { %567 = vmax.xlane.f32.xlu0 %v566_v48 }
  0x9c   :  { %v426_v50 = vpop.f32.mrf.mxu2 }
  0x9d   :  { %v3696_v51 = vsub.f32 %v426_v50, %v3658_v32  ;;  %v47_v50 = vld [vmem:[%s6529_s0 + $0xd8] sm:$0xff] }
  0x9e   :  { %v312_v52 = vpop.f32.mrf.mxu0 }
  0x9f   :  { %v686_v54 = vsel %vm562_vm1, %v3696_v51, -inf  ;;  %v3707_v56 = vsub.f32 %v312_v52, %v3658_v32 }
  0xa0   :  { %687 = vmax.xlane.f32.xlu2 %v686_v54  ;;  %570 = vmax.xlane.f32.xlu1 %v569_v55 }
  0xa1   :  { %3074 = vmatmul.msk.f32.gmra.mxu0 %vm87_vm0, %v39_v53  ;;  %v572_v63 = vsel %vm562_vm1, %v3707_v56, -inf }
  0xa4   :  { %v429_v57 = vpop.f32.mrf.mxu2 }
  0xa5   :  { %v3710_v58 = vsub.f32 %v429_v57, %v3658_v32 }
  0xa6   :  { %v315_v59 = vpop.f32.mrf.mxu0 }
  0xa7   :  { %v3716_v61 = vsub.f32 %v315_v59, %v3658_v32  ;;  %v689_v62 = vsel %vm562_vm1, %v3710_v58, -inf }
  0xa8   :  { %690 = vmax.xlane.f32.xlu0 %v689_v62  ;;  %573 = vmax.xlane.f32.xlu1 %v572_v63  ;;  %v48_v62 = vld [vmem:[%s6529_s0 + $0xe0] sm:$0xff] }
  0xa9   :  { %3075 = vmatmul.msk.f32.gmra.mxu0 %vm87_vm0, %v40_v60  ;;  %v575_v0 = vsel %vm562_vm1, %v3716_v61, -inf }
  0xaa   :  { %576 = vmax.xlane.f32.xlu2 %v575_v0 }
  0xac   :  { %v432_v1 = vpop.f32.mrf.mxu2 }
  0xad   :  { %v3726_v2 = vsub.f32 %v432_v1, %v3658_v32 }
  0xae   :  { %v318_v3 = vpop.f32.mrf.mxu0 }
  0xaf   :  { %v692_v5 = vsel %vm562_vm1, %v3726_v2, -inf  ;;  %v3735_v7 = vsub.f32 %v318_v3, %v3658_v32 }
  0xb1   :  { %3076 = vmatmul.msk.f32.gmra.mxu0 %vm87_vm0, %v41_v4  ;;  %v578_v12 = vsel %vm562_vm1, %v3735_v7, -inf }
  0xb2   :  { %693 = vmax.xlane.f32.xlu2 %v692_v5 }
  0xb4   :  { %v435_v6 = vpop.f32.mrf.mxu2 }
  0xb5   :  { %v3738_v8 = vsub.f32 %v435_v6, %v3658_v32  ;;  %v49_v6 = vld [vmem:[%s6529_s0 + $0xe8] sm:$0xff] }
  0xb6   :  { %v321_v9 = vpop.f32.mrf.mxu0 }
  0xb7   :  { %v695_v11 = vsel %vm562_vm1, %v3738_v8, -inf  ;;  %v3749_v13 = vsub.f32 %v321_v9, %v3658_v32 }
  0xb8   :  { %696 = vmax.xlane.f32.xlu1 %v695_v11 }
  0xb9   :  { %3077 = vmatmul.msk.f32.gmra.mxu0 %vm87_vm0, %v42_v10  ;;  %v581_v19 = vsel %vm562_vm1, %v3749_v13, -inf }
  0xba   :  { %579 = vmax.xlane.f32.xlu2 %v578_v12 }
  0xbc   :  { %v438_v14 = vpop.f32.mrf.mxu2 }
  0xbd   :  { %v3752_v15 = vsub.f32 %v438_v14, %v3658_v32 }
  0xbe   :  { %v324_v16 = vpop.f32.mrf.mxu0 }
  0xbf   :  { %v698_v18 = vsel %vm562_vm1, %v3752_v15, -inf  ;;  %v3763_v20 = vsub.f32 %v324_v16, %v3658_v32 }
  0xc0   :  { %699 = vmax.xlane.f32.xlu0 %v698_v18  ;;  %582 = vmax.xlane.f32.xlu1 %v581_v19  ;;  %v6536_v19 = vlaneseq }
  0xc1   :  { %3078 = vmatmul.msk.f32.gmra.mxu0 %vm87_vm0, %v43_v17  ;;  %v584_v26 = vsel %vm562_vm1, %v3763_v20, -inf  ;;  %v50_v17 = vld [vmem:[%s6529_s0 + $0xf0] sm:$0xff] }
  0xc4   :  { %v441_v21 = vpop.f32.mrf.mxu2 }
  0xc5   :  { %v3766_v22 = vsub.f32 %v441_v21, %v3658_v32 }
  0xc6   :  { %v327_v23 = vpop.f32.mrf.mxu0 }
  0xc7   :  { %v701_v25 = vsel %vm562_vm1, %v3766_v22, -inf  ;;  %v3777_v27 = vsub.f32 %v327_v23, %v3658_v32 }
  0xc8   :  { %702 = vmax.xlane.f32.xlu2 %v701_v25  ;;  %585 = vmax.xlane.f32.xlu0 %v584_v26 }
  0xc9   :  { %3079 = vmatmul.msk.f32.gmra.mxu0 %vm87_vm0, %v44_v24  ;;  %v587_v34 = vsel %vm562_vm1, %v3777_v27, -inf  ;;  %v3864_v24 = vand.u32 127, %v6536_v19 }
  0xcc   :  { %v444_v28 = vpop.f32.mrf.mxu2 }
  0xcd   :  { %v3780_v29 = vsub.f32 %v444_v28, %v3658_v32 }
  0xce   :  { %v330_v30 = vpop.f32.mrf.mxu0 }
  0xcf   :  { %v704_v33 = vsel %vm562_vm1, %v3780_v29, -inf  ;;  %v3791_v36 = vsub.f32 %v330_v30, %v3658_v32  ;;  %v51_v30 = vld [vmem:[%s6529_s0 + $0xf8] sm:$0xff] }
  0xd0   :  { %705 = vmax.xlane.f32.xlu1 %v704_v33  ;;  %588 = vmax.xlane.f32.xlu2 %v587_v34 }
  0xd1   :  { %3080 = vmatmul.msk.f32.gmra.mxu0 %vm87_vm0, %v45_v31  ;;  %v590_v45 = vsel %vm562_vm1, %v3791_v36, -inf }
  0xd4   :  { %v447_v37 = vpop.f32.mrf.mxu2 }
  0xd5   :  { %v3794_v39 = vsub.f32 %v447_v37, %v3658_v32 }
  0xd6   :  { %v333_v40 = vpop.f32.mrf.mxu0 }
  0xd7   :  { %v707_v42 = vsel %vm562_vm1, %v3794_v39, -inf  ;;  %v3805_v46 = vsub.f32 %v333_v40, %v3658_v32 }
  0xd8   :  { %708 = vmax.xlane.f32.xlu0 %v707_v42  ;;  %591 = vmax.xlane.f32.xlu1 %v590_v45  ;;  %v52_v45 = vld [vmem:[%s6529_s0 + $0x100] sm:$0xff] }
  0xd9   :  { %3081 = vmatmul.msk.f32.gmra.mxu0 %vm87_vm0, %v46_v41  ;;  %v593_v53 = vsel %vm562_vm1, %v3805_v46, -inf }
  0xdc   :  { %v450_v47 = vpop.f32.mrf.mxu2 }
  0xdd   :  { %v3818_v55 = vsub.f32 %v450_v47, %v3658_v32 }
  0xde   :  { %v336_v48 = vpop.f32.mrf.mxu0 }
  0xdf   :  { %v3811_v52 = vsub.f32 %v336_v48, %v3658_v32  ;;  %6638 = vst [vmem:[#allocation9_spill] sm:$0xff] %v3818_v55  ;;  %v710_v59 = vsel %vm562_vm1, %v3818_v55, -inf }
  0xe0   :  { %594 = vmax.xlane.f32.xlu0 %v593_v53 }
  0xe1   :  { %v596_v54 = vsel %vm562_vm1, %v3811_v52, -inf  ;;  %3082 = vmatmul.msk.f32.gmra.mxu0 %vm87_vm0, %v47_v50 }
  0xe2   :  { %597 = vmax.xlane.f32.xlu2 %v596_v54 }
  0xe4   :  { %v453_v57 = vpop.f32.mrf.mxu2 }
  0xe5   :  { %v3832_v1 = vsub.f32 %v453_v57, %v3658_v32 }
  0xe6   :  { %v339_v60 = vpop.f32.mrf.mxu0 }
  0xe7   :  { %v3827_v63 = vsub.f32 %v339_v60, %v3658_v32  ;;  %6639 = vst [vmem:[#allocation10_spill] sm:$0xff] %v3832_v1  ;;  %v713_v4 = vsel %vm562_vm1, %v3832_v1, -inf }
  0xe8   :  { %711 = vmax.xlane.f32.xlu0 %v710_v59 }
  0xe9   :  { %v599_v0 = vsel %vm562_vm1, %v3827_v63, -inf  ;;  %3083 = vmatmul.msk.f32.gmra.mxu0 %vm87_vm0, %v48_v62  ;;  %v53_v62 = vld [vmem:[%s6529_s0 + $0x108] sm:$0xff] }
  0xea   :  { %600 = vmax.xlane.f32.xlu2 %v599_v0 }
  0xec   :  { %v456_v3 = vpop.f32.mrf.mxu2 }
  0xed   :  { %v3846_v11 = vsub.f32 %v456_v3, %v3658_v32 }
  0xee   :  { %v342_v5 = vpop.f32.mrf.mxu0 }
  0xef   :  { %v3841_v9 = vsub.f32 %v342_v5, %v3658_v32  ;;  %6640 = vst [vmem:[#allocation11_spill] sm:$0xff] %v3846_v11  ;;  %v716_v12 = vsel %vm562_vm1, %v3846_v11, -inf }
  0xf0   :  { %714 = vmax.xlane.f32.xlu0 %v713_v4 }
  0xf1   :  { %v602_v10 = vsel %vm562_vm1, %v3841_v9, -inf  ;;  %3084 = vmatmul.msk.f32.gmra.mxu0 %vm87_vm0, %v49_v6 }
  0xf2   :  { %603 = vmax.xlane.f32.xlu2 %v602_v10 }
  0xf4   :  { %v459_v16 = vpop.f32.mrf.mxu2 }
  0xf5   :  { %v3860_v23 = vsub.f32 %v459_v16, %v3658_v32 }
  0xf6   :  { %v345_v14 = vpop.f32.mrf.mxu0 }
  0xf7   :  { %v3855_v18 = vsub.f32 %v345_v14, %v3658_v32  ;;  %6641 = vst [vmem:[#allocation12_spill] sm:$0xff] %v3860_v23  ;;  %v719_v26 = vsel %vm562_vm1, %v3860_v23, -inf }
  0xf8   :  { %717 = vmax.xlane.f32.xlu0 %v716_v12 }
  0xf9   :  { %v605_v21 = vsel %vm562_vm1, %v3855_v18, -inf  ;;  %3085 = vmatmul.msk.f32.gmra.mxu0 %vm87_vm0, %v50_v17 }
  0xfa   :  { %606 = vmax.xlane.f32.xlu2 %v605_v21 }
  0xfd   :  { %v565_v25 = vpop.xlane.xlu0 %564 }
  0xfe   :  { %vm757_vm2 = vcmp.eq.f32.partialorder %v3664_v35, %v565_v25  ;;  %v348_v28 = vpop.f32.mrf.mxu0 }
  0xff   :  { %v821_v31 = vsel %vm757_vm2, %v3864_v24, 16  ;;  %v3874_v33 = vsub.f32 %v348_v28, %v3658_v32  ;;  %v54_v28 = vld [vmem:[%s6529_s0 + $0x110] sm:$0xff] }
 0x100   :  { %720 = vmax.xlane.f32.xlu0 %v719_v26  ;;  %v3877_v34 = vsel %vm562_vm1, %v821_v31, 2147483647 }
 0x101   :  { %v608_v37 = vsel %vm562_vm1, %v3874_v33, -inf  ;;  %3086 = vmatmul.msk.f32.gmra.mxu0 %vm87_vm0, %v51_v30  ;;  %v887_v35 = vshra.s32 %v3877_v34, 16 }
 0x102   :  { %609 = vmax.xlane.f32.xlu2 %v608_v37 }
 0x103   :  { %v3884_v42 = vcvt.s32.f32 %v887_v35 }
 0x105   :  { %v682_v40 = vpop.xlane.xlu0 %681 }
 0x106   :  { %vm796_vm3 = vcmp.eq.f32.partialorder %v3670_v38, %v682_v40  ;;  %v351_v41 = vpop.f32.mrf.mxu0 }
 0x107   :  { %v860_v47 = vsel %vm796_vm3, %v3864_v24, 16  ;;  %v3897_v38 = vsub.f32 %v351_v41, %v3658_v32 }
 0x108   :  { %890 = vmin.xlane.f32.xlu0 %v3884_v42  ;;  %v3892_v48 = vsel %vm562_vm1, %v860_v47, 2147483647 }
 0x109   :  { %v1472_v50 = vshra.s32 %v3892_v48, 16  ;;  %3087 = vmatmul.msk.f32.gmra.mxu0 %vm87_vm0, %v52_v45 }
 0x10b   :  { %v685_v53 = vpop.xlane.xlu1 %684  ;;  %v3899_v54 = vcvt.s32.f32 %v1472_v50 }
 0x10c   :  { %vm797_vm4 = vcmp.eq.f32.partialorder %v3682_v44, %v685_v53  ;;  %v611_v44 = vsel %vm562_vm1, %v3897_v38, -inf }
 0x10d   :  { %v568_v57 = vpop.xlane.xlu0 %567  ;;  %1475 = vmin.xlane.f32.xlu2 %v3899_v54  ;;  %v861_v59 = vsel %vm797_vm4, %v3864_v24, 16 }
 0x10e   :  { %vm758_vm5 = vcmp.eq.f32.partialorder %v3679_v43, %v568_v57  ;;  %v354_v60 = vpop.f32.mrf.mxu0  ;;  %v3922_v6 = vsel %vm562_vm1, %v861_v59, 2147483647 }
 0x10f   :  { %v822_v0 = vsel %vm758_vm5, %v3864_v24, 16  ;;  %v3910_v3 = vsub.f32 %v354_v60, %v3658_v32  ;;  %v1487_v16 = vshra.s32 %v3922_v6, 16 }
 0x110   :  { %612 = vmax.xlane.f32.xlu0 %v611_v44  ;;  %v3915_v4 = vsel %vm562_vm1, %v822_v0, 2147483647 }
 0x111   :  { %v614_v43 = vsel %vm562_vm1, %v3910_v3, -inf  ;;  %v902_v5 = vshra.s32 %v3915_v4, 16  ;;  %3088 = vmatmul.msk.f32.gmra.mxu0 %vm87_vm0, %v53_v62  ;;  %v3942_v30 = vcvt.s32.f32 %v1487_v16 }
 0x112   :  { %615 = vmax.xlane.f32.xlu1 %v614_v43  ;;  %v73_v43 = vld [vmem:[%s6529_s0 + $0x1a8] sm:$0xff] }
 0x113   :  { %v688_v10 = vpop.xlane.xlu2 %687  ;;  %v571_v12 = vpop.xlane.xlu1 %570  ;;  %v3924_v14 = vcvt.s32.f32 %v902_v5  ;;  %3108 = vmatmul.msk.f32.gmra.mxu2 %vm87_vm0, %v73_v43 }
 0x114   :  { %vm798_vm6 = vcmp.eq.f32.partialorder %v3696_v51, %v688_v10  ;;  %vm759_vm7 = vcmp.eq.f32.partialorder %v3693_v49, %v571_v12 }
 0x115   :  { %v862_v17 = vsel %vm798_vm6, %v3864_v24, 16  ;;  %905 = vmin.xlane.f32.xlu2 %v3924_v14  ;;  %v823_v21 = vsel %vm759_vm7, %v3864_v24, 16 }
 0x116   :  { %v357_v25 = vpop.f32.mrf.mxu0  ;;  %v3933_v26 = vsel %vm562_vm1, %v862_v17, 2147483647  ;;  %v3948_v37 = vsel %vm562_vm1, %v823_v21, 2147483647  ;;  %v56_v21 = vld [vmem:[%s6529_s0 + $0x120] sm:$0xff] }
 0x117   :  { %v1502_v51 = vshra.s32 %v3933_v26, 16  ;;  %v3940_v49 = vsub.f32 %v357_v25, %v3658_v32  ;;  %v917_v45 = vshra.s32 %v3948_v37, 16 }
 0x119   :  { %v3944_v31 = vcvt.s32.f32 %v1502_v51  ;;  %3089 = vmatmul.msk.f32.gmra.mxu0 %vm87_vm0, %v54_v28  ;;  %v617_v41 = vsel %vm562_vm1, %v3940_v49, -inf  ;;  %v3971_v0 = vcvt.s32.f32 %v917_v45 }
 0x11a   :  { %1490 = vmin.xlane.f32.xlu1 %v3942_v30 }
 0x11b   :  { %v691_v35 = vpop.xlane.xlu0 %690  ;;  %v574_v40 = vpop.xlane.xlu1 %573  ;;  %1505 = vmin.xlane.f32.xlu0 %v3944_v31 }
 0x11c   :  { %vm799_vm8 = vcmp.eq.f32.partialorder %v3710_v58, %v691_v35  ;;  %vm760_vm9 = vcmp.eq.f32.partialorder %v3707_v56, %v574_v40  ;;  %v55_v56 = vld [vmem:[%s6529_s0 + $0x118] sm:$0xff] }
 0x11d   :  { %v863_v47 = vsel %vm799_vm8, %v3864_v24, 16  ;;  %v824_v50 = vsel %vm760_vm9, %v3864_v24, 16  ;;  %v577_v53 = vpop.xlane.xlu2 %576  ;;  %618 = vmax.xlane.f32.xlu2 %v617_v41 }
 0x11e   :  { %vm761_vm10 = vcmp.eq.f32.partialorder %v3716_v61, %v577_v53  ;;  %v360_v57 = vpop.f32.mrf.mxu0  ;;  %v3961_v59 = vsel %vm562_vm1, %v824_v50, 2147483647  ;;  %v3964_v58 = vsel %vm562_vm1, %v863_v47, 2147483647  ;;  %v57_v53 = vld [vmem:[%s6529_s0 + $0x128] sm:$0xff] }
 0x11f   :  { %v932_v60 = vshra.s32 %v3961_v59, 16  ;;  %v1517_v62 = vshra.s32 %v3964_v58, 16  ;;  %v825_v44 = vsel %vm761_vm10, %v3864_v24, 16  ;;  %v3990_v16 = vsub.f32 %v360_v57, %v3658_v32 }
 0x120   :  { %v3986_v10 = vsel %vm562_vm1, %v825_v44, 2147483647 }
 0x121   :  { %v3974_v61 = vcvt.s32.f32 %v932_v60  ;;  %3090 = vmatmul.msk.f32.gmra.mxu0 %vm87_vm0, %v55_v56  ;;  %v3982_v5 = vcvt.s32.f32 %v1517_v62  ;;  %v947_v28 = vshra.s32 %v3986_v10, 16 }
 0x122   :  { %920 = vmin.xlane.f32.xlu1 %v3971_v0 }
 0x123   :  { %935 = vmin.xlane.f32.xlu0 %v3974_v61  ;;  %v4006_v41 = vcvt.s32.f32 %v947_v28 }
 0x125   :  { %v694_v12 = vpop.xlane.xlu2 %693  ;;  %1520 = vmin.xlane.f32.xlu2 %v3982_v5 }
 0x126   :  { %vm800_vm11 = vcmp.eq.f32.partialorder %v3726_v2, %v694_v12  ;;  %v363_v17 = vpop.f32.mrf.mxu0  ;;  %v620_v2 = vsel %vm562_vm1, %v3990_v16, -inf }
 0x127   :  { %v3997_v25 = vsub.f32 %v363_v17, %v3658_v32  ;;  %v864_v51 = vsel %vm800_vm11, %v3864_v24, 16 }
 0x128   :  { %v4009_v45 = vsel %vm562_vm1, %v864_v51, 2147483647  ;;  %v58_v51 = vld [vmem:[%s6529_s0 + $0x130] sm:$0xff] }
 0x129   :  { %v623_v35 = vsel %vm562_vm1, %v3997_v25, -inf  ;;  %3091 = vmatmul.msk.f32.gmra.mxu0 %vm87_vm0, %v56_v21  ;;  %v1532_v56 = vshra.s32 %v4009_v45, 16 }
 0x12a   :  { %624 = vmax.xlane.f32.xlu1 %v623_v35 }
 0x12b   :  { %v697_v40 = vpop.xlane.xlu1 %696  ;;  %621 = vmax.xlane.f32.xlu0 %v620_v2  ;;  %v4023_v12 = vcvt.s32.f32 %v1532_v56 }
 0x12c   :  { %vm801_vm14 = vcmp.eq.f32.partialorder %v3738_v8, %v697_v40 }
 0x12d   :  { %v580_v47 = vpop.xlane.xlu2 %579  ;;  %950 = vmin.xlane.f32.xlu2 %v4006_v41  ;;  %v865_v2 = vsel %vm801_vm14, %v3864_v24, 16 }
 0x12e   :  { %vm762_vm12 = vcmp.eq.f32.partialorder %v3735_v7, %v580_v47  ;;  %v366_v50 = vpop.f32.mrf.mxu0 }
 0x12f   :  { %v826_v57 = vsel %vm762_vm12, %v3864_v24, 16 }
 0x130   :  { %v4019_v60 = vsel %vm562_vm1, %v826_v57, 2147483647  ;;  %v4049_v57 = vsel %vm562_vm1, %v865_v2, 2147483647 }
 0x131   :  { %v962_v62 = vshra.s32 %v4019_v60, 16  ;;  %3092 = vmatmul.msk.f32.gmra.mxu0 %vm87_vm0, %v57_v53 }
 0x133   :  { %v700_v44 = vpop.xlane.xlu0 %699  ;;  %v583_v43 = vpop.xlane.xlu1 %582  ;;  %v4025_v7 = vcvt.s32.f32 %v962_v62  ;;  %v1547_v62 = vshra.s32 %v4049_v57, 16 }
 0x134   :  { %vm763_vm13 = vcmp.eq.f32.partialorder %v3749_v13, %v583_v43  ;;  %v4040_v13 = vsub.f32 %v366_v50, %v3658_v32  ;;  %vm802_vm15 = vcmp.eq.f32.partialorder %v3752_v15, %v700_v44 }
 0x135   :  { %v827_v17 = vsel %vm763_vm13, %v3864_v24, 16  ;;  %1535 = vmin.xlane.f32.xlu2 %v4023_v12  ;;  %965 = vmin.xlane.f32.xlu1 %v4025_v7 }
 0x136   :  { %v369_v21 = vpop.f32.mrf.mxu0  ;;  %v4033_v28 = vsel %vm562_vm1, %v827_v17, 2147483647  ;;  %v626_v40 = vsel %vm562_vm1, %v4040_v13, -inf  ;;  %v866_v17 = vsel %vm802_vm15, %v3864_v24, 16 }
 0x137   :  { %v977_v35 = vshra.s32 %v4033_v28, 16  ;;  %v4059_v43 = vsub.f32 %v369_v21, %v3658_v32 }
 0x139   :  { %3093 = vmatmul.msk.f32.gmra.mxu0 %vm87_vm0, %v58_v51  ;;  %v4044_v8 = vcvt.s32.f32 %v977_v35  ;;  %v629_v2 = vsel %vm562_vm1, %v4059_v43, -inf }
 0x13b   :  { %v703_v47 = vpop.xlane.xlu2 %702  ;;  %v586_v53 = vpop.xlane.xlu0 %585 }
 0x13c   :  { %vm764_vm2 = vcmp.eq.f32.partialorder %v3763_v20, %v586_v53  ;;  %v4065_v20 = vcvt.s32.f32 %v1547_v62  ;;  %v4070_v53 = vsel %vm562_vm1, %v866_v17, 2147483647  ;;  %vm803_vm3 = vcmp.eq.f32.partialorder %v3766_v22, %v703_v47 }
 0x13d   :  { %980 = vmin.xlane.f32.xlu1 %v4044_v8  ;;  %627 = vmax.xlane.f32.xlu2 %v626_v40  ;;  %v828_v51 = vsel %vm764_vm2, %v3864_v24, 16 }
 0x13e   :  { %v372_v50 = vpop.f32.mrf.mxu0  ;;  %v4073_v21 = vsel %vm562_vm1, %v828_v51, 2147483647 }
 0x13f   :  { %v4055_v56 = vsub.f32 %v372_v50, %v3658_v32  ;;  %6642 = vst [vmem:[#allocation13_spill] sm:$0xff] %v4073_v21  ;;  %v1562_v50 = vshra.s32 %v4070_v53, 16  ;;  %v992_v62 = vshra.s32 %v4073_v21, 16 }
 0x141   :  { %v632_v35 = vsel %vm562_vm1, %v4055_v56, -inf  ;;  %v4084_v23 = vcvt.s32.f32 %v1562_v50  ;;  %v4086_v11 = vcvt.s32.f32 %v992_v62 }
 0x142   :  { %633 = vmax.xlane.f32.xlu0 %v632_v35  ;;  %v867_v35 = vsel %vm803_vm3, %v3864_v24, 16 }
 0x143   :  { %v706_v15 = vpop.xlane.xlu1 %705  ;;  %v589_v44 = vpop.xlane.xlu2 %588  ;;  %6643 = vst [vmem:[#allocation14_spill] sm:$0xff] %v4086_v11  ;;  %v4089_v22 = vsel %vm562_vm1, %v867_v35, 2147483647 }
 0x144   :  { %vm765_vm4 = vcmp.eq.f32.partialorder %v3777_v27, %v589_v44  ;;  %v1577_v44 = vshra.s32 %v4089_v22, 16  ;;  %vm804_vm6 = vcmp.eq.f32.partialorder %v3780_v29, %v706_v15 }
 0x145   :  { %1550 = vmin.xlane.f32.xlu2 %v4065_v20  ;;  %630 = vmax.xlane.f32.xlu1 %v629_v2  ;;  %v829_v17 = vsel %vm765_vm4, %v3864_v24, 16 }
 0x146   :  { %v375_v40 = vpop.f32.mrf.mxu0  ;;  %v4092_v27 = vsel %vm562_vm1, %v829_v17, 2147483647  ;;  %v4100_v1 = vcvt.s32.f32 %v1577_v44 }
 0x147   :  { %v1007_v2 = vshra.s32 %v4092_v27, 16 }
 0x149   :  { %v4102_v35 = vcvt.s32.f32 %v1007_v2 }
 0x14b   :  { %v4082_v19 = vpop.xlane.xlu0 %708  ;;  %v592_v51 = vpop.xlane.xlu1 %591 }
 0x14c   :  { %vm766_vm5 = vcmp.eq.f32.partialorder %v3791_v36, %v592_v51 }
 0x14d   :  { %1565 = vmin.xlane.f32.xlu2 %v4084_v23  ;;  %995 = vmin.xlane.f32.xlu1 %v4086_v11  ;;  %v830_v50 = vsel %vm766_vm5, %v3864_v24, 16  ;;  %v868_v11 = vsel %vm804_vm6, %v3864_v24, 16 }
 0x14e   :  { %v378_v47 = vpop.f32.mrf.mxu0  ;;  %v4105_v17 = vsel %vm562_vm1, %v830_v50, 2147483647  ;;  %v4117_v50 = vsub.f32 %v375_v40, %v3658_v32  ;;  %v4133_v40 = vsel %vm562_vm1, %v868_v11, 2147483647 }
 0x14f   :  { %6644 = vst [vmem:[#allocation15_spill] sm:$0xff] %v4105_v17  ;;  %v1022_v2 = vshra.s32 %v4105_v17, 16 }
 0x150   :  { %v635_v15 = vsel %vm562_vm1, %v4117_v50, -inf }
 0x153   :  { %v595_v62 = vpop.xlane.xlu0 %594 }
 0x154   :  { %vm767_vm8 = vcmp.eq.f32.partialorder %v3805_v46, %v595_v62 }
 0x155   :  { %v598_v55 = vpop.xlane.xlu2 %597  ;;  %1580 = vmin.xlane.f32.xlu2 %v4100_v1  ;;  %1010 = vmin.xlane.f32.xlu1 %v4102_v35 }
 0x156   :  { %vm768_vm7 = vcmp.eq.f32.partialorder %v3811_v52, %v598_v55  ;;  %v381_v36 = vpop.f32.mrf.mxu0  ;;  %v4127_v55 = vcvt.s32.f32 %v1022_v2  ;;  %v4140_v2 = vsub.f32 %v378_v47, %v3658_v32 }
 0x157   :  { %v832_v51 = vsel %vm768_vm7, %v3864_v24, 16  ;;  %v4113_v44 = vsub.f32 %v381_v36, %v3658_v32 }
 0x158   :  { %v4123_v29 = vsel %vm562_vm1, %v832_v51, 2147483647  ;;  %v1592_v51 = vshra.s32 %v4133_v40, 16  ;;  %6648 = vst [vmem:[#allocation19_spill] sm:$0xff] %v4140_v2  ;;  %v638_v62 = vsel %vm562_vm1, %v4140_v2, -inf }
 0x159   :  { %6645 = vst [vmem:[#allocation16_spill] sm:$0xff] %v4113_v44  ;;  %v641_v21 = vsel %vm562_vm1, %v4113_v44, -inf  ;;  %v1052_v36 = vshra.s32 %v4123_v29, 16 }
 0x15a   :  { %6646 = vst [vmem:[#allocation17_spill] sm:$0xff] %v4123_v29  ;;  %642 = vmax.xlane.f32.xlu0 %v641_v21  ;;  %v831_v29 = vsel %vm767_vm8, %v3864_v24, 16 }
 0x15b   :  { %v4125_v52 = vpop.xlane.xlu0 %711  ;;  %v4157_v47 = vsel %vm562_vm1, %v831_v29, 2147483647 }
 0x15c   :  { %6647 = vst [vmem:[#allocation18_spill] sm:$0xff] %v4125_v52  ;;  %v4142_v52 = vcvt.s32.f32 %v1052_v36 }
 0x15d   :  { %v601_v17 = vpop.xlane.xlu2 %600  ;;  %1025 = vmin.xlane.f32.xlu1 %v4127_v55  ;;  %636 = vmax.xlane.f32.xlu2 %v635_v15 }
 0x15e   :  { %vm769_vm9 = vcmp.eq.f32.partialorder %v3827_v63, %v601_v17  ;;  %v384_v21 = vpop.f32.mrf.mxu0  ;;  %6649 = vst [vmem:[#allocation20_spill] sm:$0xff] %v4142_v52  ;;  %v4152_v63 = vcvt.s32.f32 %v1592_v51  ;;  %v1037_v51 = vshra.s32 %v4157_v47, 16 }
 0x15f   :  { %v833_v11 = vsel %vm769_vm9, %v3864_v24, 16  ;;  %v4150_v46 = vsub.f32 %v384_v21, %v3658_v32 }
 0x160   :  { %v4160_v17 = vsel %vm562_vm1, %v833_v11, 2147483647  ;;  %v4174_v2 = vcvt.s32.f32 %v1037_v51 }
 0x161   :  { %6651 = vst [vmem:[#allocation22_spill] sm:$0xff] %v4150_v46  ;;  %v644_v21 = vsel %vm562_vm1, %v4150_v46, -inf }
 0x162   :  { %1055 = vmin.xlane.f32.xlu0 %v4142_v52  ;;  %6654 = vst [vmem:[#allocation25_spill] sm:$0xff] %v4174_v2 }
 0x163   :  { %v4147_v44 = vpop.xlane.xlu0 %714 }
 0x164   :  { %6650 = vst [vmem:[#allocation21_spill] sm:$0xff] %v4147_v44  ;;  %v1067_v44 = vshra.s32 %v4160_v17, 16 }
 0x165   :  { %v604_v15 = vpop.xlane.xlu2 %603  ;;  %1595 = vmin.xlane.f32.xlu2 %v4152_v63  ;;  %639 = vmax.xlane.f32.xlu1 %v638_v62 }
 0x166   :  { %vm770_vm10 = vcmp.eq.f32.partialorder %v3841_v9, %v604_v15  ;;  %v387_v36 = vpop.f32.mrf.mxu0  ;;  %v4176_v62 = vcvt.s32.f32 %v1067_v44 }
 0x167   :  { %v834_v29 = vsel %vm770_vm10, %v3864_v24, 16  ;;  %v4172_v11 = vsub.f32 %v387_v36, %v3658_v32 }
 0x168   :  { %v4179_v9 = vsel %vm562_vm1, %v834_v29, 2147483647 }
 0x169   :  { %6653 = vst [vmem:[#allocation24_spill] sm:$0xff] %v4172_v11 }
 0x16a   :  { %645 = vmax.xlane.f32.xlu0 %v644_v21  ;;  %6655 = vst [vmem:[#allocation26_spill] sm:$0xff] %v4179_v9  ;;  %v647_v21 = vsel %vm562_vm1, %v4172_v11, -inf }
 0x16b   :  { %v4169_v52 = vpop.xlane.xlu0 %717 }
 0x16c   :  { %6652 = vst [vmem:[#allocation23_spill] sm:$0xff] %v4169_v52  ;;  %v1082_v52 = vshra.s32 %v4179_v9, 16 }
 0x16d   :  { %v607_v15 = vpop.xlane.xlu2 %606  ;;  %1040 = vmin.xlane.f32.xlu2 %v4174_v2  ;;  %1070 = vmin.xlane.f32.xlu1 %v4176_v62 }
 0x16e   :  { %v390_v46 = vpop.f32.mrf.mxu0  ;;  %vm771_vm11 = vcmp.eq.f32.partialorder %v3855_v18, %v607_v15  ;;  %v4190_v36 = vcvt.s32.f32 %v1082_v52 }
 0x16f   :  { %v4188_v44 = vsub.f32 %v390_v46, %v3658_v32  ;;  %v835_v2 = vsel %vm771_vm11, %v3864_v24, 16 }
 0x170   :  { %6657 = vst [vmem:[#allocation28_spill] sm:$0xff] %v4190_v36  ;;  %v4205_v15 = vsel %vm562_vm1, %v835_v2, 2147483647 }
 0x171   :  { %6656 = vst [vmem:[#allocation27_spill] sm:$0xff] %v4188_v44  ;;  %v650_v18 = vsel %vm562_vm1, %v4188_v44, -inf }
 0x172   :  { %648 = vmax.xlane.f32.xlu0 %v647_v21  ;;  %6659 = vst [vmem:[#allocation30_spill] sm:$0xff] %v4205_v15 }
 0x173   :  { %v4192_v51 = vpop.xlane.xlu0 %720 }
 0x174   :  { %6658 = vst [vmem:[#allocation29_spill] sm:$0xff] %v4192_v51  ;;  %v1097_v51 = vshra.s32 %v4205_v15, 16 }
 0x175   :  { %v610_v29 = vpop.xlane.xlu2 %609  ;;  %1085 = vmin.xlane.f32.xlu2 %v4190_v36 }
 0x176   :  { %vm772_vm12 = vcmp.eq.f32.partialorder %v3874_v33, %v610_v29  ;;  %v393_v11 = vpop.f32.mrf.mxu0  ;;  %v1471_v29 = vand.u32 65535, %v3892_v48 }
 0x177   :  { %v836_v9 = vsel %vm772_vm12, %v3864_v24, 16 }
 0x178   :  { %v4201_v46 = vsel %vm562_vm1, %v836_v9, 2147483647  ;;  %v4216_v9 = vcvt.s32.f32 %v1097_v51  ;;  %v1473_v2 = vcvt.s32.f32 %v1471_v29 }
 0x179   :  { %v1112_v52 = vshra.s32 %v4201_v46, 16 }
 0x17a   :  { %651 = vmax.xlane.f32.xlu0 %v650_v18  ;;  %6661 = vst [vmem:[#allocation32_spill] sm:$0xff] %v4216_v9  ;;  %v4222_v18 = vsub.f32 %v393_v11, %v3658_v32 }
 0x17b   :  { %v4207_v21 = vcvt.s32.f32 %v1112_v52  ;;  %v4212_v36 = vpop.xlane.xlu0 %890  ;;  %v74_v52 = vld [vmem:[%s6529_s0 + $0x1b0] sm:$0xff] }
 0x17c   :  { %6662 = vst [vmem:[#allocation33_spill] sm:$0xff] %v4222_v18  ;;  %3109 = vmatmul.msk.f32.gmra.mxu2 %vm87_vm0, %v74_v52  ;;  %v653_v29 = vsel %vm562_vm1, %v4222_v18, -inf  ;;  %v1486_v52 = vand.u32 65535, %v3922_v6  ;;  %vm892_vm2 = vcmp.eq.f32.partialorder %v3884_v42, %v4212_v36  ;;  %v76_v42 = vld [vmem:[%s6529_s0 + $0x1c0] sm:$0xff] }
 0x17d   :  { %1115 = vmin.xlane.f32.xlu1 %v4207_v21 }
 0x17e   :  { %v396_v33 = vpop.f32.mrf.mxu0 }
 0x180   :  { %v4214_v44 = vpop.xlane.xlu2 %1475 }
 0x181   :  { %6660 = vst [vmem:[#allocation31_spill] sm:$0xff] %v4214_v44  ;;  %vm1477_vm13 = vcmp.eq.f32.partialorder %v3899_v54, %v4214_v44 }
 0x182   :  { %1100 = vmin.xlane.f32.xlu0 %v4216_v9  ;;  %v1478_v48 = vsel %vm1477_vm13, %v1473_v2, inf }
 0x183   :  { %v613_v9 = vpop.xlane.xlu0 %612 }
 0x184   :  { %vm773_vm5 = vcmp.eq.f32.partialorder %v3897_v38, %v613_v9 }
 0x185   :  { %v616_v15 = vpop.xlane.xlu1 %615  ;;  %1479 = vmin.xlane.f32.xlu1 %v1478_v48 }
 0x186   :  { %vm774_vm14 = vcmp.eq.f32.partialorder %v3910_v3, %v616_v15  ;;  %v4229_v51 = vpop.f32.mrf.mxu0  ;;  %v886_v3 = vand.u32 65535, %v3877_v34  ;;  %v75_v15 = vld [vmem:[%s6529_s0 + $0x1b8] sm:$0xff] }
 0x187   :  { %v838_v54 = vsel %vm774_vm14, %v3864_v24, 16  ;;  %3110 = vmatmul.msk.f32.gmra.mxu2 %vm87_vm0, %v75_v15  ;;  %vm805_vm14 = vcmp.eq.f32.partialorder %v3794_v39, %v4082_v19 }
 0x188   :  { %v4234_v11 = vpop.xlane.xlu2 %905  ;;  %v4237_v44 = vsel %vm562_vm1, %v838_v54, 2147483647  ;;  %v1488_v54 = vcvt.s32.f32 %v1486_v52  ;;  %v4262_v52 = vsub.f32 %v396_v33, %v3658_v32 }
 0x189   :  { %6663 = vst [vmem:[#allocation34_spill] sm:$0xff] %v4237_v44  ;;  %v1142_v2 = vshra.s32 %v4237_v44, 16  ;;  %vm907_vm7 = vcmp.eq.f32.partialorder %v3924_v14, %v4234_v11 }
 0x18a   :  { %654 = vmax.xlane.f32.xlu0 %v653_v29  ;;  %v888_v29 = vcvt.s32.f32 %v886_v3  ;;  %6667 = vst [vmem:[#allocation38_spill] sm:$0xff] %v4262_v52  ;;  %v656_v32 = vsel %vm562_vm1, %v4262_v52, -inf  ;;  %v6689_v52 = vld [vmem:[#allocation17_spill] sm:$0xff] }
 0x18b   :  { %v4241_v48 = vcvt.s32.f32 %v1142_v2 }
 0x18c   :  { %v893_v15 = vsel %vm892_vm2, %v888_v29, inf  ;;  %v901_v29 = vand.u32 65535, %v3915_v4 }
 0x18d   :  { %6664 = vst [vmem:[#allocation35_spill] sm:$0xff] %v4241_v48  ;;  %v4248_v18 = vpop.xlane.xlu1 %1490  ;;  %1145 = vmin.xlane.f32.xlu2 %v4241_v48  ;;  %v1501_v48 = vand.u32 65535, %v3933_v26 }
 0x18e   :  { %6665 = vst [vmem:[#allocation36_spill] sm:$0xff] %v4248_v18  ;;  %vm1492_vm15 = vcmp.eq.f32.partialorder %v3942_v30, %v4248_v18  ;;  %v4255_v6 = vpop.f32.mrf.mxu0  ;;  %v4257_v44 = vpop.xlane.xlu0 %1505  ;;  %v903_v4 = vcvt.s32.f32 %v901_v29  ;;  %v78_v29 = vld [vmem:[%s6529_s0 + $0x1d0] sm:$0xff] }
 0x18f   :  { %v1493_v34 = vsel %vm1492_vm15, %v1488_v54, inf  ;;  %6666 = vst [vmem:[#allocation37_spill] sm:$0xff] %v4257_v44  ;;  %vm1507_vm4 = vcmp.eq.f32.partialorder %v3944_v31, %v4257_v44  ;;  %3111 = vmatmul.msk.f32.gmra.mxu2 %vm87_vm0, %v76_v42 }
 0x190   :  { %v619_v2 = vpop.xlane.xlu2 %618  ;;  %1494 = vmin.xlane.f32.xlu1 %v1493_v34 }
 0x191   :  { %vm775_vm3 = vcmp.eq.f32.partialorder %v3940_v49, %v619_v2  ;;  %v1503_v49 = vcvt.s32.f32 %v1501_v48  ;;  %v77_v48 = vld [vmem:[%s6529_s0 + $0x1c8] sm:$0xff] }
 0x192   :  { %894 = vmin.xlane.f32.xlu0 %v893_v15  ;;  %v839_v30 = vsel %vm775_vm3, %v3864_v24, 16  ;;  %v837_v15 = vsel %vm773_vm5, %v3864_v24, 16 }
 0x193   :  { %v1508_v26 = vsel %vm1507_vm4, %v1503_v49, inf  ;;  %v4278_v33 = vsel %vm562_vm1, %v839_v30, 2147483647 }
 0x194   :  { %v1157_v31 = vshra.s32 %v4278_v33, 16 }
 0x195   :  { %v4271_v3 = vpop.xlane.xlu1 %920 }
 0x196   :  { %v4273_v54 = vpop.f32.mrf.mxu0  ;;  %v4291_v42 = vcvt.s32.f32 %v1157_v31  ;;  %v4307_v31 = vsel %vm562_vm1, %v837_v15, 2147483647  ;;  %vm922_vm11 = vcmp.eq.f32.partialorder %v3971_v0, %v4271_v3 }
 0x197   :  { %3112 = vmatmul.msk.f32.gmra.mxu2 %vm87_vm0, %v77_v48  ;;  %v1127_v48 = vshra.s32 %v4307_v31, 16 }
 0x198   :  { %v4280_v34 = vpop.xlane.xlu2 %1520  ;;  %1509 = vmin.xlane.f32.xlu1 %v1508_v26  ;;  %v908_v26 = vsel %vm907_vm7, %v903_v4, inf }
 0x199   :  { %6668 = vst [vmem:[#allocation39_spill] sm:$0xff] %v4280_v34  ;;  %vm1522_vm8 = vcmp.eq.f32.partialorder %v3982_v5, %v4280_v34  ;;  %v961_v34 = vand.u32 65535, %v4019_v60 }
 0x19a   :  { %657 = vmax.xlane.f32.xlu0 %v656_v32  ;;  %v1516_v32 = vand.u32 65535, %v3964_v58 }
 0x19b   :  { %v963_v60 = vcvt.s32.f32 %v961_v34 }
 0x19c   :  { %v1518_v58 = vcvt.s32.f32 %v1516_v32  ;;  %v916_v32 = vand.u32 65535, %v3948_v37 }
 0x19d   :  { %v625_v2 = vpop.xlane.xlu1 %624 }
 0x19e   :  { %vm777_vm6 = vcmp.eq.f32.partialorder %v3997_v25, %v625_v2  ;;  %v4295_v30 = vpop.f32.mrf.mxu0  ;;  %v1531_v2 = vand.u32 65535, %v4009_v45 }
 0x19f   :  { %6669 = vst [vmem:[#allocation40_spill] sm:$0xff] %v4295_v30  ;;  %v841_v38 = vsel %vm777_vm6, %v3864_v24, 16  ;;  %3113 = vmatmul.msk.f32.gmra.mxu2 %vm87_vm0, %v78_v29  ;;  %v79_v29 = vld [vmem:[%s6529_s0 + $0x1d8] sm:$0xff] }
 0x1a0   :  { %v4298_v9 = vpop.xlane.xlu2 %950  ;;  %1160 = vmin.xlane.f32.xlu1 %v4291_v42  ;;  %v4302_v49 = vsel %vm562_vm1, %v841_v38, 2147483647  ;;  %v1523_v38 = vsel %vm1522_vm8, %v1518_v58, inf  ;;  %v1533_v5 = vcvt.s32.f32 %v1531_v2  ;;  %v918_v58 = vcvt.s32.f32 %v916_v32  ;;  %v4358_v32 = vpop.xlane.xlu0 %935 }
 0x1a1   :  { %v1187_v25 = vshra.s32 %v4302_v49, 16  ;;  %vm937_vm15 = vcmp.eq.f32.partialorder %v3974_v61, %v4358_v32  ;;  %v946_v61 = vand.u32 65535, %v3986_v10  ;;  %vm952_vm4 = vcmp.eq.f32.partialorder %v4006_v41, %v4298_v9 }
 0x1a2   :  { %909 = vmin.xlane.f32.xlu0 %v908_v26  ;;  %v923_v44 = vsel %vm922_vm11, %v918_v58, inf }
 0x1a3   :  { %v4309_v14 = vcvt.s32.f32 %v1187_v25  ;;  %v4326_v25 = vcvt.s32.f32 %v1127_v48  ;;  %v976_v48 = vand.u32 65535, %v4033_v28 }
 0x1a5   :  { %1190 = vmin.xlane.f32.xlu2 %v4309_v14 }
 0x1a6   :  { %v4320_v15 = vpop.f32.mrf.mxu0 }
 0x1a7   :  { %3114 = vmatmul.msk.f32.gmra.mxu2 %vm87_vm0, %v79_v29  ;;  %v80_v29 = vld [vmem:[%s6529_s0 + $0x1e0] sm:$0xff] }
 0x1a8   :  { %v4322_v4 = vpop.xlane.xlu2 %1535  ;;  %v4324_v26 = vpop.xlane.xlu1 %965  ;;  %1524 = vmin.xlane.f32.xlu1 %v1523_v38 }
 0x1a9   :  { %6670 = vst [vmem:[#allocation41_spill] sm:$0xff] %v4322_v4  ;;  %vm1537_vm9 = vcmp.eq.f32.partialorder %v4023_v12, %v4322_v4  ;;  %vm967_vm10 = vcmp.eq.f32.partialorder %v4025_v7, %v4324_v26  ;;  %v4352_v7 = vld [vmem:[%s6531_s2] ss:$0 sm:$0xff] }
 0x1aa   :  { %1130 = vmin.xlane.f32.xlu0 %v4326_v25  ;;  %v4332_v45 = vsel %vm1537_vm9, %v1533_v5, inf  ;;  %v968_v2 = vsel %vm967_vm10, %v963_v60, inf  ;;  %v978_v5 = vcvt.s32.f32 %v976_v48  ;;  %v1546_v60 = vand.u32 65535, %v4049_v57 }
 0x1ae   :  { %v414_v12 = vpop.f32.mrf.mxu0 }
 0x1af   :  { %v4355_v0 = vsub.f32 %v414_v12, %v4352_v7  ;;  %3115 = vmatmul.msk.f32.gmra.mxu2 %vm87_vm0, %v80_v29 }
 0x1b0   :  { %v4344_v38 = vpop.xlane.xlu1 %980  ;;  %v628_v37 = vpop.xlane.xlu2 %627  ;;  %969 = vmin.xlane.f32.xlu1 %v968_v2 }
 0x1b1   :  { %vm778_vm12 = vcmp.eq.f32.partialorder %v4040_v13, %v628_v37  ;;  %vm982_vm13 = vcmp.eq.f32.partialorder %v4044_v8, %v4344_v38  ;;  %v931_v8 = vand.u32 65535, %v3961_v59  ;;  %v869_v59 = vsel %vm805_vm14, %v3864_v24, 16 }
 0x1b2   :  { %v842_v28 = vsel %vm778_vm12, %v3864_v24, 16  ;;  %924 = vmin.xlane.f32.xlu0 %v923_v44  ;;  %v983_v34 = vsel %vm982_vm13, %v978_v5, inf  ;;  %v674_v44 = vsel %vm562_vm1, %v4355_v0, -inf  ;;  %v1548_v37 = vcvt.s32.f32 %v1546_v60 }
 0x1b3   :  { %v4361_v13 = vsel %vm562_vm1, %v842_v28, 2147483647  ;;  %984 = vmin.xlane.f32.xlu2 %v983_v34  ;;  %v933_v12 = vcvt.s32.f32 %v931_v8  ;;  %v4382_v5 = vsel %vm562_vm1, %v869_v59, 2147483647  ;;  %v1561_v28 = vand.u32 65535, %v4070_v53  ;;  %v622_v34 = vpop.xlane.xlu0 %621 }
 0x1b4   :  { %v1202_v48 = vshra.s32 %v4361_v13, 16  ;;  %v1607_v8 = vshra.s32 %v4382_v5, 16  ;;  %vm776_vm6 = vcmp.eq.f32.partialorder %v3990_v16, %v622_v34 }
 0x1b5   :  { %v938_v39 = vsel %vm937_vm15, %v933_v12, inf  ;;  %v1563_v10 = vcvt.s32.f32 %v1561_v28 }
 0x1b6   :  { %v4379_v19 = vcvt.s32.f32 %v1202_v48  ;;  %v4400_v12 = vcvt.s32.f32 %v1607_v8 }
 0x1b8   :  { %v4377_v2 = vpop.xlane.xlu2 %1550  ;;  %v631_v58 = vpop.xlane.xlu1 %630  ;;  %675 = vmax.xlane.f32.xlu1 %v674_v44  ;;  %v948_v44 = vcvt.s32.f32 %v946_v61  ;;  %v840_v61 = vsel %vm776_vm6, %v3864_v24, 16 }
 0x1b9   :  { %6671 = vst [vmem:[#allocation42_spill] sm:$0xff] %v4377_v2  ;;  %vm1552_vm2 = vcmp.eq.f32.partialorder %v4065_v20, %v4377_v2  ;;  %vm779_vm3 = vcmp.eq.f32.partialorder %v4059_v43, %v631_v58  ;;  %v462_v20 = vpop.f32.mrf.mxu2  ;;  %v1006_v58 = vand.u32 65535, %v4092_v27 }
 0x1ba   :  { %939 = vmin.xlane.f32.xlu0 %v938_v39  ;;  %v4388_v57 = vsel %vm1552_vm2, %v1548_v37, inf  ;;  %v843_v29 = vsel %vm779_vm3, %v3864_v24, 16  ;;  %v953_v59 = vsel %vm952_vm4, %v948_v44, inf  ;;  %v4412_v53 = vsub.f32 %v462_v20, %v4352_v7 }
 0x1bb   :  { %1205 = vmin.xlane.f32.xlu2 %v4379_v19  ;;  %v4405_v43 = vsel %vm562_vm1, %v843_v29, 2147483647  ;;  %v1576_v39 = vand.u32 65535, %v4089_v22  ;;  %v634_v37 = vpop.xlane.xlu0 %633  ;;  %v1008_v34 = vcvt.s32.f32 %v1006_v58  ;;  %v4425_v44 = vsel %vm562_vm1, %v840_v61, 2147483647  ;;  %v417_v22 = vpop.f32.mrf.mxu0 }
 0x1bc   :  { %v722_v28 = vsel %vm562_vm1, %v4412_v53, -inf  ;;  %vm780_vm9 = vcmp.eq.f32.partialorder %v4055_v56, %v634_v37  ;;  %v1172_v58 = vshra.s32 %v4425_v44, 16  ;;  %v6676_v56 = vld [vmem:[#allocation13_spill] sm:$0xff] }
 0x1bd   :  { %v1578_v29 = vcvt.s32.f32 %v1576_v39  ;;  %v991_v37 = vand.u32 65535, %v6676_v56  ;;  %v6681_v56 = vld [vmem:[#allocation15_spill] sm:$0xff] }
 0x1be   :  { %v4446_v61 = vcvt.s32.f32 %v1172_v58  ;;  %v6677_v58 = vld [vmem:[#allocation14_spill] sm:$0xff] }
 0x1bf   :  { %v993_v18 = vcvt.s32.f32 %v991_v37  ;;  %v1021_v37 = vand.u32 65535, %v6681_v56  ;;  %v6682_v56 = vld [vmem:[#allocation19_spill] sm:$0xff] }
 0x1c0   :  { %v4396_v48 = vpop.xlane.xlu2 %1565  ;;  %v4398_v60 = vpop.xlane.xlu1 %995 }
 0x1c1   :  { %6672 = vst [vmem:[#allocation43_spill] sm:$0xff] %v4396_v48  ;;  %vm1567_vm5 = vcmp.eq.f32.partialorder %v4084_v23, %v4396_v48  ;;  %v1217_v23 = vshra.s32 %v4405_v43, 16  ;;  %vm997_vm10 = vcmp.eq.f32.partialorder %v6677_v58, %v4398_v60 }
 0x1c2   :  { %954 = vmin.xlane.f32.xlu0 %v953_v59  ;;  %v4407_v41 = vsel %vm1567_vm5, %v1563_v10, inf  ;;  %v4438_v59 = vsub.f32 %v417_v22, %v4352_v7  ;;  %v998_v4 = vsel %vm997_vm10, %v993_v18, inf }
 0x1c3   :  { %6673 = vst [vmem:[#allocation44_spill] sm:$0xff] %v4407_v41  ;;  %1610 = vmin.xlane.f32.xlu2 %v4400_v12  ;;  %v4427_v27 = vcvt.s32.f32 %v1217_v23 }
 0x1c8   :  { %v4420_v8 = vpop.xlane.xlu2 %1580  ;;  %v4422_v16 = vpop.xlane.xlu1 %1010 }
 0x1c9   :  { %6674 = vst [vmem:[#allocation45_spill] sm:$0xff] %v4420_v8  ;;  %vm1012_vm7 = vcmp.eq.f32.partialorder %v4102_v35, %v4422_v16  ;;  %vm1582_vm8 = vcmp.eq.f32.partialorder %v4100_v1, %v4420_v8  ;;  %v844_v35 = vsel %vm780_vm9, %v3864_v24, 16 }
 0x1ca   :  { %723 = vmax.xlane.f32.xlu0 %v722_v28  ;;  %v1013_v20 = vsel %vm1012_vm7, %v1008_v34, inf  ;;  %v4433_v10 = vsel %vm1582_vm8, %v1578_v29, inf  ;;  %v677_v28 = vsel %vm562_vm1, %v4438_v59, -inf  ;;  %v4451_v34 = vsel %vm562_vm1, %v844_v35, 2147483647 }
 0x1cb   :  { %1220 = vmin.xlane.f32.xlu2 %v4427_v27  ;;  %1014 = vmin.xlane.f32.xlu1 %v1013_v20  ;;  %6675 = vst [vmem:[#allocation46_spill] sm:$0xff] %v4451_v34  ;;  %v1591_v29 = vand.u32 65535, %v4133_v40  ;;  %v1232_v20 = vshra.s32 %v4451_v34, 16 }
 0x1cd   :  { %v4441_v39 = vpop.xlane.xlu0 %642  ;;  %v1593_v35 = vcvt.s32.f32 %v1591_v29  ;;  %v4463_v8 = vcvt.s32.f32 %v1232_v20  ;;  %v4475_v29 = vsub.f32 %v4229_v51, %v4352_v7 }
 0x1cf   :  { %6679 = vst [vmem:[#allocation14_spill] sm:$0xff] %v4463_v8  ;;  %v659_v51 = vsel %vm562_vm1, %v4475_v29, -inf }
 0x1d0   :  { %v4444_v23 = vpop.xlane.xlu1 %1025  ;;  %v637_v1 = vpop.xlane.xlu2 %636 }
 0x1d1   :  { %vm781_vm12 = vcmp.eq.f32.partialorder %v4117_v50, %v637_v1  ;;  %vm1027_vm13 = vcmp.eq.f32.partialorder %v4127_v55, %v4444_v23 }
 0x1d2   :  { %1175 = vmin.xlane.f32.xlu0 %v4446_v61  ;;  %v845_v20 = vsel %vm781_vm12, %v3864_v24, 16 }
 0x1d3   :  { %678 = vmax.xlane.f32.xlu2 %v677_v28  ;;  %v1066_v28 = vand.u32 65535, %v4160_v17  ;;  %v4495_v55 = vsel %vm562_vm1, %v845_v20, 2147483647 }
 0x1d5   :  { %v4456_v22 = vpop.xlane.xlu0 %1055  ;;  %v1068_v17 = vcvt.s32.f32 %v1066_v28  ;;  %v1036_v28 = vand.u32 65535, %v4157_v47 }
 0x1d7   :  { %v1038_v20 = vcvt.s32.f32 %v1036_v28 }
 0x1d8   :  { %v4461_v48 = vpop.xlane.xlu2 %1595  ;;  %v640_v2 = vpop.xlane.xlu1 %639 }
 0x1d9   :  { %6678 = vst [vmem:[#allocation13_spill] sm:$0xff] %v4461_v48  ;;  %vm1597_vm11 = vcmp.eq.f32.partialorder %v4152_v63, %v4461_v48  ;;  %v81_v63 = vld [vmem:[%s6529_s0 + $0x1e8] sm:$0xff]  ;;  %vm782_vm15 = vcmp.eq.f32.partialorder %v6682_v56, %v640_v2 }
 0x1da   :  { %999 = vmin.xlane.f32.xlu0 %v998_v4  ;;  %v4467_v40 = vsel %vm1597_vm11, %v1593_v35, inf  ;;  %v1023_v4 = vcvt.s32.f32 %v1021_v37  ;;  %3116 = vmatmul.msk.f32.gmra.mxu2 %vm87_vm0, %v81_v63  ;;  %v1247_v63 = vshra.s32 %v4495_v55, 16  ;;  %v6683_v48 = vld [vmem:[#allocation25_spill] sm:$0xff] }
 0x1db   :  { %6680 = vst [vmem:[#allocation47_spill] sm:$0xff] %v4467_v40  ;;  %1235 = vmin.xlane.f32.xlu2 %v4463_v8 }
 0x1dc   :  { %v1028_v35 = vsel %vm1027_vm13, %v1023_v4, inf  ;;  %v4509_v47 = vcvt.s32.f32 %v1247_v63 }
 0x1dd   :  { %v4477_v18 = vpop.xlane.xlu0 %645 }
 0x1e0   :  { %v4485_v50 = vpop.xlane.xlu1 %1070  ;;  %v4488_v1 = vpop.xlane.xlu2 %1040 }
 0x1e1   :  { %vm1072_vm14 = vcmp.eq.f32.partialorder %v4176_v62, %v4485_v50  ;;  %vm1042_vm2 = vcmp.eq.f32.partialorder %v6683_v48, %v4488_v1  ;;  %v846_v62 = vsel %vm782_vm15, %v3864_v24, 16  ;;  %v6685_v48 = vld [vmem:[#allocation26_spill] sm:$0xff] }
 0x1e2   :  { %660 = vmax.xlane.f32.xlu0 %v659_v51  ;;  %v1073_v58 = vsel %vm1072_vm14, %v1068_v17, inf  ;;  %v82_v17 = vld [vmem:[%s6529_s0 + $0x1f0] sm:$0xff]  ;;  %v1043_v4 = vsel %vm1042_vm2, %v1038_v20, inf  ;;  %v4512_v2 = vsel %vm562_vm1, %v846_v62, 2147483647  ;;  %v6686_v20 = vld [vmem:[#allocation28_spill] sm:$0xff] }
 0x1e3   :  { %1074 = vmin.xlane.f32.xlu1 %v1073_v58  ;;  %1029 = vmin.xlane.f32.xlu2 %v1028_v35  ;;  %6684 = vst [vmem:[#allocation15_spill] sm:$0xff] %v4512_v2  ;;  %v1081_v58 = vand.u32 65535, %v6685_v48  ;;  %v1111_v35 = vand.u32 65535, %v4201_v46  ;;  %v1262_v56 = vshra.s32 %v4512_v2, 16  ;;  %v6688_v46 = vld [vmem:[#allocation16_spill] sm:$0xff] }
 0x1e4   :  { %3117 = vmatmul.msk.f32.gmra.mxu2 %vm87_vm0, %v82_v17  ;;  %vm783_vm5 = vcmp.eq.f32.partialorder %v6688_v46, %v4441_v39  ;;  %v6693_v46 = vld [vmem:[#allocation22_spill] sm:$0xff]  ;;  %v6696_v2 = vld [vmem:[#allocation32_spill] sm:$0xff] }
 0x1e5   :  { %v4499_v37 = vpop.xlane.xlu0 %648  ;;  %v1083_v63 = vcvt.s32.f32 %v1081_v58  ;;  %v1113_v62 = vcvt.s32.f32 %v1111_v35  ;;  %v4528_v40 = vcvt.s32.f32 %v1262_v56  ;;  %v847_v35 = vsel %vm783_vm5, %v3864_v24, 16 }
 0x1e6   :  { %v4540_v56 = vsel %vm562_vm1, %v847_v35, 2147483647  ;;  %vm784_vm7 = vcmp.eq.f32.partialorder %v6693_v46, %v4477_v18  ;;  %v6574_v18 = vmov 0.0  }
 0x1e7   :  { %6687 = vst [vmem:[#allocation19_spill] sm:$0xff] %v4528_v40 }
 0x1e8   :  { %v4514_v51 = vpop.xlane.xlu2 %1085 }
 0x1e9   :  { %vm1087_vm3 = vcmp.eq.f32.partialorder %v6686_v20, %v4514_v51  ;;  %v1051_v20 = vand.u32 65535, %v6689_v52  ;;  %v897_v52 = vcvt.f32.s32 %v4212_v36 }
 0x1ea   :  { %1044 = vmin.xlane.f32.xlu0 %v1043_v4  ;;  %v1088_v4 = vsel %vm1087_vm3, %v1083_v63, inf  ;;  %v6691_v63 = vld [vmem:[#allocation20_spill] sm:$0xff] }
 0x1eb   :  { %1250 = vmin.xlane.f32.xlu2 %v4509_v47  ;;  %vm1057_vm6 = vcmp.eq.f32.partialorder %v6691_v63, %v4456_v22  ;;  %v6694_v63 = vld [vmem:[#allocation30_spill] sm:$0xff] }
 0x1ed   :  { %v4519_v28 = vpop.xlane.xlu0 %651 }
 0x1f0   :  { %v4524_v17 = vpop.xlane.xlu1 %1115 }
 0x1f1   :  { %vm1117_vm4 = vcmp.eq.f32.partialorder %v4207_v21, %v4524_v17  ;;  %v1053_v21 = vcvt.s32.f32 %v1051_v20  ;;  %v1096_v20 = vand.u32 65535, %v6694_v63  ;;  %v6699_v63 = vld [vmem:[#allocation9_spill] sm:$0xff] }
 0x1f2   :  { %1089 = vmin.xlane.f32.xlu0 %v1088_v4  ;;  %v1118_v48 = vsel %vm1117_vm4, %v1113_v62, inf }
 0x1f3   :  { %1119 = vmin.xlane.f32.xlu1 %v1118_v48  ;;  %1265 = vmin.xlane.f32.xlu2 %v4528_v40  ;;  %v1058_v62 = vsel %vm1057_vm6, %v1053_v21, inf  ;;  %v1277_v48 = vshra.s32 %v4540_v56, 16  ;;  %v898_v21 = vshll.u32 %v897_v52, 16  ;;  %v1098_v41 = vcvt.s32.f32 %v1096_v20  ;;  %v6698_v52 = vld [vmem:[#allocation18_spill] sm:$0xff] }
 0x1f4   :  { %vm806_vm10 = vcmp.eq.f32.partialorder %v6699_v63, %v6698_v52 }
 0x1f5   :  { %v4534_v58 = vpop.xlane.xlu0 %1100  ;;  %v4545_v39 = vcvt.s32.f32 %v1277_v48 }
 0x1f6   :  { %6690 = vst [vmem:[#allocation25_spill] sm:$0xff] %v4534_v58  ;;  %vm1102_vm8 = vcmp.eq.f32.partialorder %v6696_v2, %v4534_v58 }
 0x1f7   :  { %v1103_v8 = vsel %vm1102_vm8, %v1098_v41, inf  ;;  %v870_v41 = vsel %vm806_vm10, %v3864_v24, 16 }
 0x1f8   :  { %v4552_v40 = vpop.xlane.xlu1 %1479 }
 0x1f9   :  { %6695 = vst [vmem:[#allocation28_spill] sm:$0xff] %v4552_v40 }
 0x1fb   :  { %1059 = vmin.xlane.f32.xlu2 %v1058_v62 }
 0x1fd   :  { %v4542_v4 = vpop.xlane.xlu0 %654 }
 0x1fe   :  { %6692 = vst [vmem:[#allocation26_spill] sm:$0xff] %v4542_v4  ;;  %v848_v4 = vsel %vm784_vm7, %v3864_v24, 16 }
 0x1ff   :  { %v4558_v36 = vsel %vm562_vm1, %v848_v4, 2147483647  ;;  %v4584_v63 = vpop.f32.mrf.mxu2 }
 0x200   :  { %6697 = vst [vmem:[#allocation16_spill] sm:$0xff] %v4558_v36  ;;  %v1292_v4 = vshra.s32 %v4558_v36, 16 }
 0x203   :  { %1280 = vmin.xlane.f32.xlu2 %v4545_v39  ;;  %v4568_v2 = vpop.xlane.xlu1 %1494 }
 0x204   :  { %6700 = vst [vmem:[#allocation17_spill] sm:$0xff] %v4568_v2  ;;  %v4586_v2 = vpop.xlane.xlu2 %1145 }
 0x205   :  { %v895_v35 = vpop.xlane.xlu0 %894 }
 0x206   :  { %v896_v62 = vcvt.f32.s32 %v895_v35  ;;  %v4574_v35 = vcvt.s32.f32 %v1292_v4 }
 0x208   :  { %v899_v48 = vadd.s32 %v898_v21, %v896_v62  ;;  %6702 = vst [vmem:[#allocation22_spill] sm:$0xff] %v4574_v35  ;;  %v4578_v21 = vsel %vm562_vm1, %v870_v41, 2147483647  ;;  %v6704_v62 = vld [vmem:[#allocation24_spill] sm:$0xff] }
 0x209   :  { %6703 = vst [vmem:[#allocation30_spill] sm:$0xff] %v4578_v21  ;;  %vm785_vm11 = vcmp.eq.f32.partialorder %v6704_v62, %v4499_v37  ;;  %v1622_v52 = vshra.s32 %v4578_v21, 16 }
 0x20a   :  { %vm1845_vm9 = vcmp.eq.s32.totalorder %v3864_v24, %v899_v48  ;;  %v849_v40 = vsel %vm785_vm11, %v3864_v24, 16 }
 0x20b   :  { %1104 = vmin.xlane.f32.xlu2 %v1103_v8  ;;  %v4562_v46 = vsel %vm1845_vm9, 1.0, %v6574_v18  ;;  %v912_v8 = vcvt.f32.s32 %v4234_v11  ;;  %v4589_v11 = vpop.xlane.xlu1 %1509  ;;  %v4591_v36 = vcvt.s32.f32 %v1622_v52  ;;  %v4595_v37 = vsel %vm562_vm1, %v849_v40, 2147483647 }
 0x20c   :  { %3183 = vmatmul.msk.f32.vlgmr.msra.gmra.mxu1 %vm562_vm1, %v4562_v46  ;;  %6705 = vst [vmem:[#allocation32_spill] sm:$0xff] %v4589_v11  ;;  %v4614_v11 = vpop.f32.mrf.mxu2 }
 0x20d   :  { %v4570_v20 = vpop.xlane.xlu0 %657  ;;  %v913_v18 = vshll.u32 %v912_v8, 16  ;;  %6706 = vst [vmem:[#allocation18_spill] sm:$0xff] %v4591_v36  ;;  %v6708_v8 = vmov 0.0  }
 0x20e   :  { %6701 = vst [vmem:[#allocation20_spill] sm:$0xff] %v4570_v20  ;;  %v6710_v20 = vld [vmem:[#allocation10_spill] sm:$0xff] }
 0x20f   :  { %6707 = vst [vmem:[#allocation9_spill] sm:$0xff] %v4595_v37 }
 0x213   :  { %1295 = vmin.xlane.f32.xlu2 %v4574_v35  ;;  %v1126_v35 = vand.u32 65535, %v4307_v31  ;;  %v1307_v31 = vshra.s32 %v4595_v37, 16 }
 0x215   :  { %v910_v48 = vpop.xlane.xlu0 %909  ;;  %v1128_v52 = vcvt.s32.f32 %v1126_v35  ;;  %v927_v35 = vcvt.f32.s32 %v4271_v3 }
 0x216   :  { %v911_v4 = vcvt.f32.s32 %v910_v48  ;;  %v6709_v48 = vld [vmem:[#allocation21_spill] sm:$0xff] }
 0x217   :  { %vm807_vm13 = vcmp.eq.f32.partialorder %v6710_v20, %v6709_v48  ;;  %v4616_v20 = vpop.xlane.xlu1 %1160  ;;  %v4618_v48 = vcvt.s32.f32 %v1307_v31  ;;  %v928_v58 = vshll.u32 %v927_v35, 16 }
 0x218   :  { %v914_v41 = vadd.s32 %v913_v18, %v911_v4  ;;  %v4609_v40 = vpop.xlane.xlu2 %1190  ;;  %v871_v4 = vsel %vm807_vm13, %v3864_v24, 16  ;;  %6712 = vst [vmem:[#allocation21_spill] sm:$0xff] %v4616_v20  ;;  %vm1162_vm5 = vcmp.eq.f32.partialorder %v4291_v42, %v4616_v20 }
 0x219   :  { %6713 = vst [vmem:[#allocation10_spill] sm:$0xff] %v4618_v48  ;;  %v4623_v37 = vsel %vm562_vm1, %v871_v4, 2147483647  ;;  %vm1192_vm13 = vcmp.eq.f32.partialorder %v4309_v14, %v4609_v40 }
 0x21a   :  { %vm1846_vm12 = vcmp.eq.s32.totalorder %v3864_v24, %v914_v41  ;;  %v1637_v31 = vshra.s32 %v4623_v37, 16 }
 0x21b   :  { %1625 = vmin.xlane.f32.xlu2 %v4591_v36  ;;  %v4600_v62 = vsel %vm1846_vm12, 1.0, %v6708_v8  ;;  %v6714_v36 = vld [vmem:[#allocation34_spill] sm:$0xff] }
 0x21c   :  { %3184 = vmatmul.msk.f32.gmra.mxu1 %vm562_vm1, %v4600_v62  ;;  %v1141_v21 = vand.u32 65535, %v6714_v36  ;;  %6715 = vst [vmem:[#allocation34_spill] sm:$0xff] %v4623_v37  ;;  %v1606_v37 = vand.u32 65535, %v4382_v5 }
 0x21d   :  { %v4606_v18 = vpop.xlane.xlu0 %1130 }
 0x21e   :  { %6711 = vst [vmem:[#allocation24_spill] sm:$0xff] %v4606_v18  ;;  %vm1132_vm14 = vcmp.eq.f32.partialorder %v4326_v25, %v4606_v18  ;;  %v6716_v25 = vld [vmem:[#allocation27_spill] sm:$0xff]  ;;  %v1143_v18 = vcvt.s32.f32 %v1141_v21 }
 0x21f   :  { %v1133_v41 = vsel %vm1132_vm14, %v1128_v52, inf  ;;  %vm786_vm15 = vcmp.eq.f32.partialorder %v6716_v25, %v4519_v28  ;;  %v6717_v52 = vld [vmem:[#allocation35_spill] sm:$0xff]  ;;  %v1156_v28 = vand.u32 65535, %v4278_v33  ;;  %v4637_v25 = vpop.f32.mrf.mxu2  ;;  %v4644_v35 = vpop.xlane.xlu1 %1524 }
 0x220   :  { %1134 = vmin.xlane.f32.xlu1 %v1133_v41  ;;  %vm1147_vm2 = vcmp.eq.f32.partialorder %v6717_v52, %v4586_v2  ;;  %v850_v3 = vsel %vm786_vm15, %v3864_v24, 16  ;;  %v942_v52 = vcvt.f32.s32 %v4358_v32  ;;  %6720 = vst [vmem:[#allocation48_spill] sm:$0xff] %v4644_v35 }
 0x221   :  { %v1148_v4 = vsel %vm1147_vm2, %v1143_v18, inf  ;;  %v4641_v21 = vsel %vm562_vm1, %v850_v3, 2147483647  ;;  %v6722_v18 = vld [vmem:[#allocation11_spill] sm:$0xff]  ;;  %v1158_v32 = vcvt.s32.f32 %v1156_v28 }
 0x222   :  { %6719 = vst [vmem:[#allocation35_spill] sm:$0xff] %v4641_v21 }
 0x223   :  { %1310 = vmin.xlane.f32.xlu2 %v4618_v48  ;;  %v4634_v48 = vcvt.s32.f32 %v1637_v31  ;;  %v1163_v35 = vsel %vm1162_vm5, %v1158_v32, inf }
 0x225   :  { %v925_v41 = vpop.xlane.xlu0 %924  ;;  %6718 = vst [vmem:[#allocation27_spill] sm:$0xff] %v4634_v48 }
 0x226   :  { %v926_v34 = vcvt.f32.s32 %v925_v41  ;;  %v4631_v36 = vpop.xlane.xlu2 %984  ;;  %v943_v41 = vshll.u32 %v942_v52, 16 }
 0x227   :  { %v4672_v52 = vpop.f32.mrf.mxu2 }
 0x228   :  { %v929_v30 = vadd.s32 %v928_v58, %v926_v34  ;;  %1149 = vmin.xlane.f32.xlu1 %v1148_v4  ;;  %v6721_v58 = vld [vmem:[#allocation23_spill] sm:$0xff] }
 0x229   :  { %vm808_vm4 = vcmp.eq.f32.partialorder %v6722_v18, %v6721_v58  ;;  %v957_v18 = vcvt.f32.s32 %v4298_v9 }
 0x22a   :  { %vm1847_vm3 = vcmp.eq.s32.totalorder %v3864_v24, %v929_v30  ;;  %v1322_v30 = vshra.s32 %v4641_v21, 16  ;;  %v872_v4 = vsel %vm808_vm4, %v3864_v24, 16 }
 0x22b   :  { %1640 = vmin.xlane.f32.xlu2 %v4634_v48  ;;  %v4648_v34 = vsel %vm1847_vm3, 1.0, %v6708_v8  ;;  %v4666_v42 = vsel %vm562_vm1, %v872_v4, 2147483647  ;;  %v958_v5 = vshll.u32 %v957_v18, 16 }
 0x22c   :  { %3185 = vmatmul.msk.f32.gmra.mxu1 %vm562_vm1, %v4648_v34  ;;  %v4660_v58 = vcvt.s32.f32 %v1322_v30  ;;  %6724 = vst [vmem:[#allocation11_spill] sm:$0xff] %v4666_v42  ;;  %v1652_v9 = vshra.s32 %v4666_v42, 16 }
 0x22d   :  { %v940_v33 = vpop.xlane.xlu0 %939 }
 0x22e   :  { %v941_v31 = vcvt.f32.s32 %v940_v33  ;;  %v4657_v3 = vpop.xlane.xlu2 %1205  ;;  %6723 = vst [vmem:[#allocation23_spill] sm:$0xff] %v4660_v58  ;;  %v4684_v21 = vcvt.s32.f32 %v1652_v9  ;;  %v986_v9 = vcvt.f32.s32 %v4631_v36  ;;  %v4711_v36 = vsub.f32 %v4320_v15, %v4352_v7 }
 0x22f   :  { %vm1207_vm3 = vcmp.eq.f32.partialorder %v4379_v19, %v4657_v3 }
 0x230   :  { %v944_v48 = vadd.s32 %v943_v41, %v941_v31  ;;  %1164 = vmin.xlane.f32.xlu1 %v1163_v35  ;;  %v970_v35 = vpop.xlane.xlu1 %969  ;;  %v1608_v41 = vcvt.s32.f32 %v1606_v37  ;;  %6727 = vst [vmem:[#allocation51_spill] sm:$0xff] %v4684_v21 }
 0x231   :  { %v971_v31 = vcvt.f32.s32 %v970_v35  ;;  %v987_v35 = vcvt.f32.s32 %v4344_v38  ;;  %6728 = vst [vmem:[#allocation52_spill] sm:$0xff] %v4711_v36 }
 0x232   :  { %vm1848_vm6 = vcmp.eq.s32.totalorder %v3864_v24, %v944_v48  ;;  %v972_v48 = vcvt.f32.s32 %v4324_v26 }
 0x233   :  { %1325 = vmin.xlane.f32.xlu2 %v4660_v58  ;;  %v4670_v28 = vsel %vm1848_vm6, 1.0, %v6708_v8 }
 0x234   :  { %3186 = vmatmul.msk.f32.gmra.mxu1 %vm562_vm1, %v4670_v28  ;;  %v973_v20 = vshll.u32 %v972_v48, 16  ;;  %v988_v48 = vshll.u32 %v987_v35, 16 }
 0x235   :  { %v955_v33 = vpop.xlane.xlu0 %954 }
 0x236   :  { %v956_v32 = vcvt.f32.s32 %v955_v33  ;;  %v4678_v30 = vpop.xlane.xlu2 %1610  ;;  %v974_v18 = vadd.s32 %v973_v20, %v971_v31 }
 0x237   :  { %6725 = vst [vmem:[#allocation49_spill] sm:$0xff] %v4678_v30  ;;  %vm1612_vm7 = vcmp.eq.f32.partialorder %v4400_v12, %v4678_v30  ;;  %v477_v12 = vpop.f32.mrf.mxu2 }
 0x238   :  { %v959_v4 = vadd.s32 %v958_v5, %v956_v32  ;;  %v4682_v58 = vsel %vm1612_vm7, %v1608_v41, inf  ;;  %vm1850_vm9 = vcmp.eq.s32.totalorder %v3864_v24, %v974_v18  ;;  %v1171_v5 = vand.u32 65535, %v4425_v44  ;;  %v676_v41 = vpop.xlane.xlu1 %675  ;;  %v83_v18 = vld [vmem:[%s6529_s0 + $0x1f8] sm:$0xff] }
 0x239   :  { %6726 = vst [vmem:[#allocation50_spill] sm:$0xff] %v4682_v58  ;;  %v4703_v20 = vsel %vm1850_vm9, 1.0, %v6708_v8  ;;  %v989_v32 = vadd.s32 %v988_v48, %v986_v9  ;;  %3118 = vmatmul.msk.f32.gmra.mxu2 %vm87_vm0, %v83_v18  ;;  %v2669_v9 = vsel %vm562_vm1, %v4600_v62, 0.0  ;;  %vm794_vm14 = vcmp.eq.f32.partialorder %v4355_v0, %v676_v41 }
 0x23a   :  { %vm1849_vm8 = vcmp.eq.s32.totalorder %v3864_v24, %v959_v4  ;;  %v1173_v31 = vcvt.s32.f32 %v1171_v5  ;;  %v671_v5 = vsel %vm562_vm1, %v4711_v36, -inf  ;;  %v1017_v36 = vcvt.f32.s32 %v4422_v16 }
 0x23b   :  { %1655 = vmin.xlane.f32.xlu2 %v4684_v21  ;;  %v4689_v26 = vsel %vm1849_vm8, 1.0, %v6708_v8  ;;  %vm1851_vm12 = vcmp.eq.s32.totalorder %v3864_v24, %v989_v32  ;;  %v2668_v32 = vsel %vm562_vm1, %v4562_v46, 0.0  ;;  %v2673_v21 = vsel %vm562_vm1, %v4670_v28, 0.0 }
 0x23c   :  { %3187 = vmatmul.msk.f32.gmra.mxu1 %vm562_vm1, %v4689_v26  ;;  %v858_v0 = vsel %vm794_vm14, %v3864_v24, 16 }
 0x23d   :  { %v4693_v37 = vpop.xlane.xlu0 %723 }
 0x23e   :  { %v4696_v33 = vpop.xlane.xlu2 %1220  ;;  %vm810_vm2 = vcmp.eq.f32.partialorder %v4412_v53, %v4693_v37 }
 0x23f   :  { %v874_v37 = vsel %vm810_vm2, %v3864_v24, 16 }
 0x240   :  { %v1015_v18 = vpop.xlane.xlu1 %1014 }
 0x241   :  { %v1016_v16 = vcvt.f32.s32 %v1015_v18  ;;  %v4784_v18 = vsel %vm562_vm1, %v858_v0, 2147483647 }
 0x243   :  { %1584 = vmin.xlane.f32.xlu2 %v4433_v10  ;;  %v4716_v10 = vpop.f32.mrf.mxu2 }
 0x244   :  { %3188 = vmatmul.msk.f32.gmra.mxu1 %vm562_vm1, %v4703_v20 }
 0x245   :  { %v4707_v38 = vpop.xlane.xlu0 %1175 }
 0x246   :  { %v679_v4 = vpop.xlane.xlu2 %678  ;;  %vm1177_vm10 = vcmp.eq.f32.partialorder %v4446_v61, %v4707_v38  ;;  %v1186_v61 = vand.u32 65535, %v4302_v49  ;;  %v2671_v49 = vsel %vm562_vm1, %v4648_v34, 0.0 }
 0x247   :  { %vm795_vm11 = vcmp.eq.f32.partialorder %v4438_v59, %v679_v4  ;;  %v1178_v44 = vsel %vm1177_vm10, %v1173_v31, inf  ;;  %v1002_v59 = vcvt.f32.s32 %v4398_v60  ;;  %v4737_v31 = vsel %vm1851_vm12, 1.0, %v6708_v8 }
 0x248   :  { %v859_v35 = vsel %vm795_vm11, %v3864_v24, 16  ;;  %1179 = vmin.xlane.f32.xlu1 %v1178_v44  ;;  %v4742_v60 = vsub.f32 %v477_v12, %v4352_v7  ;;  %v2670_v44 = vadd.f32 %v2669_v9, %v2668_v32  ;;  %vm1222_vm10 = vcmp.eq.f32.partialorder %v4427_v27, %v4696_v33 }
 0x249   :  { %v4725_v15 = vsel %vm562_vm1, %v859_v35, 2147483647  ;;  %v1003_v30 = vshll.u32 %v1002_v59, 16 }
 0x24a   :  { %6729 = vst [vmem:[#allocation53_spill] sm:$0xff] %v4725_v15  ;;  %v1457_v48 = vshra.s32 %v4725_v15, 16  ;;  %v2672_v14 = vadd.f32 %v2671_v49, %v2670_v44  ;;  %v737_v32 = vsel %vm562_vm1, %v4742_v60, -inf  ;;  %v1018_v15 = vshll.u32 %v1017_v36, 16 }
 0x24b   :  { %672 = vmax.xlane.f32.xlu2 %v671_v5  ;;  %v1188_v5 = vcvt.s32.f32 %v1186_v61  ;;  %v2675_v61 = vsel %vm562_vm1, %v4689_v26, 0.0  ;;  %v483_v58 = vpop.f32.mrf.mxu2 }
 0x24c   :  { %3189 = vmatmul.msk.f32.gmra.mxu1 %vm562_vm1, %v4737_v31  ;;  %v4746_v4 = vcvt.s32.f32 %v1457_v48  ;;  %v4758_v48 = vsub.f32 %v4584_v63, %v4352_v7  ;;  %v1032_v63 = vcvt.f32.s32 %v4444_v23 }
 0x24d   :  { %v1000_v35 = vpop.xlane.xlu0 %999  ;;  %v1193_v9 = vsel %vm1192_vm13, %v1188_v5, inf  ;;  %v2677_v5 = vsel %vm562_vm1, %v4703_v20, 0.0 }
 0x24e   :  { %6730 = vst [vmem:[#allocation54_spill] sm:$0xff] %v4746_v4  ;;  %v1001_v12 = vcvt.f32.s32 %v1000_v35  ;;  %1460 = vmin.xlane.f32.xlu0 %v4746_v4  ;;  %v4754_v42 = vpop.xlane.xlu2 %1235  ;;  %v2674_v35 = vadd.f32 %v2673_v21, %v2672_v14  ;;  %v1201_v4 = vand.u32 65535, %v4361_v13  ;;  %v1019_v21 = vadd.s32 %v1018_v15, %v1016_v16 }
 0x24f   :  { %v4779_v13 = vsub.f32 %v483_v58, %v4352_v7  ;;  %v1033_v44 = vshll.u32 %v1032_v63, 16  ;;  %v1047_v14 = vcvt.f32.s32 %v4488_v1  ;;  %v4799_v16 = vsel %vm562_vm1, %v874_v37, 2147483647 }
 0x250   :  { %v1004_v59 = vadd.s32 %v1003_v30, %v1001_v12  ;;  %1194 = vmin.xlane.f32.xlu1 %v1193_v9  ;;  %v2676_v41 = vadd.f32 %v2675_v61, %v2674_v35  ;;  %v725_v30 = vsel %vm562_vm1, %v4758_v48, -inf  ;;  %v1203_v36 = vcvt.s32.f32 %v1201_v4 }
 0x251   :  { %v743_v19 = vsel %vm562_vm1, %v4779_v13, -inf  ;;  %vm1853_vm4 = vcmp.eq.s32.totalorder %v3864_v24, %v1019_v21  ;;  %v4794_v4 = vsub.f32 %v4255_v6, %v4352_v7  ;;  %v1246_v61 = vand.u32 65535, %v4495_v55 }
 0x252   :  { %vm1852_vm15 = vcmp.eq.s32.totalorder %v3864_v24, %v1004_v59  ;;  %v2678_v15 = vadd.f32 %v2677_v5, %v2676_v41  ;;  %v1208_v58 = vsel %vm1207_vm3, %v1203_v36, inf  ;;  %v2679_v59 = vsel %vm562_vm1, %v4737_v31, 0.0 }
 0x253   :  { %738 = vmax.xlane.f32.xlu2 %v737_v32  ;;  %v4770_v49 = vsel %vm1852_vm15, 1.0, %v6708_v8  ;;  %v1442_v35 = vshra.s32 %v4784_v18, 16  ;;  %v4807_v6 = vsel %vm1853_vm4, 1.0, %v6708_v8  ;;  %v1682_v1 = vshra.s32 %v4799_v16, 16 }
 0x254   :  { %3190 = vmatmul.msk.f32.gmra.mxu1 %vm562_vm1, %v4770_v49  ;;  %v2681_v32 = vsel %vm562_vm1, %v4770_v49, 0.0  ;;  %v2680_v63 = vadd.f32 %v2679_v59, %v2678_v15  ;;  %v662_v41 = vsel %vm562_vm1, %v4794_v4, -inf  ;;  %v1048_v21 = vshll.u32 %v1047_v14, 16 }
 0x255   :  { %v661_v23 = vpop.xlane.xlu0 %660  ;;  %v2683_v15 = vsel %vm562_vm1, %v4807_v6, 0.0 }
 0x256   :  { %726 = vmax.xlane.f32.xlu0 %v725_v30  ;;  %v1030_v53 = vpop.xlane.xlu2 %1029  ;;  %vm789_vm6 = vcmp.eq.f32.partialorder %v4475_v29, %v661_v23  ;;  %v2682_v55 = vadd.f32 %v2681_v32, %v2680_v63  ;;  %v1075_v36 = vpop.xlane.xlu1 %1074  ;;  %v4821_v29 = vcvt.s32.f32 %v1442_v35  ;;  %v1248_v23 = vcvt.s32.f32 %v1246_v61 }
 0x257   :  { %v1031_v12 = vcvt.f32.s32 %v1030_v53  ;;  %v4825_v53 = vsub.f32 %v4614_v11, %v4352_v7  ;;  %v853_v37 = vsel %vm789_vm6, %v3864_v24, 16 }
 0x258   :  { %1209 = vmin.xlane.f32.xlu1 %v1208_v58  ;;  %v2684_v14 = vadd.f32 %v2683_v15, %v2682_v55  ;;  %v4840_v11 = vsel %vm562_vm1, %v853_v37, 2147483647  ;;  %v1216_v37 = vand.u32 65535, %v4405_v43  ;;  %v1092_v15 = vcvt.f32.s32 %v4514_v51 }
 0x259   :  { %v1034_v9 = vadd.s32 %v1033_v44, %v1031_v12  ;;  %v728_v59 = vsel %vm562_vm1, %v4825_v53, -inf  ;;  %v1367_v63 = vshra.s32 %v4840_v11, 16 }
 0x25a   :  { %v1218_v51 = vcvt.s32.f32 %v1216_v37 }
 0x25b   :  { %744 = vmax.xlane.f32.xlu2 %v743_v19  ;;  %vm1854_vm5 = vcmp.eq.s32.totalorder %v3864_v24, %v1034_v9  ;;  %v4837_v9 = vcvt.s32.f32 %v1682_v1 }
 0x25c   :  { %3191 = vmatmul.msk.f32.gmra.mxu1 %vm562_vm1, %v4807_v6  ;;  %v4817_v30 = vsel %vm1854_vm5, 1.0, %v6708_v8 }
 0x25d   :  { %v1045_v0 = vpop.xlane.xlu0 %1044  ;;  %v2685_v58 = vsel %vm562_vm1, %v4817_v30, 0.0 }
 0x25e   :  { %v1046_v44 = vcvt.f32.s32 %v1045_v0  ;;  %663 = vmax.xlane.f32.xlu0 %v662_v41  ;;  %v4819_v5 = vpop.xlane.xlu2 %1250  ;;  %v2686_v61 = vadd.f32 %v2685_v58, %v2684_v14  ;;  %v1077_v0 = vcvt.f32.s32 %v4485_v50  ;;  %v4865_v14 = vcvt.s32.f32 %v1367_v63 }
 0x25f   :  { %vm1252_vm7 = vcmp.eq.f32.partialorder %v4509_v47, %v4819_v5  ;;  %v1122_v47 = vcvt.f32.s32 %v4524_v17 }
 0x260   :  { %v1049_v12 = vadd.s32 %v1048_v21, %v1046_v44  ;;  %1445 = vmin.xlane.f32.xlu1 %v4821_v29  ;;  %v4835_v19 = vsel %vm1252_vm7, %v1248_v23, inf  ;;  %v4860_v44 = vsub.f32 %v4273_v54, %v4352_v7  ;;  %v1078_v50 = vshll.u32 %v1077_v0, 16 }
 0x261   :  { %v1123_v41 = vshll.u32 %v1122_v47, 16  ;;  %v1223_v0 = vsel %vm1222_vm10, %v1218_v51, inf }
 0x262   :  { %vm1855_vm8 = vcmp.eq.s32.totalorder %v3864_v24, %v1049_v12  ;;  %v1076_v12 = vcvt.f32.s32 %v1075_v36 }
 0x263   :  { %1685 = vmin.xlane.f32.xlu2 %v4837_v9  ;;  %v4848_v32 = vsel %vm1855_vm8, 1.0, %v6708_v8 }
 0x264   :  { %3192 = vmatmul.msk.f32.gmra.mxu1 %vm562_vm1, %v4817_v30  ;;  %v2687_v35 = vsel %vm562_vm1, %v4848_v32, 0.0  ;;  %v1079_v43 = vadd.s32 %v1078_v50, %v1076_v12 }
 0x265   :  { %v2688_v1 = vadd.f32 %v2687_v35, %v2686_v61  ;;  %v1090_v23 = vpop.xlane.xlu0 %1089  ;;  %v1062_v61 = vcvt.f32.s32 %v4456_v22  ;;  %v665_v22 = vsel %vm562_vm1, %v4860_v44, -inf  ;;  %v4883_v35 = vsub.f32 %v4637_v25, %v4352_v7 }
 0x266   :  { %v1120_v55 = vpop.xlane.xlu1 %1119  ;;  %729 = vmax.xlane.f32.xlu0 %v728_v59  ;;  %v4855_v17 = vpop.xlane.xlu2 %1265  ;;  %v1091_v47 = vcvt.f32.s32 %v1090_v23  ;;  %vm1857_vm11 = vcmp.eq.s32.totalorder %v3864_v24, %v1079_v43 }
 0x267   :  { %v1121_v21 = vcvt.f32.s32 %v1120_v55  ;;  %v1063_v36 = vshll.u32 %v1062_v61, 16  ;;  %v3131_v25 = vsel %vm1857_vm11, 1.0, %v6708_v8 }
 0x268   :  { %1539 = vmin.xlane.f32.xlu1 %v4332_v45  ;;  %v1093_v45 = vshll.u32 %v1092_v15, 16  ;;  %v2691_v61 = vsel %vm562_vm1, %v3131_v25, 0.0 }
 0x269   :  { %v1124_v58 = vadd.s32 %v1123_v41, %v1121_v21  ;;  %v1276_v41 = vand.u32 65535, %v4540_v56  ;;  %v731_v21 = vsel %vm562_vm1, %v4883_v35, -inf }
 0x26a   :  { %v1094_v63 = vadd.s32 %v1093_v45, %v1091_v47  ;;  %v6731_v45 = vld [vmem:[#allocation40_spill] sm:$0xff] }
 0x26b   :  { %1370 = vmin.xlane.f32.xlu2 %v4865_v14  ;;  %vm1860_vm9 = vcmp.eq.s32.totalorder %v3864_v24, %v1124_v58  ;;  %v1278_v58 = vcvt.s32.f32 %v1276_v41  ;;  %v4906_v43 = vsub.f32 %v6731_v45, %v4352_v7 }
 0x26c   :  { %3193 = vmatmul.msk.f32.gmra.mxu1 %vm562_vm1, %v4848_v32  ;;  %v4873_v54 = vsel %vm1860_vm9, 1.0, %v6708_v8  ;;  %vm1858_vm13 = vcmp.eq.s32.totalorder %v3864_v24, %v1094_v63  ;;  %v6733_v63 = vld [vmem:[#allocation25_spill] sm:$0xff] }
 0x26d   :  { %3247 = vmatpush.xpose.msk.msrb.mxu2 %vm562_vm1, %v4873_v54  ;;  %v3132_v56 = vsel %vm1858_vm13, 1.0, %v6708_v8 }
 0x26e   :  { %666 = vmax.xlane.f32.xlu0 %v665_v22  ;;  %v1060_v59 = vpop.xlane.xlu2 %1059  ;;  %v2693_v51 = vsel %vm562_vm1, %v3132_v56, 0.0 }
 0x26f   :  { %v1061_v55 = vcvt.f32.s32 %v1060_v59 }
 0x270   :  { %1224 = vmin.xlane.f32.xlu1 %v1223_v0 }
 0x271   :  { %v1064_v27 = vadd.s32 %v1063_v36, %v1061_v55  ;;  %v486_v36 = vpop.f32.mrf.mxu2  ;;  %v1107_v55 = vcvt.f32.s32 %v6733_v63 }
 0x273   :  { %vm1856_vm12 = vcmp.eq.s32.totalorder %v3864_v24, %v1064_v27  ;;  %v1108_v41 = vshll.u32 %v1107_v55, 16  ;;  %v6735_v55 = vld [vmem:[#allocation44_spill] sm:$0xff] }
 0x274   :  { %v3130_v23 = vsel %vm1856_vm12, 1.0, %v6708_v8 }
 0x275   :  { %3194 = vmatmul.msk.f32.gmra.mxu1 %vm562_vm1, %v3130_v23  ;;  %v2689_v37 = vsel %vm562_vm1, %v3130_v23, 0.0 }
 0x276   :  { %v2690_v15 = vadd.f32 %v2689_v37, %v2688_v1  ;;  %732 = vmax.xlane.f32.xlu0 %v731_v21  ;;  %v4895_v12 = vpop.xlane.xlu2 %1280  ;;  %v6732_v1 = vld [vmem:[#allocation46_spill] sm:$0xff]  ;;  %v4918_v21 = vsub.f32 %v4672_v52, %v4352_v7 }
 0x277   :  { %vm1282_vm14 = vcmp.eq.f32.partialorder %v4545_v39, %v4895_v12  ;;  %v1231_v22 = vand.u32 65535, %v6732_v1  ;;  %v6734_v39 = vld [vmem:[#allocation14_spill] sm:$0xff] }
 0x278   :  { %1554 = vmin.xlane.f32.xlu1 %v4388_v57  ;;  %v2692_v50 = vadd.f32 %v2691_v61, %v2690_v15  ;;  %v4902_v47 = vsel %vm1282_vm14, %v1278_v58, inf  ;;  %vm1237_vm15 = vcmp.eq.f32.partialorder %v6734_v39, %v4754_v42  ;;  %v668_v57 = vsel %vm562_vm1, %v4906_v43, -inf }
 0x279   :  { %v1233_v0 = vcvt.s32.f32 %v1231_v22  ;;  %v734_v61 = vsel %vm562_vm1, %v4918_v21, -inf  ;;  %v489_v45 = vpop.f32.mrf.mxu2 }
 0x27a   :  { %v2694_v59 = vadd.f32 %v2693_v51, %v2692_v50  ;;  %v2697_v51 = vsel %vm562_vm1, %v4873_v54, 0.0  ;;  %v4932_v63 = vsub.f32 %v489_v45, %v4352_v7 }
 0x27b   :  { %v1238_v15 = vsel %vm1237_vm15, %v1233_v0, inf  ;;  %v6737_v0 = vld [vmem:[#allocation30_spill] sm:$0xff] }
 0x27c   :  { %v749_v7 = vsel %vm562_vm1, %v4932_v63, -inf }
 0x27d   :  { %3195 = vmatmul.msk.f32.gmra.mxu1 %vm562_vm1, %v3131_v25 }
 0x27e   :  { %669 = vmax.xlane.f32.xlu0 %v668_v57  ;;  %v1105_v27 = vpop.xlane.xlu2 %1104 }
 0x27f   :  { %v1106_v37 = vcvt.f32.s32 %v1105_v27  ;;  %v1621_v27 = vand.u32 65535, %v6737_v0 }
 0x280   :  { %1239 = vmin.xlane.f32.xlu1 %v1238_v15 }
 0x281   :  { %v1109_v58 = vadd.s32 %v1108_v41, %v1106_v37  ;;  %v1623_v41 = vcvt.s32.f32 %v1621_v27  ;;  %v6740_v37 = vld [vmem:[#allocation15_spill] sm:$0xff] }
 0x282   :  { %v1261_v15 = vand.u32 65535, %v6740_v37  ;;  %v6746_v37 = vld [vmem:[#allocation38_spill] sm:$0xff] }
 0x283   :  { %vm1859_vm2 = vcmp.eq.s32.totalorder %v3864_v24, %v1109_v58  ;;  %v6741_v58 = vld [vmem:[#allocation24_spill] sm:$0xff] }
 0x284   :  { %v3133_v50 = vsel %vm1859_vm2, 1.0, %v6708_v8 }
 0x285   :  { %3196 = vmatmul.msk.f32.gmra.mxu1 %vm562_vm1, %v3132_v56  ;;  %3248 = vmatpush.xpose.msk.msrb.mxu2 %vm562_vm1, %v3133_v50  ;;  %v2695_v1 = vsel %vm562_vm1, %v3133_v50, 0.0 }
 0x286   :  { %v2696_v52 = vadd.f32 %v2695_v1, %v2694_v59  ;;  %735 = vmax.xlane.f32.xlu0 %v734_v61  ;;  %v4927_v22 = vpop.xlane.xlu2 %1295  ;;  %v1137_v61 = vcvt.f32.s32 %v6741_v58  ;;  %v6742_v1 = vld [vmem:[#allocation9_spill] sm:$0xff] }
 0x288   :  { %1569 = vmin.xlane.f32.xlu1 %v6735_v55  ;;  %v4935_v39 = vadd.f32 %v2697_v51, %v2696_v52  ;;  %v1306_v52 = vand.u32 65535, %v6742_v1  ;;  %v1263_v51 = vcvt.s32.f32 %v1261_v15  ;;  %v1138_v55 = vshll.u32 %v1137_v61, 16  ;;  %v4971_v15 = vld [vmem:[%s6531_s2] ss:$0 sm:$0xff]  ;;  %s3009_s2 = sshll.u32 %s3489_s10, 4  ;;  %s3010_s2 = int_to_ptr.vmem [resolvable:$true] %s3009_s2 }
 0x289   :  { %v4937_v57 = vpop.f32.mrf.mxu1  ;;  %3249 = vmatpush.xpose.msk.msrb.mxu2 %vm562_vm1, %v3132_v56  ;;  %v6739_v56 = vld [vmem:[#allocation18_spill] sm:$0xff]  ;;  %v4974_v58 = vsub.f32 %v486_v36, %v4971_v15 }
 0x28a   :  { %6736 = vst [vmem:[#allocation40_spill] sm:$0xff] %v4935_v39 }
 0x28b   :  { %2438 = vst.msk [vmem:[%s6532_s3] sm:$0xff] %vm87_vm0, %v4937_v57 }
 0x28d   :  { %3197 = vmatmul.msk.f32.gmra.mxu1 %vm562_vm1, %v3133_v50  ;;  %3250 = vmatpush.xpose.msk.msrb.mxu2 %vm562_vm1, %v3131_v25  ;;  %v6743_v50 = vld [vmem:[#allocation19_spill] sm:$0xff] }
 0x28e   :  { %750 = vmax.xlane.f32.xlu0 %v749_v7  ;;  %v4950_v59 = vpop.xlane.xlu2 %1625  ;;  %vm1267_vm4 = vcmp.eq.f32.partialorder %v6743_v50, %v4855_v17 }
 0x28f   :  { %6738 = vst [vmem:[#allocation46_spill] sm:$0xff] %v4950_v59  ;;  %vm1627_vm3 = vcmp.eq.f32.partialorder %v6739_v56, %v4950_v59  ;;  %v1268_v27 = vsel %vm1267_vm4, %v1263_v51, inf  ;;  %v6745_v56 = vld [vmem:[#allocation20_spill] sm:$0xff] }
 0x290   :  { %v1628_v45 = vsel %vm1627_vm3, %v1623_v41, inf  ;;  %v1308_v41 = vcvt.s32.f32 %v1306_v52  ;;  %vm788_vm5 = vcmp.eq.f32.partialorder %v6746_v37, %v6745_v56 }
 0x291   :  { %3251 = vmatpush.xpose.msk.msrb.mxu2 %vm562_vm1, %v3130_v23  ;;  %1629 = vmin.xlane.f32.xlu2 %v1628_v45  ;;  %v852_v1 = vsel %vm788_vm5, %v3864_v24, 16 }
 0x293   :  { %v1135_v25 = vpop.xlane.xlu1 %1134 }
 0x294   :  { %v1136_v0 = vcvt.f32.s32 %v1135_v25 }
 0x295   :  { %3198 = vmatmul.msk.f32.gmra.mxu1 %vm562_vm1, %v4873_v54  ;;  %3252 = vmatpush.xpose.msk.msrb.mxu2 %vm562_vm1, %v4848_v32  ;;  %v6747_v54 = vld [vmem:[#allocation10_spill] sm:$0xff]  ;;  %v1152_v32 = vcvt.f32.s32 %v4586_v2  ;;  %v746_v2 = vsel %vm562_vm1, %v4974_v58, -inf }
 0x296   :  { %v1139_v7 = vadd.s32 %v1138_v55, %v1136_v0  ;;  %1269 = vmin.xlane.f32.xlu0 %v1268_v27  ;;  %v4964_v23 = vpop.xlane.xlu2 %1310  ;;  %v6750_v27 = vld [vmem:[#allocation21_spill] sm:$0xff] }
 0x297   :  { %6744 = vst [vmem:[#allocation25_spill] sm:$0xff] %v4964_v23  ;;  %vm1312_vm6 = vcmp.eq.f32.partialorder %v6747_v54, %v4964_v23  ;;  %v1153_v52 = vshll.u32 %v1152_v32, 16 }
 0x298   :  { %v4979_v61 = vsel %vm1312_vm6, %v1308_v41, inf  ;;  %vm1861_vm7 = vcmp.eq.s32.totalorder %v3864_v24, %v1139_v7  ;;  %v1167_v7 = vcvt.f32.s32 %v6750_v27 }
 0x299   :  { %v4981_v45 = vpop.f32.mrf.mxu1  ;;  %3253 = vmatpush.xpose.msk.msrb.mxu2 %vm562_vm1, %v4817_v30  ;;  %v4995_v25 = vsel %vm1861_vm7, 1.0, %v6708_v8  ;;  %v4998_v30 = vsel %vm562_vm1, %v852_v1, 2147483647  ;;  %v5025_v1 = vsub.f32 %v4716_v10, %v4971_v15  ;;  %v6754_v10 = vld [vmem:[#allocation16_spill] sm:$0xff] }
 0x29a   :  { %2439 = vst.msk [vmem:[%s6532_s3 + $0x8] sm:$0xff] %vm87_vm0, %v4981_v45  ;;  %v1352_v0 = vshra.s32 %v4998_v30, 16  ;;  %v1168_v56 = vshll.u32 %v1167_v7, 16 }
 0x29b   :  { %v1150_v36 = vpop.xlane.xlu1 %1149  ;;  %6748 = vst [vmem:[#allocation14_spill] sm:$0xff] %v4995_v25 }
 0x29c   :  { %v1151_v50 = vcvt.f32.s32 %v1150_v36 }
 0x29d   :  { %3199 = vmatmul.msk.f32.gmra.mxu1 %vm562_vm1, %v4995_v25  ;;  %3254 = vmatpush.xpose.msk.msrb.mxu2 %vm562_vm1, %v4807_v6  ;;  %v5014_v6 = vcvt.s32.f32 %v1352_v0 }
 0x29e   :  { %v1154_v51 = vadd.s32 %v1153_v52, %v1151_v50  ;;  %747 = vmax.xlane.f32.xlu0 %v746_v2  ;;  %v5004_v55 = vpop.xlane.xlu2 %1640  ;;  %v1291_v52 = vand.u32 65535, %v6754_v10 }
 0x29f   :  { %6749 = vst [vmem:[#allocation44_spill] sm:$0xff] %v5004_v55 }
 0x2a0   :  { %vm1862_vm8 = vcmp.eq.s32.totalorder %v3864_v24, %v1154_v51  ;;  %v6755_v51 = vld [vmem:[#allocation22_spill] sm:$0xff]  ;;  %v1293_v27 = vcvt.s32.f32 %v1291_v52 }
 0x2a1   :  { %3255 = vmatpush.xpose.msk.msrb.mxu2 %vm562_vm1, %v4770_v49  ;;  %v5012_v54 = vsel %vm1862_vm8, 1.0, %v6708_v8  ;;  %vm1297_vm10 = vcmp.eq.f32.partialorder %v6755_v51, %v4927_v22  ;;  %v1197_v51 = vcvt.f32.s32 %v4609_v40 }
 0x2a2   :  { %6751 = vst [vmem:[#allocation30_spill] sm:$0xff] %v5012_v54  ;;  %v1298_v7 = vsel %vm1297_vm10, %v1293_v27, inf }
 0x2a3   :  { %v1165_v41 = vpop.xlane.xlu1 %1164  ;;  %v1198_v40 = vshll.u32 %v1197_v51, 16 }
 0x2a4   :  { %v1166_v37 = vcvt.f32.s32 %v1165_v41 }
 0x2a5   :  { %3200 = vmatmul.msk.f32.gmra.mxu1 %vm562_vm1, %v5012_v54  ;;  %3256 = vmatpush.xpose.msk.msrb.mxu2 %vm562_vm1, %v4737_v31  ;;  %v740_v31 = vsel %vm562_vm1, %v5025_v1, -inf }
 0x2a6   :  { %v1169_v32 = vadd.s32 %v1168_v56, %v1166_v37  ;;  %1355 = vmin.xlane.f32.xlu0 %v5014_v6  ;;  %v5021_v49 = vpop.xlane.xlu2 %1325  ;;  %v1182_v37 = vcvt.f32.s32 %v4707_v38 }
 0x2a7   :  { %6752 = vst [vmem:[#allocation18_spill] sm:$0xff] %v5021_v49 }
 0x2a8   :  { %vm1863_vm9 = vcmp.eq.s32.totalorder %v3864_v24, %v1169_v32  ;;  %v1183_v10 = vshll.u32 %v1182_v37, 16 }
 0x2a9   :  { %v5027_v36 = vpop.f32.mrf.mxu1  ;;  %3257 = vmatpush.xpose.msk.msrb.mxu2 %vm562_vm1, %v4703_v20  ;;  %v5040_v2 = vsel %vm1863_vm9, 1.0, %v6708_v8 }
 0x2aa   :  { %2440 = vst.msk [vmem:[%s6532_s3 + $0x10] sm:$0xff] %vm87_vm0, %v5027_v36 }
 0x2ab   :  { %6753 = vst [vmem:[#allocation15_spill] sm:$0xff] %v5040_v2 }
 0x2ad   :  { %3201 = vmatmul.msk.f32.gmra.mxu1 %vm562_vm1, %v5040_v2  ;;  %3258 = vmatpush.xpose.msk.msrb.mxu2 %vm562_vm1, %v4689_v26  ;;  %v6756_v26 = vld [vmem:[#allocation45_spill] sm:$0xff]  ;;  %v6765_v2 = vld [vmem:[#allocation27_spill] sm:$0xff] }
 0x2ae   :  { %741 = vmax.xlane.f32.xlu0 %v740_v31  ;;  %v5046_v20 = vpop.xlane.xlu2 %1655  ;;  %v1587_v0 = vcvt.f32.s32 %v6756_v26  ;;  %vm1642_vm4 = vcmp.eq.f32.partialorder %v6765_v2, %v5004_v55  ;;  %v6767_v2 = vld [vmem:[#allocation35_spill] sm:$0xff] }
 0x2b0   :  { %v1588_v56 = vshll.u32 %v1587_v0, 16 }
 0x2b1   :  { %v5049_v50 = vpop.f32.mrf.mxu1  ;;  %3259 = vmatpush.xpose.msk.msrb.mxu2 %vm562_vm1, %v4670_v28 }
 0x2b2   :  { %2441 = vst.msk [vmem:[%s6532_s3 + $0x18] sm:$0xff] %vm87_vm0, %v5049_v50 }
 0x2b5   :  { %3260 = vmatpush.xpose.msk.msrb.mxu2 %vm562_vm1, %v4648_v34 }
 0x2b6   :  { %1299 = vmin.xlane.f32.xlu0 %v1298_v7  ;;  %v1585_v41 = vpop.xlane.xlu2 %1584 }
 0x2b7   :  { %v1586_v28 = vcvt.f32.s32 %v1585_v41  ;;  %v1212_v41 = vcvt.f32.s32 %v4657_v3 }
 0x2b9   :  { %v5064_v32 = vadd.s32 %v1588_v56, %v1586_v28  ;;  %v5066_v31 = vpop.f32.mrf.mxu1  ;;  %3261 = vmatpush.xpose.msk.msrb.mxu2 %vm562_vm1, %v4600_v62  ;;  %v1213_v3 = vshll.u32 %v1212_v41, 16 }
 0x2ba   :  { %2442 = vst.msk [vmem:[%s6532_s3 + $0x20] sm:$0xff] %vm87_vm0, %v5066_v31 }
 0x2bb   :  { %v1180_v34 = vpop.xlane.xlu1 %1179 }
 0x2bc   :  { %v1181_v52 = vcvt.f32.s32 %v1180_v34 }
 0x2bd   :  { %3262 = vmatpush.xpose.msk.msrb.mxu2 %vm562_vm1, %v4562_v46 }
 0x2be   :  { %v1184_v38 = vadd.s32 %v1183_v10, %v1181_v52 }
 0x2c0   :  { %vm1864_vm11 = vcmp.eq.s32.totalorder %v3864_v24, %v1184_v38  ;;  %v1441_v38 = vand.u32 65535, %v4784_v18 }
 0x2c1   :  { %v5079_v26 = vpop.f32.mrf.mxu1  ;;  %v5081_v62 = vpop.xlane.xlu0 %1460  ;;  %v5084_v0 = vsel %vm1864_vm11, 1.0, %v6708_v8 }
 0x2c2   :  { %6757 = vst [vmem:[#allocation24_spill] sm:$0xff] %v5084_v0  ;;  %3202 = vmatmul.msk.f32.gmra.mxu1 %vm562_vm1, %v5084_v0  ;;  %v1443_v41 = vcvt.s32.f32 %v1441_v38 }
 0x2c3   :  { %2443 = vst.msk [vmem:[%s6532_s3 + $0x28] sm:$0xff] %vm87_vm0, %v5079_v26  ;;  %v1195_v46 = vpop.xlane.xlu1 %1194 }
 0x2c4   :  { %v1196_v27 = vcvt.f32.s32 %v1195_v46 }
 0x2c6   :  { %v1199_v7 = vadd.s32 %v1198_v40, %v1196_v27 }
 0x2c8   :  { %vm1865_vm12 = vcmp.eq.s32.totalorder %v3864_v24, %v1199_v7 }
 0x2c9   :  { %v5095_v56 = vpop.f32.mrf.mxu1  ;;  %v5097_v28 = vpop.xlane.xlu0 %726  ;;  %v5100_v37 = vsel %vm1865_vm12, 1.0, %v6708_v8 }
 0x2ca   :  { %6758 = vst [vmem:[#allocation9_spill] sm:$0xff] %v5100_v37  ;;  %3203 = vmatmul.msk.f32.gmra.mxu1 %vm562_vm1, %v5100_v37  ;;  %vm811_vm12 = vcmp.eq.f32.partialorder %v4758_v48, %v5097_v28  ;;  %v6779_v28 = vld [vmem:[#allocation50_spill] sm:$0xff] }
 0x2cb   :  { %2444 = vst.msk [vmem:[%s6532_s3 + $0x30] sm:$0xff] %vm87_vm0, %v5095_v56  ;;  %v1210_v34 = vpop.xlane.xlu1 %1209 }
 0x2cc   :  { %v1211_v10 = vcvt.f32.s32 %v1210_v34 }
 0x2ce   :  { %v1214_v52 = vadd.s32 %v1213_v3, %v1211_v10 }
 0x2d0   :  { %vm1866_vm13 = vcmp.eq.s32.totalorder %v3864_v24, %v1214_v52 }
 0x2d1   :  { %v5111_v51 = vpop.f32.mrf.mxu1  ;;  %v664_v46 = vpop.xlane.xlu0 %663  ;;  %v5114_v40 = vsel %vm1866_vm13, 1.0, %v6708_v8 }
 0x2d2   :  { %6759 = vst [vmem:[#allocation19_spill] sm:$0xff] %v5114_v40  ;;  %vm790_vm14 = vcmp.eq.f32.partialorder %v4794_v4, %v664_v46  ;;  %3204 = vmatmul.msk.f32.gmra.mxu1 %vm562_vm1, %v5114_v40  ;;  %v6760_v4 = vld [vmem:[#allocation41_spill] sm:$0xff] }
 0x2d3   :  { %2445 = vst.msk [vmem:[%s6532_s3 + $0x38] sm:$0xff] %vm87_vm0, %v5111_v51  ;;  %v854_v27 = vsel %vm790_vm14, %v3864_v24, 16  ;;  %v5125_v18 = vpop.xlane.xlu1 %1445  ;;  %v1542_v52 = vcvt.f32.s32 %v6760_v4  ;;  %v6761_v46 = vld [vmem:[#allocation53_spill] sm:$0xff] }
 0x2d4   :  { %v5128_v7 = vsel %vm562_vm1, %v854_v27, 2147483647  ;;  %vm1447_vm15 = vcmp.eq.f32.partialorder %v4821_v29, %v5125_v18  ;;  %v1456_v40 = vand.u32 65535, %v6761_v46  ;;  %v6762_v27 = vld [vmem:[#allocation34_spill] sm:$0xff] }
 0x2d5   :  { %v1382_v34 = vshra.s32 %v5128_v7, 16  ;;  %v1448_v3 = vsel %vm1447_vm15, %v1443_v41, inf  ;;  %v1636_v38 = vand.u32 65535, %v6762_v27 }
 0x2d6   :  { %1449 = vmin.xlane.f32.xlu1 %v1448_v3  ;;  %v1543_v3 = vshll.u32 %v1542_v52, 16  ;;  %v1458_v27 = vcvt.s32.f32 %v1456_v40  ;;  %v1321_v40 = vand.u32 65535, %v6767_v2 }
 0x2d7   :  { %v5133_v10 = vcvt.s32.f32 %v1382_v34  ;;  %v6763_v34 = vld [vmem:[#allocation54_spill] sm:$0xff] }
 0x2d8   :  { %vm1462_vm3 = vcmp.eq.f32.partialorder %v6763_v34, %v5081_v62  ;;  %v1227_v34 = vcvt.f32.s32 %v4696_v33  ;;  %v6768_v33 = vld [vmem:[#allocation26_spill] sm:$0xff] }
 0x2d9   :  { %v5137_v37 = vpop.f32.mrf.mxu1  ;;  %v730_v0 = vpop.xlane.xlu0 %729  ;;  %1385 = vmin.xlane.f32.xlu0 %v5133_v10 }
 0x2da   :  { %2446 = vst.msk [vmem:[%s6532_s3 + $0x40] sm:$0xff] %vm87_vm0, %v5137_v37  ;;  %vm812_vm2 = vcmp.eq.f32.partialorder %v4825_v53, %v730_v0  ;;  %v1463_v53 = vsel %vm1462_vm3, %v1458_v27, inf  ;;  %v1638_v0 = vcvt.s32.f32 %v1636_v38  ;;  %v1228_v38 = vshll.u32 %v1227_v34, 16  ;;  %v492_v27 = vpop.f32.mrf.mxu2 }
 0x2db   :  { %v876_v29 = vsel %vm812_vm2, %v3864_v24, 16  ;;  %v1540_v41 = vpop.xlane.xlu1 %1539 }
 0x2dc   :  { %v5151_v4 = vsel %vm562_vm1, %v876_v29, 2147483647  ;;  %v1541_v46 = vcvt.f32.s32 %v1540_v41  ;;  %v1643_v52 = vsel %vm1642_vm4, %v1638_v0, inf  ;;  %v1323_v0 = vcvt.s32.f32 %v1321_v40  ;;  %v6773_v40 = vld [vmem:[#allocation29_spill] sm:$0xff] }
 0x2dd   :  { %6764 = vst [vmem:[#allocation20_spill] sm:$0xff] %v5151_v4  ;;  %v1712_v39 = vshra.s32 %v5151_v4, 16 }
 0x2de   :  { %v5156_v54 = vadd.s32 %v1543_v3, %v1541_v46  ;;  %1464 = vmin.xlane.f32.xlu1 %v1463_v53  ;;  %v6769_v3 = vld [vmem:[#allocation33_spill] sm:$0xff]  ;;  %v6770_v46 = vld [vmem:[#allocation23_spill] sm:$0xff] }
 0x2df   :  { %v5158_v25 = vcvt.s32.f32 %v1712_v39  ;;  %vm787_vm5 = vcmp.eq.f32.partialorder %v6769_v3, %v6768_v33  ;;  %vm1327_vm6 = vcmp.eq.f32.partialorder %v6770_v46, %v5021_v49  ;;  %v3347_v46 = vld [vmem:[%s6529_s0] sm:$0xff] }
 0x2e0   :  { %v851_v55 = vsel %vm787_vm5, %v3864_v24, 16  ;;  %v1328_v23 = vsel %vm1327_vm6, %v1323_v0, inf }
 0x2e1   :  { %6766 = vst [vmem:[#allocation38_spill] sm:$0xff] %v5158_v25  ;;  %v5161_v59 = vpop.xlane.xlu0 %666  ;;  %v5163_v29 = vpop.f32.mrf.mxu1  ;;  %1715 = vmin.xlane.f32.xlu2 %v5158_v25  ;;  %1644 = vmin.xlane.f32.xlu0 %v1643_v52  ;;  %v6771_v52 = vld [vmem:[#allocation42_spill] sm:$0xff]  ;;  %v5180_v25 = vsub.f32 %v492_v27, %v4971_v15  ;;  %v3346_v15 = vld [vmem:[%s6529_s0 + $0x8] sm:$0xff]  ;;  %v2604_v27 = vsub.f32 %v4937_v57, %v3347_v46 }
 0x2e2   :  { %2447 = vst.msk [vmem:[%s6532_s3 + $0x48] sm:$0xff] %vm87_vm0, %v5163_v29  ;;  %v1557_v2 = vcvt.f32.s32 %v6771_v52  ;;  %vm791_vm13 = vcmp.eq.f32.partialorder %v4860_v44, %v5161_v59 }
 0x2e3   :  { %v1225_v39 = vpop.xlane.xlu1 %1224  ;;  %v752_v0 = vsel %vm562_vm1, %v5180_v25, -inf }
 0x2e4   :  { %v1226_v41 = vcvt.f32.s32 %v1225_v39 }
 0x2e6   :  { %v1229_v53 = vadd.s32 %v1228_v38, %v1226_v41  ;;  %1254 = vmin.xlane.f32.xlu1 %v4835_v19  ;;  %v6774_v38 = vld [vmem:[#allocation12_spill] sm:$0xff]  ;;  %v1558_v19 = vshll.u32 %v1557_v2, 16  ;;  %v2605_v41 = vsub.f32 %v4981_v45, %v3346_v15  ;;  %v3348_v45 = vld [vmem:[%s6529_s0 + $0x10] sm:$0xff] }
 0x2e7   :  { %vm809_vm8 = vcmp.eq.f32.partialorder %v6774_v38, %v6773_v40  ;;  %v2606_v52 = vsub.f32 %v5027_v36, %v3348_v45 }
 0x2e8   :  { %vm1867_vm7 = vcmp.eq.s32.totalorder %v3864_v24, %v1229_v53  ;;  %v873_v57 = vsel %vm809_vm8, %v3864_v24, 16 }
 0x2e9   :  { %v733_v34 = vpop.xlane.xlu0 %732  ;;  %v5183_v39 = vpop.f32.mrf.mxu1  ;;  %1329 = vmin.xlane.f32.xlu2 %v1328_v23  ;;  %v5186_v33 = vsel %vm1867_vm7, 1.0, %v6708_v8  ;;  %v5199_v23 = vsel %vm562_vm1, %v851_v55, 2147483647  ;;  %v2805_v45 = vmul.f32 %v2606_v52, %v2606_v52  ;;  %v3351_v52 = vld [vmem:[%s6529_s0 + $0x28] sm:$0xff] }
 0x2ea   :  { %6772 = vst [vmem:[#allocation10_spill] sm:$0xff] %v5186_v33  ;;  %vm813_vm9 = vcmp.eq.f32.partialorder %v4883_v35, %v733_v34  ;;  %3205 = vmatmul.msk.f32.gmra.mxu1 %vm562_vm1, %v5186_v33  ;;  %v1337_v15 = vshra.s32 %v5199_v23, 16  ;;  %v3350_v33 = vld [vmem:[%s6529_s0 + $0x20] sm:$0xff] }
 0x2eb   :  { %2448 = vst.msk [vmem:[%s6532_s3 + $0x50] sm:$0xff] %vm87_vm0, %v5183_v39  ;;  %v877_v35 = vsel %vm813_vm9, %v3864_v24, 16  ;;  %v1555_v3 = vpop.xlane.xlu1 %1554  ;;  %v2608_v40 = vsub.f32 %v5066_v31, %v3350_v33  ;;  %v2609_v31 = vsub.f32 %v5079_v26, %v3351_v52  ;;  %v3352_v26 = vld [vmem:[%s6529_s0 + $0x30] sm:$0xff] }
 0x2ec   :  { %v5211_v53 = vsel %vm562_vm1, %v877_v35, 2147483647  ;;  %v1556_v55 = vcvt.f32.s32 %v1555_v3  ;;  %v2804_v35 = vmul.f32 %v2605_v41, %v2605_v41  ;;  %v3349_v3 = vld [vmem:[%s6529_s0 + $0x18] sm:$0xff] }
 0x2ed   :  { %v1727_v2 = vshra.s32 %v5211_v53, 16  ;;  %v2607_v46 = vsub.f32 %v5049_v50, %v3349_v3  ;;  %v5240_v50 = vcvt.s32.f32 %v1337_v15  ;;  %v2870_v3 = vsel %vm87_vm0, %v2805_v45, 0.0 }
 0x2ee   :  { %v5220_v34 = vadd.s32 %v1558_v19, %v1556_v55  ;;  %753 = vmax.xlane.f32.xlu1 %v752_v0  ;;  %v1242_v19 = vcvt.f32.s32 %v4754_v42  ;;  %v2803_v55 = vmul.f32 %v2604_v27, %v2604_v27  ;;  %v5243_v0 = vsel %vm562_vm1, %v873_v57, 2147483647 }
 0x2ef   :  { %v5231_v36 = vcvt.s32.f32 %v1727_v2  ;;  %v2868_v42 = vsel %vm87_vm0, %v2804_v35, 0.0  ;;  %v2806_v27 = vmul.f32 %v2607_v46, %v2607_v46  ;;  %v2807_v46 = vmul.f32 %v2608_v40, %v2608_v40 }
 0x2f0   :  { %v1243_v2 = vshll.u32 %v1242_v19, 16  ;;  %v2867_v15 = vsel %vm87_vm0, %v2803_v55, 0.0  ;;  %v2808_v55 = vmul.f32 %v2609_v31, %v2609_v31 }
 0x2f1   :  { %6775 = vst [vmem:[#allocation21_spill] sm:$0xff] %v5231_v36  ;;  %v670_v38 = vpop.xlane.xlu0 %669  ;;  %1730 = vmin.xlane.f32.xlu0 %v5231_v36  ;;  %v2869_v49 = vadd.f32 %v2868_v42, %v2867_v15  ;;  %v2872_v19 = vsel %vm87_vm0, %v2806_v27, 0.0  ;;  %v1667_v42 = vshra.s32 %v5243_v0, 16  ;;  %v2874_v27 = vsel %vm87_vm0, %v2807_v46, 0.0  ;;  %v3355_v46 = vld [vmem:[%s6529_s0 + $0x48] sm:$0xff] }
 0x2f2   :  { %vm792_vm10 = vcmp.eq.f32.partialorder %v4906_v43, %v670_v38  ;;  %v2279_v41 = vpop.f32.mrf.mxu1  ;;  %v2610_v38 = vsub.f32 %v5095_v56, %v3352_v26  ;;  %v2613_v26 = vsub.f32 %v5163_v29, %v3355_v46 }
 0x2f3   :  { %v856_v33 = vsel %vm792_vm10, %v3864_v24, 16  ;;  %2449 = vst.msk [vmem:[%s6532_s3 + $0x58] sm:$0xff] %vm87_vm0, %v2279_v41  ;;  %v1240_v43 = vpop.xlane.xlu1 %1239  ;;  %v2871_v56 = vadd.f32 %v2870_v3, %v2869_v49 }
 0x2f4   :  { %v5257_v57 = vsel %vm562_vm1, %v856_v33, 2147483647  ;;  %v1241_v35 = vcvt.f32.s32 %v1240_v43  ;;  %v3353_v33 = vld [vmem:[%s6529_s0 + $0x38] sm:$0xff]  ;;  %v2809_v31 = vmul.f32 %v2610_v38, %v2610_v38 }
 0x2f5   :  { %v1412_v52 = vshra.s32 %v5257_v57, 16  ;;  %v2611_v45 = vsub.f32 %v5111_v51, %v3353_v33  ;;  %v6776_v43 = vld [vmem:[#allocation43_spill] sm:$0xff] }
 0x2f6   :  { %v1244_v36 = vadd.s32 %v1243_v2, %v1241_v35  ;;  %1340 = vmin.xlane.f32.xlu1 %v5240_v50  ;;  %v1572_v4 = vcvt.f32.s32 %v6776_v43  ;;  %v3354_v2 = vld [vmem:[%s6529_s0 + $0x40] sm:$0xff]  ;;  %v2873_v35 = vadd.f32 %v2872_v19, %v2871_v56  ;;  %v2878_v33 = vsel %vm87_vm0, %v2809_v31, 0.0 }
 0x2f7   :  { %v5271_v40 = vcvt.s32.f32 %v1412_v52  ;;  %v2612_v51 = vsub.f32 %v5137_v37, %v3354_v2  ;;  %v2810_v3 = vmul.f32 %v2611_v45, %v2611_v45  ;;  %v5301_v56 = vcvt.s32.f32 %v1667_v42 }
 0x2f8   :  { %vm1868_vm11 = vcmp.eq.s32.totalorder %v3864_v24, %v1244_v36  ;;  %v2876_v36 = vsel %vm87_vm0, %v2808_v55, 0.0  ;;  %v1573_v38 = vshll.u32 %v1572_v4, 16  ;;  %v2875_v52 = vadd.f32 %v2874_v27, %v2873_v35  ;;  %v3356_v55 = vld [vmem:[%s6529_s0 + $0x50] sm:$0xff]  ;;  %v3357_v4 = vld [vmem:[%s6529_s0 + $0x58] sm:$0xff] }
 0x2f9   :  { %1415 = vmin.xlane.f32.xlu2 %v5271_v40  ;;  %v5283_v15 = vsel %vm1868_vm11, 1.0, %v6708_v8  ;;  %v2811_v43 = vmul.f32 %v2612_v51, %v2612_v51  ;;  %v2614_v45 = vsub.f32 %v5183_v39, %v3356_v55  ;;  %v2880_v46 = vsel %vm87_vm0, %v2810_v3, 0.0  ;;  %v3358_v39 = vld [vmem:[%s6529_s0 + $0x60] sm:$0xff] }
 0x2fa   :  { %6777 = vst [vmem:[#allocation16_spill] sm:$0xff] %v5283_v15  ;;  %v2282_v49 = vpop.f32.mrf.mxu1  ;;  %3206 = vmatmul.msk.f32.gmra.mxu1 %vm562_vm1, %v5283_v15  ;;  %v2877_v29 = vadd.f32 %v2876_v36, %v2875_v52  ;;  %v2812_v15 = vmul.f32 %v2613_v26, %v2613_v26  ;;  %v2615_v27 = vsub.f32 %v2279_v41, %v3357_v4  ;;  %v3359_v41 = vld [vmem:[%s6529_s0 + $0x68] sm:$0xff] }
 0x2fb   :  { %2450 = vst.msk [vmem:[%s6532_s3 + $0x60] sm:$0xff] %vm87_vm0, %v2282_v49  ;;  %v1570_v37 = vpop.xlane.xlu1 %1569  ;;  %v2882_v51 = vsel %vm87_vm0, %v2811_v43, 0.0  ;;  %v2813_v35 = vmul.f32 %v2614_v45, %v2614_v45  ;;  %v2616_v42 = vsub.f32 %v2282_v49, %v3358_v39 }
 0x2fc   :  { %v1571_v19 = vcvt.f32.s32 %v1570_v37  ;;  %v2879_v31 = vadd.f32 %v2878_v33, %v2877_v29  ;;  %v2884_v3 = vsel %vm87_vm0, %v2812_v15, 0.0  ;;  %v2814_v26 = vmul.f32 %v2615_v27, %v2615_v27  ;;  %v6778_v15 = vld [vmem:[#allocation47_spill] sm:$0xff] }
 0x2fd   :  { %v2815_v33 = vmul.f32 %v2616_v42, %v2616_v42 }
 0x2fe   :  { %v5303_v2 = vadd.s32 %v1573_v38, %v1571_v19  ;;  %1670 = vmin.xlane.f32.xlu1 %v5301_v56  ;;  %v2881_v36 = vadd.f32 %v2880_v46, %v2879_v31  ;;  %v2886_v19 = vsel %vm87_vm0, %v2813_v35, 0.0  ;;  %v2888_v43 = vsel %vm87_vm0, %v2814_v26, 0.0  ;;  %v3360_v31 = vld [vmem:[%s6529_s0 + $0x70] sm:$0xff] }
 0x2ff   :  { %v2890_v29 = vsel %vm87_vm0, %v2815_v33, 0.0  ;;  %v875_v26 = vsel %vm811_vm12, %v3864_v24, 16 }
 0x300   :  { %v2883_v52 = vadd.f32 %v2882_v51, %v2881_v36 }
 0x302   :  { %v2285_v37 = vpop.f32.mrf.mxu1  ;;  %v2885_v49 = vadd.f32 %v2884_v3, %v2883_v52 }
 0x303   :  { %2451 = vst.msk [vmem:[%s6532_s3 + $0x68] sm:$0xff] %vm87_vm0, %v2285_v37  ;;  %v2617_v38 = vsub.f32 %v2285_v37, %v3359_v41  ;;  %v3361_v41 = vld [vmem:[%s6529_s0 + $0x78] sm:$0xff] }
 0x304   :  { %v2887_v45 = vadd.f32 %v2886_v19, %v2885_v49 }
 0x305   :  { %v2816_v55 = vmul.f32 %v2617_v38, %v2617_v38 }
 0x306   :  { %1599 = vmin.xlane.f32.xlu1 %v6778_v15  ;;  %v2889_v46 = vadd.f32 %v2888_v43, %v2887_v45  ;;  %v3362_v43 = vld [vmem:[%s6529_s0 + $0x80] sm:$0xff] }
 0x307   :  { %v2892_v27 = vsel %vm87_vm0, %v2816_v55, 0.0 }
 0x308   :  { %v2891_v35 = vadd.f32 %v2890_v29, %v2889_v46 }
 0x30a   :  { %v2288_v4 = vpop.f32.mrf.mxu1  ;;  %v2893_v42 = vadd.f32 %v2892_v27, %v2891_v35  ;;  %v855_v27 = vsel %vm791_vm13, %v3864_v24, 16 }
 0x30b   :  { %2452 = vst.msk [vmem:[%s6532_s3 + $0x70] sm:$0xff] %vm87_vm0, %v2288_v4  ;;  %v2618_v51 = vsub.f32 %v2288_v4, %v3360_v31  ;;  %v3363_v31 = vld [vmem:[%s6529_s0 + $0x88] sm:$0xff] }
 0x30d   :  { %v2817_v39 = vmul.f32 %v2618_v51, %v2618_v51 }
 0x30e   :  { %1284 = vmin.xlane.f32.xlu1 %v4902_v47  ;;  %v5347_v47 = vsel %vm562_vm1, %v875_v26, 2147483647 }
 0x30f   :  { %v2894_v36 = vsel %vm87_vm0, %v2817_v39, 0.0  ;;  %v1697_v33 = vshra.s32 %v5347_v47, 16  ;;  %v5374_v39 = vsel %vm562_vm1, %v855_v27, 2147483647 }
 0x310   :  { %v2895_v37 = vadd.f32 %v2894_v36, %v2893_v42  ;;  %v1397_v42 = vshra.s32 %v5374_v39, 16 }
 0x311   :  { %v5359_v45 = vcvt.s32.f32 %v1697_v33  ;;  %v5394_v33 = vpop.xlane.xlu2 %672 }
 0x312   :  { %v2291_v3 = vpop.f32.mrf.mxu1 }
 0x313   :  { %2453 = vst.msk [vmem:[%s6532_s3 + $0x78] sm:$0xff] %vm87_vm0, %v2291_v3  ;;  %v2619_v38 = vsub.f32 %v2291_v3, %v3361_v41  ;;  %v3364_v3 = vld [vmem:[%s6529_s0 + $0x90] sm:$0xff] }
 0x315   :  { %v2818_v52 = vmul.f32 %v2619_v38, %v2619_v38  ;;  %v5386_v38 = vcvt.s32.f32 %v1397_v42 }
 0x316   :  { %1614 = vmin.xlane.f32.xlu1 %v6779_v28 }
 0x317   :  { %v2896_v48 = vsel %vm87_vm0, %v2818_v52, 0.0  ;;  %v6780_v52 = vld [vmem:[#allocation11_spill] sm:$0xff] }
 0x318   :  { %v2897_v19 = vadd.f32 %v2896_v48, %v2895_v37  ;;  %v736_v37 = vpop.xlane.xlu0 %735  ;;  %v1651_v48 = vand.u32 65535, %v6780_v52  ;;  %v3366_v52 = vld [vmem:[%s6529_s0 + $0xa0] sm:$0xff] }
 0x319   :  { %vm814_vm14 = vcmp.eq.f32.partialorder %v4918_v21, %v736_v37 }
 0x31a   :  { %v2294_v49 = vpop.f32.mrf.mxu1 }
 0x31b   :  { %2454 = vst.msk [vmem:[%s6532_s3 + $0x80] sm:$0xff] %vm87_vm0, %v2294_v49  ;;  %v2620_v55 = vsub.f32 %v2294_v49, %v3362_v43  ;;  %v878_v49 = vsel %vm814_vm14, %v3864_v24, 16  ;;  %v1653_v43 = vcvt.s32.f32 %v1651_v48 }
 0x31d   :  { %v2819_v15 = vmul.f32 %v2620_v55, %v2620_v55 }
 0x31e   :  { %1700 = vmin.xlane.f32.xlu1 %v5359_v45 }
 0x31f   :  { %v2898_v29 = vsel %vm87_vm0, %v2819_v15, 0.0  ;;  %v5398_v15 = vsel %vm562_vm1, %v878_v49, 2147483647 }
 0x320   :  { %v2899_v46 = vadd.f32 %v2898_v29, %v2897_v19  ;;  %v6781_v19 = vld [vmem:[#allocation51_spill] sm:$0xff]  ;;  %v751_v55 = vpop.xlane.xlu0 %750 }
 0x321   :  { %vm1657_vm15 = vcmp.eq.f32.partialorder %v6781_v19, %v5046_v20  ;;  %vm819_vm2 = vcmp.eq.f32.partialorder %v4932_v63, %v751_v55  ;;  %v3365_v63 = vld [vmem:[%s6529_s0 + $0x98] sm:$0xff] }
 0x322   :  { %v2297_v4 = vpop.f32.mrf.mxu1  ;;  %v1658_v29 = vsel %vm1657_vm15, %v1653_v43, inf  ;;  %v883_v21 = vsel %vm819_vm2, %v3864_v24, 16 }
 0x323   :  { %2455 = vst.msk [vmem:[%s6532_s3 + $0x88] sm:$0xff] %vm87_vm0, %v2297_v4  ;;  %v2621_v51 = vsub.f32 %v2297_v4, %v3363_v31  ;;  %v739_v4 = vpop.xlane.xlu2 %738  ;;  %v5406_v31 = vsel %vm562_vm1, %v883_v21, 2147483647 }
 0x324   :  { %vm815_vm3 = vcmp.eq.f32.partialorder %v4742_v60, %v739_v4 }
 0x325   :  { %v2820_v35 = vmul.f32 %v2621_v51, %v2621_v51  ;;  %v879_v42 = vsel %vm815_vm3, %v3864_v24, 16 }
 0x326   :  { %1314 = vmin.xlane.f32.xlu1 %v4979_v61  ;;  %v5423_v60 = vsel %vm562_vm1, %v879_v42, 2147483647 }
 0x327   :  { %v2900_v44 = vsel %vm87_vm0, %v2820_v35, 0.0 }
 0x328   :  { %v2901_v59 = vadd.f32 %v2900_v44, %v2899_v46  ;;  %v1742_v46 = vshra.s32 %v5398_v15, 16  ;;  %v1817_v44 = vshra.s32 %v5406_v31, 16  ;;  %v1270_v19 = vpop.xlane.xlu0 %1269 }
 0x32a   :  { %v2300_v36 = vpop.f32.mrf.mxu1  ;;  %v5403_v27 = vcvt.s32.f32 %v1742_v46 }
 0x32b   :  { %2456 = vst.msk [vmem:[%s6532_s3 + $0x90] sm:$0xff] %vm87_vm0, %v2300_v36  ;;  %v2622_v26 = vsub.f32 %v2300_v36, %v3364_v3  ;;  %v5420_v3 = vcvt.s32.f32 %v1817_v44  ;;  %v3367_v44 = vld [vmem:[%s6529_s0 + $0xa8] sm:$0xff] }
 0x32d   :  { %v2821_v41 = vmul.f32 %v2622_v26, %v2622_v26  ;;  %v745_v26 = vpop.xlane.xlu2 %744 }
 0x32e   :  { %1400 = vmin.xlane.f32.xlu1 %v5386_v38  ;;  %vm817_vm4 = vcmp.eq.f32.partialorder %v4779_v13, %v745_v26  ;;  %v6782_v26 = vld [vmem:[#allocation31_spill] sm:$0xff] }
 0x32f   :  { %v2902_v61 = vsel %vm87_vm0, %v2821_v41, 0.0  ;;  %v1452_v41 = vcvt.f32.s32 %v5125_v18  ;;  %v881_v43 = vsel %vm817_vm4, %v3864_v24, 16 }
 0x330   :  { %v2903_v28 = vadd.f32 %v2902_v61, %v2901_v59 }
 0x331   :  { %v1453_v55 = vshll.u32 %v1452_v41, 16  ;;  %v1482_v41 = vcvt.f32.s32 %v6782_v26  ;;  %v6786_v26 = vld [vmem:[#allocation17_spill] sm:$0xff] }
 0x336   :  { %1659 = vmin.xlane.f32.xlu1 %v1658_v29 }
 0x33e   :  { %1745 = vmin.xlane.f32.xlu1 %v5403_v27 }
 0x33f   :  { %v2303_v51 = vpop.f32.mrf.mxu1 }
 0x340   :  { %2457 = vst.msk [vmem:[%s6532_s3 + $0x98] sm:$0xff] %vm87_vm0, %v2303_v51  ;;  %v2623_v35 = vsub.f32 %v2303_v51, %v3365_v63  ;;  %v5441_v51 = vsel %vm562_vm1, %v881_v43, 2147483647  ;;  %v1467_v63 = vcvt.f32.s32 %v5081_v62 }
 0x341   :  { %v1787_v62 = vshra.s32 %v5441_v51, 16 }
 0x342   :  { %v2822_v59 = vmul.f32 %v2623_v35, %v2623_v35 }
 0x344   :  { %v2904_v36 = vsel %vm87_vm0, %v2822_v59, 0.0 }
 0x345   :  { %v2905_v37 = vadd.f32 %v2904_v36, %v2903_v28  ;;  %v1757_v28 = vshra.s32 %v5423_v60, 16 }
 0x346   :  { %1820 = vmin.xlane.f32.xlu1 %v5420_v3 }
 0x347   :  { %v2306_v61 = vpop.f32.mrf.mxu1  ;;  %v5438_v4 = vcvt.s32.f32 %v1757_v28 }
 0x348   :  { %2458 = vst.msk [vmem:[%s6532_s3 + $0xa0] sm:$0xff] %vm87_vm0, %v2306_v61  ;;  %v2624_v48 = vsub.f32 %v2306_v61, %v3366_v52  ;;  %v1468_v61 = vshll.u32 %v1467_v63, 16  ;;  %v5460_v52 = vpop.xlane.xlu0 %747 }
 0x349   :  { %v1450_v18 = vpop.xlane.xlu1 %1449  ;;  %vm818_vm13 = vcmp.eq.f32.partialorder %v4974_v58, %v5460_v52 }
 0x34a   :  { %v2823_v49 = vmul.f32 %v2624_v48, %v2624_v48  ;;  %v1451_v29 = vcvt.f32.s32 %v1450_v18  ;;  %v882_v58 = vsel %vm818_vm13, %v3864_v24, 16  ;;  %vm1890_vm13 = vcmp.eq.s32.totalorder %v3864_v24, %v5303_v2 }
 0x34c   :  { %v2906_v13 = vsel %vm87_vm0, %v2823_v49, 0.0  ;;  %v1454_v21 = vadd.s32 %v1453_v55, %v1451_v29  ;;  %v6783_v49 = vld [vmem:[#allocation28_spill] sm:$0xff]  ;;  %v5466_v29 = vcvt.s32.f32 %v1787_v62  ;;  %v1272_v62 = vcvt.f32.s32 %v4855_v17 }
 0x34d   :  { %v2907_v46 = vadd.f32 %v2906_v13, %v2905_v37  ;;  %v1481_v18 = vcvt.f32.s32 %v6783_v49  ;;  %v1483_v13 = vshll.u32 %v1482_v41, 16  ;;  %v1271_v41 = vcvt.f32.s32 %v1270_v19 }
 0x34e   :  { %1760 = vmin.xlane.f32.xlu1 %v5438_v4  ;;  %vm1882_vm5 = vcmp.eq.s32.totalorder %v3864_v24, %v1454_v21  ;;  %6784 = vst [vmem:[#allocation22_spill] sm:$0xff] %v5466_v29  ;;  %v1257_v21 = vcvt.f32.s32 %v4819_v5  ;;  %v1496_v5 = vcvt.f32.s32 %v6786_v26  ;;  %v1273_v49 = vshll.u32 %v1272_v62, 16 }
 0x34f   :  { %v2309_v35 = vpop.f32.mrf.mxu1  ;;  %v5454_v42 = vsel %vm1882_vm5, 1.0, %v6708_v8  ;;  %vm1888_vm5 = vcmp.eq.s32.totalorder %v3864_v24, %v5156_v54 }
 0x350   :  { %2459 = vst.msk [vmem:[%s6532_s3 + $0xa8] sm:$0xff] %vm87_vm0, %v2309_v35  ;;  %v2625_v59 = vsub.f32 %v2309_v35, %v3367_v44  ;;  %3220 = vmatmul.msk.f32.vlgmr.msra.gmra.mxu3 %vm562_vm1, %v5454_v42  ;;  %v1484_v35 = vadd.s32 %v1483_v13, %v1481_v18  ;;  %v1274_v13 = vadd.s32 %v1273_v49, %v1271_v41 }
 0x351   :  { %v1465_v37 = vpop.xlane.xlu1 %1464 }
 0x352   :  { %v2824_v36 = vmul.f32 %v2625_v59, %v2625_v59  ;;  %v1466_v48 = vcvt.f32.s32 %v1465_v37  ;;  %vm1884_vm7 = vcmp.eq.s32.totalorder %v3864_v24, %v1484_v35  ;;  %vm1870_vm11 = vcmp.eq.s32.totalorder %v3864_v24, %v1274_v13 }
 0x354   :  { %v2908_v28 = vsel %vm87_vm0, %v2824_v36, 0.0  ;;  %v1469_v55 = vadd.s32 %v1468_v61, %v1466_v48  ;;  %v1258_v36 = vshll.u32 %v1257_v21, 16  ;;  %v5479_v61 = vpop.xlane.xlu0 %1355  ;;  %v6787_v21 = vld [vmem:[#allocation37_spill] sm:$0xff] }
 0x355   :  { %v5464_v43 = vadd.f32 %v2908_v28, %v2907_v46  ;;  %v6785_v46 = vld [vmem:[#allocation36_spill] sm:$0xff]  ;;  %v1512_v35 = vcvt.f32.s32 %v6787_v21  ;;  %v5531_v21 = vpop.xlane.xlu2 %1685  ;;  %vm1357_vm4 = vcmp.eq.f32.partialorder %v5014_v6, %v5479_v61  ;;  %v1681_v6 = vand.u32 65535, %v4799_v16 }
 0x356   :  { %1790 = vmin.xlane.f32.xlu1 %v5466_v29  ;;  %vm1883_vm6 = vcmp.eq.s32.totalorder %v3864_v24, %v1469_v55  ;;  %v1497_v59 = vcvt.f32.s32 %v6785_v46  ;;  %v5487_v55 = vsel %vm1884_vm7, 1.0, %v6708_v8 }
 0x357   :  { %v5472_v63 = vsel %vm1883_vm6, 1.0, %v6708_v8  ;;  %v1683_v54 = vcvt.s32.f32 %v1681_v6 }
 0x358   :  { %3221 = vmatmul.msk.f32.gmra.mxu3 %vm562_vm1, %v5472_v63  ;;  %v1498_v28 = vshll.u32 %v1497_v59, 16  ;;  %v6789_v59 = vld [vmem:[#allocation32_spill] sm:$0xff] }
 0x359   :  { %v1255_v44 = vpop.xlane.xlu1 %1254 }
 0x35a   :  { %v1256_v37 = vcvt.f32.s32 %v1255_v44  ;;  %v1499_v17 = vadd.s32 %v1498_v28, %v1496_v5  ;;  %v6788_v44 = vld [vmem:[#allocation52_spill] sm:$0xff] }
 0x35b   :  { %vm793_vm9 = vcmp.eq.f32.partialorder %v6788_v44, %v5394_v33  ;;  %v1513_v33 = vshll.u32 %v1512_v35, 16 }
 0x35c   :  { %v1259_v48 = vadd.s32 %v1258_v36, %v1256_v37  ;;  %v1511_v36 = vcvt.f32.s32 %v6789_v59  ;;  %vm1885_vm12 = vcmp.eq.s32.totalorder %v3864_v24, %v1499_v17  ;;  %v1336_v37 = vand.u32 65535, %v5199_v23  ;;  %v5507_v41 = vpop.xlane.xlu0 %741  ;;  %v6790_v59 = vld [vmem:[#allocation39_spill] sm:$0xff] }
 0x35d   :  { %v857_v26 = vsel %vm793_vm9, %v3864_v24, 16  ;;  %v5517_v23 = vsel %vm1870_vm11, 1.0, %v6708_v8  ;;  %v5520_v49 = vsel %vm1885_vm12, 1.0, %v6708_v8  ;;  %vm816_vm7 = vcmp.eq.f32.partialorder %v5025_v1, %v5507_v41 }
 0x35e   :  { %vm1869_vm8 = vcmp.eq.s32.totalorder %v3864_v24, %v1259_v48  ;;  %v3368_v48 = vld [vmem:[%s6529_s0 + $0xb0] sm:$0xff]  ;;  %v1514_v13 = vadd.s32 %v1513_v33, %v1511_v36  ;;  %vm1687_vm9 = vcmp.eq.f32.partialorder %v4837_v9, %v5531_v21  ;;  %v880_v16 = vsel %vm816_vm7, %v3864_v24, 16 }
 0x35f   :  { %v5484_v18 = vsel %vm1869_vm8, 1.0, %v6708_v8  ;;  %v1302_v41 = vcvt.f32.s32 %v4927_v22  ;;  %vm1889_vm11 = vcmp.eq.s32.totalorder %v3864_v24, %v5220_v34 }
 0x360   :  { %3207 = vmatmul.msk.f32.gmra.mxu1 %vm562_vm1, %v5484_v18  ;;  %3222 = vmatmul.msk.f32.gmra.mxu3 %vm562_vm1, %v5487_v55  ;;  %vm1886_vm15 = vcmp.eq.s32.totalorder %v3864_v24, %v1514_v13  ;;  %v5567_v13 = vpop.xlane.xlu2 %1370 }
 0x361   :  { %v754_v19 = vpop.xlane.xlu1 %753  ;;  %vm1372_vm6 = vcmp.eq.f32.partialorder %v4865_v14, %v5567_v13 }
 0x362   :  { %vm820_vm10 = vcmp.eq.f32.partialorder %v5180_v25, %v754_v19  ;;  %v5525_v19 = vsel %vm562_vm1, %v857_v26, 2147483647 }
 0x363   :  { %v884_v46 = vsel %vm820_vm10, %v3864_v24, 16  ;;  %v1427_v36 = vshra.s32 %v5525_v19, 16  ;;  %vm1891_vm10 = vcmp.eq.s32.totalorder %v3864_v24, %v5064_v32  ;;  %v1688_v32 = vsel %vm1687_vm9, %v1683_v54, inf }
 0x364   :  { %v5500_v62 = vsel %vm562_vm1, %v884_v46, 2147483647  ;;  %v1338_v46 = vcvt.s32.f32 %v1336_v37  ;;  %v1666_v37 = vand.u32 65535, %v5243_v0 }
 0x365   :  { %v1832_v5 = vshra.s32 %v5500_v62, 16 }
 0x366   :  { %v1668_v0 = vcvt.s32.f32 %v1666_v37 }
 0x367   :  { %v2312_v25 = vpop.f32.mrf.mxu1  ;;  %v5522_v17 = vcvt.s32.f32 %v1832_v5  ;;  %v1527_v5 = vcvt.f32.s32 %v6790_v59  ;;  %v5553_v59 = vcvt.s32.f32 %v1427_v36 }
 0x368   :  { %2460 = vst.msk [vmem:[%s6532_s3 + $0xb0] sm:$0xff] %vm87_vm0, %v2312_v25  ;;  %v2626_v28 = vsub.f32 %v2312_v25, %v3368_v48  ;;  %3208 = vmatmul.msk.f32.gmra.mxu1 %vm562_vm1, %v5517_v23  ;;  %3223 = vmatmul.msk.f32.gmra.mxu3 %vm562_vm1, %v5520_v49  ;;  %v6791_v25 = vld [vmem:[#allocation48_spill] sm:$0xff]  ;;  %v5593_v29 = vpop.xlane.xlu2 %1629 }
 0x369   :  { %v5533_v44 = vpop.xlane.xlu1 %1340  ;;  %1835 = vmin.xlane.f32.xlu2 %v5522_v17  ;;  %v1526_v48 = vcvt.f32.s32 %v6791_v25  ;;  %v1528_v52 = vshll.u32 %v1527_v5, 16  ;;  %v5558_v25 = vpop.xlane.xlu0 %1299 }
 0x36a   :  { %v2825_v35 = vmul.f32 %v2626_v28, %v2626_v28  ;;  %vm1342_vm14 = vcmp.eq.f32.partialorder %v5240_v50, %v5533_v44  ;;  %v5551_v50 = vsel %vm1886_vm15, 1.0, %v6708_v8  ;;  %v1301_v6 = vcvt.f32.s32 %v5558_v25 }
 0x36b   :  { %v1343_v33 = vsel %vm1342_vm14, %v1338_v46, inf  ;;  %6792 = vst [vmem:[#allocation45_spill] sm:$0xff] %v5551_v50  ;;  %v5556_v46 = vsel %vm562_vm1, %v882_v58, 2147483647 }
 0x36c   :  { %v2910_v26 = vsel %vm87_vm0, %v2825_v35, 0.0  ;;  %1344 = vmin.xlane.f32.xlu0 %v1343_v33  ;;  %v1529_v35 = vadd.s32 %v1528_v52, %v1526_v48  ;;  %6793 = vst [vmem:[#allocation41_spill] sm:$0xff] %v5556_v46  ;;  %v1802_v5 = vshra.s32 %v5556_v46, 16  ;;  %v6794_v33 = vld [vmem:[#allocation13_spill] sm:$0xff] }
 0x36d   :  { %v5545_v28 = vadd.f32 %v2910_v26, %v5464_v43  ;;  %v1351_v26 = vand.u32 65535, %v4998_v30  ;;  %v1602_v48 = vcvt.f32.s32 %v6794_v33 }
 0x36e   :  { %vm1887_vm3 = vcmp.eq.s32.totalorder %v3864_v24, %v1529_v35  ;;  %v5583_v37 = vcvt.s32.f32 %v1802_v5 }
 0x36f   :  { %v1353_v35 = vcvt.s32.f32 %v1351_v26  ;;  %v1287_v26 = vcvt.f32.s32 %v4895_v12 }
 0x370   :  { %3224 = vmatmul.msk.f32.gmra.mxu3 %vm562_vm1, %v5551_v50 }
 0x371   :  { %v5562_v43 = vpop.xlane.xlu1 %1670  ;;  %1430 = vmin.xlane.f32.xlu2 %v5553_v59  ;;  %v5587_v52 = vpop.xlane.xlu0 %1385  ;;  %v1358_v5 = vsel %vm1357_vm4, %v1353_v35, inf  ;;  %v1288_v1 = vshll.u32 %v1287_v26, 16 }
 0x372   :  { %vm1672_vm2 = vcmp.eq.f32.partialorder %v5301_v56, %v5562_v43  ;;  %v5581_v56 = vsel %vm1887_vm3, 1.0, %v6708_v8  ;;  %vm1387_vm12 = vcmp.eq.f32.partialorder %v5133_v10, %v5587_v52  ;;  %v5656_v10 = vsel %vm1890_vm13, 1.0, %v6708_v8 }
 0x373   :  { %v1673_v36 = vsel %vm1672_vm2, %v1668_v0, inf  ;;  %6795 = vst [vmem:[#allocation53_spill] sm:$0xff] %v5581_v56  ;;  %v1603_v0 = vshll.u32 %v1602_v48, 16 }
 0x374   :  { %1674 = vmin.xlane.f32.xlu0 %v1673_v36  ;;  %v1366_v36 = vand.u32 65535, %v4840_v11  ;;  %6800 = vst [vmem:[#allocation26_spill] sm:$0xff] %v5656_v10 }
 0x376   :  { %v1368_v11 = vcvt.s32.f32 %v1366_v36  ;;  %v5624_v36 = vsel %vm562_vm1, %v880_v16, 2147483647 }
 0x377   :  { %v5573_v58 = vpop.f32.mrf.mxu1  ;;  %v1772_v9 = vshra.s32 %v5624_v36, 16 }
 0x378   :  { %2461 = vst.msk [vmem:[%s6532_s3 + $0xb8] sm:$0xff] %vm87_vm0, %v5573_v58  ;;  %3225 = vmatmul.msk.f32.gmra.mxu3 %vm562_vm1, %v5581_v56  ;;  %v1373_v14 = vsel %vm1372_vm6, %v1368_v11, inf  ;;  %v5649_v11 = vsel %vm1889_vm11, 1.0, %v6708_v8 }
 0x379   :  { %v1600_v30 = vpop.xlane.xlu1 %1599  ;;  %1805 = vmin.xlane.f32.xlu2 %v5583_v37  ;;  %v5621_v35 = vpop.xlane.xlu0 %1644  ;;  %6799 = vst [vmem:[#allocation35_spill] sm:$0xff] %v5649_v11  ;;  %v5663_v54 = vcvt.s32.f32 %v1772_v9 }
 0x37a   :  { %v1601_v33 = vcvt.f32.s32 %v1600_v30  ;;  %v5608_v30 = vsel %vm1888_vm5, 1.0, %v6708_v8 }
 0x37b   :  { %6797 = vst [vmem:[#allocation54_spill] sm:$0xff] %v5608_v30 }
 0x37c   :  { %v1604_v46 = vadd.s32 %v1603_v0, %v1601_v33  ;;  %1359 = vmin.xlane.f32.xlu0 %v1358_v5  ;;  %v5626_v33 = vpop.xlane.xlu2 %1715  ;;  %v5629_v5 = vsel %vm1891_vm10, 1.0, %v6708_v8 }
 0x37d   :  { %6798 = vst [vmem:[#allocation27_spill] sm:$0xff] %v5629_v5 }
 0x37e   :  { %vm1892_vm8 = vcmp.eq.s32.totalorder %v3864_v24, %v1604_v46  ;;  %v1381_v46 = vand.u32 65535, %v5128_v7  ;;  %v1303_v7 = vshll.u32 %v1302_v41, 16  ;;  %v6801_v41 = vld [vmem:[#allocation20_spill] sm:$0xff] }
 0x37f   :  { %v5605_v48 = vsel %vm1892_vm8, 1.0, %v6708_v8 }
 0x380   :  { %6796 = vst [vmem:[#allocation34_spill] sm:$0xff] %v5605_v48  ;;  %3226 = vmatmul.msk.f32.gmra.mxu3 %vm562_vm1, %v5608_v30  ;;  %3281 = vmatpush.xpose.msk.msra.mxu2 %vm562_vm1, %v5605_v48  ;;  %v1383_v25 = vcvt.s32.f32 %v1381_v46  ;;  %v1304_v16 = vadd.s32 %v1303_v7, %v1301_v6  ;;  %v1711_v46 = vand.u32 65535, %v6801_v41 }
 0x381   :  { %v1285_v12 = vpop.xlane.xlu1 %1284  ;;  %1374 = vmin.xlane.f32.xlu2 %v1373_v14  ;;  %v1726_v14 = vand.u32 65535, %v5211_v53 }
 0x382   :  { %v1286_v0 = vcvt.f32.s32 %v1285_v12  ;;  %v1388_v34 = vsel %vm1387_vm12, %v1383_v25, inf  ;;  %v5661_v12 = vpop.xlane.xlu0 %1730  ;;  %vm1872_vm15 = vcmp.eq.s32.totalorder %v3864_v24, %v1304_v16  ;;  %v1713_v25 = vcvt.s32.f32 %v1711_v46  ;;  %v6805_v46 = vld [vmem:[#allocation49_spill] sm:$0xff] }
 0x383   :  { %v1728_v53 = vcvt.s32.f32 %v1726_v14  ;;  %v5674_v6 = vsel %vm1872_vm15, 1.0, %v6708_v8  ;;  %v1411_v14 = vand.u32 65535, %v5257_v57  ;;  %v1617_v57 = vcvt.f32.s32 %v6805_v46 }
 0x384   :  { %v1289_v22 = vadd.s32 %v1288_v1, %v1286_v0  ;;  %3282 = vmatpush.xpose.msk.msra.mxu2 %vm562_vm1, %v5629_v5  ;;  %1689 = vmin.xlane.f32.xlu0 %v1688_v32  ;;  %v1696_v1 = vand.u32 65535, %v5347_v47  ;;  %v1330_v0 = vpop.xlane.xlu2 %1329  ;;  %v6802_v32 = vld [vmem:[#allocation21_spill] sm:$0xff] }
 0x385   :  { %vm1732_vm2 = vcmp.eq.f32.partialorder %v6802_v32, %v5661_v12  ;;  %v6804_v32 = vld [vmem:[#allocation25_spill] sm:$0xff] }
 0x386   :  { %vm1871_vm14 = vcmp.eq.s32.totalorder %v3864_v24, %v1289_v22  ;;  %v6803_v22 = vld [vmem:[#allocation38_spill] sm:$0xff]  ;;  %v1733_v47 = vsel %vm1732_vm2, %v1728_v53, inf  ;;  %v1698_v9 = vcvt.s32.f32 %v1696_v1  ;;  %v1317_v53 = vcvt.f32.s32 %v6804_v32 }
 0x387   :  { %v5646_v26 = vsel %vm1871_vm14, 1.0, %v6708_v8  ;;  %vm1717_vm3 = vcmp.eq.f32.partialorder %v6803_v22, %v5626_v33  ;;  %v1413_v1 = vcvt.s32.f32 %v1411_v14 }
 0x388   :  { %3209 = vmatmul.msk.f32.gmra.mxu1 %vm562_vm1, %v5646_v26  ;;  %3227 = vmatmul.msk.f32.gmra.mxu3 %vm562_vm1, %v5649_v11  ;;  %v1318_v22 = vshll.u32 %v1317_v53, 16 }
 0x389   :  { %3283 = vmatpush.xpose.msk.msra.mxu2 %vm562_vm1, %v5656_v10  ;;  %v1615_v2 = vpop.xlane.xlu1 %1614  ;;  %1389 = vmin.xlane.f32.xlu2 %v1388_v34  ;;  %v1718_v34 = vsel %vm1717_vm3, %v1713_v25, inf }
 0x38a   :  { %v1616_v32 = vcvt.f32.s32 %v1615_v2 }
 0x38c   :  { %1775 = vmin.xlane.f32.xlu0 %v5663_v54  ;;  %v5689_v41 = vpop.xlane.xlu2 %1415 }
 0x38d   :  { %3284 = vmatpush.xpose.msk.msra.mxu2 %vm562_vm1, %v5649_v11  ;;  %vm1417_vm5 = vcmp.eq.f32.partialorder %v5271_v40, %v5689_v41  ;;  %v1396_v40 = vand.u32 65535, %v5374_v39 }
 0x38f   :  { %v1398_v2 = vcvt.s32.f32 %v1396_v40 }
 0x390   :  { %3210 = vmatmul.msk.f32.gmra.mxu1 %vm562_vm1, %v5674_v6  ;;  %3228 = vmatmul.msk.f32.gmra.mxu3 %vm562_vm1, %v5656_v10 }
 0x391   :  { %3285 = vmatpush.xpose.msk.msra.mxu2 %vm562_vm1, %v5608_v30  ;;  %v5684_v7 = vpop.xlane.xlu1 %1700  ;;  %1734 = vmin.xlane.f32.xlu2 %v1733_v47  ;;  %v6806_v47 = vld [vmem:[#allocation18_spill] sm:$0xff] }
 0x392   :  { %vm1702_vm4 = vcmp.eq.f32.partialorder %v5359_v45, %v5684_v7 }
 0x393   :  { %v1703_v16 = vsel %vm1702_vm4, %v1698_v9, inf  ;;  %v1332_v9 = vcvt.f32.s32 %v6806_v47 }
 0x394   :  { %1704 = vmin.xlane.f32.xlu1 %v1703_v16  ;;  %1719 = vmin.xlane.f32.xlu0 %v1718_v34  ;;  %v1418_v16 = vsel %vm1417_vm5, %v1413_v1, inf  ;;  %v1331_v34 = vcvt.f32.s32 %v1330_v0  ;;  %v6807_v0 = vld [vmem:[#allocation46_spill] sm:$0xff] }
 0x395   :  { %3286 = vmatpush.xpose.msk.msra.mxu2 %vm562_vm1, %v5581_v56  ;;  %v1333_v11 = vshll.u32 %v1332_v9, 16  ;;  %v1646_v9 = vcvt.f32.s32 %v5621_v35 }
 0x397   :  { %v1334_v53 = vadd.s32 %v1333_v11, %v1331_v34 }
 0x398   :  { %3229 = vmatmul.msk.f32.gmra.mxu3 %vm562_vm1, %v5629_v5  ;;  %v1618_v5 = vshll.u32 %v1617_v57, 16 }
 0x399   :  { %3287 = vmatpush.xpose.msk.msra.mxu2 %vm562_vm1, %v5551_v50  ;;  %v1315_v45 = vpop.xlane.xlu1 %1314  ;;  %vm1874_vm8 = vcmp.eq.s32.totalorder %v3864_v24, %v1334_v53 }
 0x39a   :  { %v1316_v25 = vcvt.f32.s32 %v1315_v45  ;;  %v1619_v46 = vadd.s32 %v1618_v5, %v1616_v32  ;;  %v1632_v45 = vcvt.f32.s32 %v6807_v0  ;;  %v1631_v5 = vcvt.f32.s32 %v5593_v29  ;;  %v6809_v29 = vld [vmem:[#allocation44_spill] sm:$0xff] }
 0x39b   :  { %v5726_v1 = vsel %vm1874_vm8, 1.0, %v6708_v8  ;;  %v1647_v47 = vcvt.f32.s32 %v6809_v29 }
 0x39c   :  { %v1319_v10 = vadd.s32 %v1318_v22, %v1316_v25  ;;  %1419 = vmin.xlane.f32.xlu0 %v1418_v16  ;;  %vm1893_vm9 = vcmp.eq.s32.totalorder %v3864_v24, %v1619_v46  ;;  %v1633_v11 = vshll.u32 %v1632_v45, 16  ;;  %v1741_v25 = vand.u32 65535, %v5398_v15 }
 0x39d   :  { %3288 = vmatpush.xpose.msk.msra.mxu2 %vm562_vm1, %v5520_v49  ;;  %v5729_v57 = vsel %vm1893_vm9, 1.0, %v6708_v8  ;;  %v1648_v16 = vshll.u32 %v1647_v47, 16  ;;  %v1662_v46 = vcvt.f32.s32 %v5046_v20  ;;  %v1816_v15 = vand.u32 65535, %v5406_v31  ;;  %v6815_v47 = vld [vmem:[#allocation40_spill] sm:$0xff] }
 0x39e   :  { %vm1873_vm6 = vcmp.eq.s32.totalorder %v3864_v24, %v1319_v10  ;;  %6808 = vst [vmem:[#allocation33_spill] sm:$0xff] %v5729_v57  ;;  %v1634_v22 = vadd.s32 %v1633_v11, %v1631_v5  ;;  %v1743_v53 = vcvt.s32.f32 %v1741_v25  ;;  %v6813_v11 = vld [vmem:[#allocation14_spill] sm:$0xff]  ;;  %v6816_v25 = vld [vmem:[#allocation15_spill] sm:$0xff] }
 0x39f   :  { %v5707_v14 = vsel %vm1873_vm6, 1.0, %v6708_v8  ;;  %v1649_v32 = vadd.s32 %v1648_v16, %v1646_v9  ;;  %v1663_v0 = vshll.u32 %v1662_v46, 16  ;;  %v1818_v20 = vcvt.s32.f32 %v1816_v15 }
 0x3a0   :  { %3211 = vmatmul.msk.f32.gmra.mxu1 %vm562_vm1, %v5707_v14  ;;  %3230 = vmatmul.msk.f32.gmra.mxu3 %vm562_vm1, %v5605_v48  ;;  %vm1894_vm10 = vcmp.eq.s32.totalorder %v3864_v24, %v1634_v22  ;;  %v2699_v22 = vsel %vm562_vm1, %v6813_v11, 0.0 }
 0x3a1   :  { %3289 = vmatpush.xpose.msk.msra.mxu2 %vm562_vm1, %v5487_v55  ;;  %v5715_v39 = vpop.xlane.xlu1 %1400  ;;  %v5742_v34 = vsel %vm1894_vm10, 1.0, %v6708_v8  ;;  %vm1895_vm12 = vcmp.eq.s32.totalorder %v3864_v24, %v1649_v32  ;;  %v2700_v9 = vadd.f32 %v2699_v22, %v6815_v47  ;;  %v6817_v32 = vld [vmem:[#allocation24_spill] sm:$0xff] }
 0x3a2   :  { %vm1402_vm7 = vcmp.eq.f32.partialorder %v5386_v38, %v5715_v39  ;;  %6810 = vst [vmem:[#allocation23_spill] sm:$0xff] %v5742_v34  ;;  %v5754_v45 = vsel %vm1895_vm12, 1.0, %v6708_v8  ;;  %v6821_v47 = vld [vmem:[#allocation16_spill] sm:$0xff] }
 0x3a3   :  { %v1403_v10 = vsel %vm1402_vm7, %v1398_v2, inf  ;;  %6811 = vst [vmem:[#allocation42_spill] sm:$0xff] %v5754_v45 }
 0x3a4   :  { %1404 = vmin.xlane.f32.xlu1 %v1403_v10 }
 0x3a5   :  { %3290 = vmatpush.xpose.msk.msra.mxu2 %vm562_vm1, %v5472_v63 }
 0x3a8   :  { %3212 = vmatmul.msk.f32.gmra.mxu1 %vm562_vm1, %v5726_v1  ;;  %3231 = vmatmul.msk.f32.gmra.mxu3 %vm562_vm1, %v5729_v57 }
 0x3a9   :  { %3291 = vmatpush.xpose.msk.msra.mxu2 %vm562_vm1, %v5454_v42  ;;  %v1660_v38 = vpop.xlane.xlu1 %1659 }
 0x3aa   :  { %v1661_v2 = vcvt.f32.s32 %v1660_v38  ;;  %v6814_v38 = vld [vmem:[#allocation30_spill] sm:$0xff] }
 0x3ab   :  { %v2701_v29 = vsel %vm562_vm1, %v6814_v38, 0.0 }
 0x3ac   :  { %v1664_v10 = vadd.s32 %v1663_v0, %v1661_v2  ;;  %v2702_v16 = vadd.f32 %v2701_v29, %v2700_v9  ;;  %v6819_v0 = vld [vmem:[#allocation19_spill] sm:$0xff]  ;;  %v2715_v9 = vsel %vm562_vm1, %v5484_v18, 0.0 }
 0x3ae   :  { %vm1896_vm14 = vcmp.eq.s32.totalorder %v3864_v24, %v1664_v10  ;;  %v2709_v10 = vsel %vm562_vm1, %v6819_v0, 0.0 }
 0x3af   :  { %v5764_v31 = vsel %vm1896_vm14, 1.0, %v6708_v8 }
 0x3b0   :  { %3232 = vmatmul.msk.f32.gmra.mxu3 %vm562_vm1, %v5742_v34  ;;  %6812 = vst [vmem:[#allocation29_spill] sm:$0xff] %v5764_v31 }
 0x3b1   :  { %v5746_v40 = vpop.xlane.xlu1 %1745 }
 0x3b2   :  { %vm1747_vm11 = vcmp.eq.f32.partialorder %v5403_v27, %v5746_v40 }
 0x3b3   :  { %v1748_v35 = vsel %vm1747_vm11, %v1743_v53, inf  ;;  %v2705_v53 = vsel %vm562_vm1, %v6817_v32, 0.0 }
 0x3b4   :  { %1749 = vmin.xlane.f32.xlu1 %v1748_v35  ;;  %v6818_v35 = vld [vmem:[#allocation9_spill] sm:$0xff] }
 0x3b5   :  { %v2707_v2 = vsel %vm562_vm1, %v6818_v35, 0.0 }
 0x3b8   :  { %3233 = vmatmul.msk.f32.gmra.mxu3 %vm562_vm1, %v5754_v45  ;;  %v2713_v45 = vsel %vm562_vm1, %v6821_v47, 0.0 }
 0x3b9   :  { %v5758_v5 = vpop.xlane.xlu1 %1820 }
 0x3ba   :  { %vm1822_vm13 = vcmp.eq.f32.partialorder %v5420_v3, %v5758_v5  ;;  %v2703_v3 = vsel %vm562_vm1, %v6816_v25, 0.0 }
 0x3bb   :  { %v1823_v27 = vsel %vm1822_vm13, %v1818_v20, inf  ;;  %v2704_v46 = vadd.f32 %v2703_v3, %v2702_v16 }
 0x3bc   :  { %1824 = vmin.xlane.f32.xlu0 %v1823_v27  ;;  %v6820_v27 = vld [vmem:[#allocation10_spill] sm:$0xff] }
 0x3bd   :  { %v2706_v15 = vadd.f32 %v2705_v53, %v2704_v46  ;;  %v3369_v46 = vld [vmem:[%s6529_s0 + $0xb8] sm:$0xff] }
 0x3bf   :  { %v2708_v20 = vadd.f32 %v2707_v2, %v2706_v15  ;;  %v2627_v2 = vsub.f32 %v5573_v58, %v3369_v46  ;;  %v2719_v15 = vsel %vm562_vm1, %v5646_v26, 0.0 }
 0x3c0   :  { %3234 = vmatmul.msk.f32.gmra.mxu3 %vm562_vm1, %v5764_v31  ;;  %v2711_v31 = vsel %vm562_vm1, %v6820_v27, 0.0 }
 0x3c1   :  { %v2710_v22 = vadd.f32 %v2709_v10, %v2708_v20  ;;  %v2826_v20 = vmul.f32 %v2627_v2, %v2627_v2  ;;  %v5820_v2 = vpop.xlane.xlu1 %1760 }
 0x3c2   :  { %vm1762_vm2 = vcmp.eq.f32.partialorder %v5438_v4, %v5820_v2  ;;  %v6825_v4 = vld [vmem:[#allocation22_spill] sm:$0xff] }
 0x3c3   :  { %v2712_v29 = vadd.f32 %v2711_v31, %v2710_v22  ;;  %v1831_v31 = vand.u32 65535, %v5500_v62  ;;  %v2912_v46 = vsel %vm87_vm0, %v2826_v20, 0.0 }
 0x3c4   :  { %v2913_v48 = vadd.f32 %v2912_v46, %v5545_v28  ;;  %v6824_v46 = vld [vmem:[#allocation41_spill] sm:$0xff] }
 0x3c5   :  { %v2714_v3 = vadd.f32 %v2713_v45, %v2712_v29  ;;  %v2717_v45 = vsel %vm562_vm1, %v5517_v23, 0.0  ;;  %v1833_v58 = vcvt.s32.f32 %v1831_v31  ;;  %v3370_v31 = vld [vmem:[%s6529_s0 + $0xc0] sm:$0xff] }
 0x3c7   :  { %v2716_v53 = vadd.f32 %v2715_v9, %v2714_v3  ;;  %v1347_v9 = vcvt.f32.s32 %v5533_v44  ;;  %v2721_v3 = vsel %vm562_vm1, %v5674_v6, 0.0  ;;  %v2723_v44 = vsel %vm562_vm1, %v5707_v14, 0.0 }
 0x3c9   :  { %v2718_v10 = vadd.f32 %v2717_v45, %v2716_v53 }
 0x3cb   :  { %v2720_v22 = vadd.f32 %v2719_v15, %v2718_v10 }
 0x3cd   :  { %v2722_v10 = vadd.f32 %v2721_v3, %v2720_v22  ;;  %v1677_v22 = vcvt.f32.s32 %v5562_v43 }
 0x3cf   :  { %v2724_v30 = vadd.f32 %v2723_v44, %v2722_v10  ;;  %v1801_v44 = vand.u32 65535, %v6824_v46 }
 0x3d3   :  { %v5787_v16 = vpop.f32.mrf.mxu3 }
 0x3d4   :  { %6822 = vst [vmem:[#allocation12_spill] sm:$0xff] %v5787_v16 }
 0x3d5   :  { %2475 = vst.msk [vmem:[%s6532_s3 + $0x128] sm:$0xff] %vm87_vm0, %v5787_v16  ;;  %v1348_v16 = vshll.u32 %v1347_v9, 16 }
 0x3db   :  { %v5803_v29 = vpop.f32.mrf.mxu3 }
 0x3dc   :  { %6823 = vst [vmem:[#allocation43_spill] sm:$0xff] %v5803_v29  ;;  %v5811_v62 = vpop.xlane.xlu2 %1835 }
 0x3dd   :  { %2476 = vst.msk [vmem:[%s6532_s3 + $0x130] sm:$0xff] %vm87_vm0, %v5803_v29  ;;  %vm1837_vm15 = vcmp.eq.f32.partialorder %v5522_v17, %v5811_v62  ;;  %v2318_v53 = vpop.f32.mrf.mxu1  ;;  %v1426_v17 = vand.u32 65535, %v5525_v19  ;;  %v1756_v29 = vand.u32 65535, %v5423_v60  ;;  %v2725_v60 = vsel %vm562_vm1, %v5726_v1, 0.0 }
 0x3de   :  { %2462 = vst.msk [vmem:[%s6532_s3 + $0xc0] sm:$0xff] %vm87_vm0, %v2318_v53  ;;  %v2628_v45 = vsub.f32 %v2318_v53, %v3370_v31  ;;  %v1838_v15 = vsel %vm1837_vm15, %v1833_v58, inf  ;;  %v1678_v31 = vshll.u32 %v1677_v22, 16 }
 0x3df   :  { %v1345_v20 = vpop.xlane.xlu0 %1344  ;;  %1839 = vmin.xlane.f32.xlu2 %v1838_v15  ;;  %v1428_v19 = vcvt.s32.f32 %v1426_v17 }
 0x3e0   :  { %v2827_v34 = vmul.f32 %v2628_v45, %v2628_v45  ;;  %v1346_v57 = vcvt.f32.s32 %v1345_v20  ;;  %v5865_v45 = vpop.xlane.xlu1 %1790 }
 0x3e1   :  { %vm1792_vm5 = vcmp.eq.f32.partialorder %v6825_v4, %v5865_v45  ;;  %v1392_v4 = vcvt.f32.s32 %v5587_v52 }
 0x3e2   :  { %v2914_v56 = vsel %vm87_vm0, %v2827_v34, 0.0  ;;  %v1349_v50 = vadd.s32 %v1348_v16, %v1346_v57  ;;  %v1758_v57 = vcvt.s32.f32 %v1756_v29  ;;  %v3371_v34 = vld [vmem:[%s6529_s0 + $0xc8] sm:$0xff]  ;;  %v1786_v29 = vand.u32 65535, %v5441_v51 }
 0x3e3   :  { %v2915_v58 = vadd.f32 %v2914_v56, %v2913_v48  ;;  %v5835_v53 = vpop.f32.mrf.mxu3  ;;  %v2726_v56 = vadd.f32 %v2725_v60, %v2724_v30  ;;  %v1362_v60 = vcvt.f32.s32 %v5479_v61 }
 0x3e4   :  { %2477 = vst.msk [vmem:[%s6532_s3 + $0x138] sm:$0xff] %vm87_vm0, %v5835_v53  ;;  %v5845_v28 = vpop.xlane.xlu2 %1430  ;;  %vm1875_vm3 = vcmp.eq.s32.totalorder %v3864_v24, %v1349_v50 }
 0x3e5   :  { %vm1432_vm4 = vcmp.eq.f32.partialorder %v5553_v59, %v5845_v28  ;;  %v2321_v48 = vpop.f32.mrf.mxu1  ;;  %v3149_v43 = vsel %vm1875_vm3, 1.0, %v6708_v8  ;;  %v1763_v59 = vsel %vm1762_vm2, %v1758_v57, inf  ;;  %v1788_v57 = vcvt.s32.f32 %v1786_v29 }
 0x3e6   :  { %2463 = vst.msk [vmem:[%s6532_s3 + $0xc8] sm:$0xff] %vm87_vm0, %v2321_v48  ;;  %v2629_v16 = vsub.f32 %v2321_v48, %v3371_v34  ;;  %3213 = vmatmul.msk.f32.gmra.mxu1 %vm562_vm1, %v3149_v43  ;;  %v2727_v50 = vsel %vm562_vm1, %v3149_v43, 0.0  ;;  %v1433_v30 = vsel %vm1432_vm4, %v1428_v19, inf }
 0x3e7   :  { %v2728_v9 = vadd.f32 %v2727_v50, %v2726_v56  ;;  %v1675_v3 = vpop.xlane.xlu0 %1674  ;;  %1764 = vmin.xlane.f32.xlu2 %v1763_v59  ;;  %1434 = vmin.xlane.f32.xlu1 %v1433_v30  ;;  %v1803_v56 = vcvt.s32.f32 %v1801_v44  ;;  %v1793_v61 = vsel %vm1792_vm5, %v1788_v57, inf  ;;  %v1377_v59 = vcvt.f32.s32 %v5567_v13 }
 0x3e8   :  { %v2828_v15 = vmul.f32 %v2629_v16, %v2629_v16  ;;  %v1676_v17 = vcvt.f32.s32 %v1675_v3  ;;  %v1363_v16 = vshll.u32 %v1362_v60, 16  ;;  %v1771_v57 = vand.u32 65535, %v5624_v36 }
 0x3e9   :  { %v1378_v46 = vshll.u32 %v1377_v59, 16 }
 0x3ea   :  { %v2916_v10 = vsel %vm87_vm0, %v2828_v15, 0.0  ;;  %v1679_v20 = vadd.s32 %v1678_v31, %v1676_v17 }
 0x3eb   :  { %v5870_v19 = vadd.f32 %v2916_v10, %v2915_v58  ;;  %v5872_v51 = vpop.f32.mrf.mxu3 }
 0x3ec   :  { %2478 = vst.msk [vmem:[%s6532_s3 + $0x140] sm:$0xff] %vm87_vm0, %v5872_v51  ;;  %v5880_v22 = vpop.xlane.xlu2 %1805  ;;  %vm1897_vm6 = vcmp.eq.s32.totalorder %v3864_v24, %v1679_v20 }
 0x3ed   :  { %vm1807_vm7 = vcmp.eq.f32.partialorder %v5583_v37, %v5880_v22  ;;  %v5886_v58 = vsel %vm1897_vm6, 1.0, %v6708_v8  ;;  %v1692_v37 = vcvt.f32.s32 %v5531_v21 }
 0x3ee   :  { %3235 = vmatmul.msk.f32.gmra.mxu3 %vm562_vm1, %v5886_v58  ;;  %v1808_v48 = vsel %vm1807_vm7, %v1803_v56, inf }
 0x3ef   :  { %v1360_v34 = vpop.xlane.xlu0 %1359  ;;  %1794 = vmin.xlane.f32.xlu1 %v1793_v61  ;;  %1809 = vmin.xlane.f32.xlu0 %v1808_v48  ;;  %v1693_v10 = vshll.u32 %v1692_v37, 16  ;;  %v1393_v61 = vshll.u32 %v1392_v4, 16 }
 0x3f0   :  { %v1361_v50 = vcvt.f32.s32 %v1360_v34 }
 0x3f2   :  { %v1364_v30 = vadd.s32 %v1363_v16, %v1361_v50  ;;  %v1773_v16 = vcvt.s32.f32 %v1771_v57 }
 0x3f3   :  { %v5891_v29 = vpop.f32.mrf.mxu3 }
 0x3f4   :  { %2479 = vst.msk [vmem:[%s6532_s3 + $0x148] sm:$0xff] %vm87_vm0, %v5891_v29  ;;  %v1375_v3 = vpop.xlane.xlu2 %1374  ;;  %vm1876_vm8 = vcmp.eq.s32.totalorder %v3864_v24, %v1364_v30  ;;  %v1707_v30 = vcvt.f32.s32 %v5684_v7 }
 0x3f5   :  { %v1376_v44 = vcvt.f32.s32 %v1375_v3  ;;  %v3150_v31 = vsel %vm1876_vm8, 1.0, %v6708_v8 }
 0x3f6   :  { %3214 = vmatmul.msk.f32.gmra.mxu1 %vm562_vm1, %v3150_v31  ;;  %v2729_v13 = vsel %vm562_vm1, %v3150_v31, 0.0  ;;  %3264 = vmatpush.xpose.msk.msrb.mxu3 %vm562_vm1, %v3150_v31 }
 0x3f7   :  { %v1379_v21 = vadd.s32 %v1378_v46, %v1376_v44  ;;  %v5904_v15 = vadd.f32 %v2729_v13, %v2728_v9  ;;  %v1690_v17 = vpop.xlane.xlu0 %1689  ;;  %v1722_v46 = vcvt.f32.s32 %v5626_v33  ;;  %v1708_v44 = vshll.u32 %v1707_v30, 16 }
 0x3f8   :  { %v1691_v20 = vcvt.f32.s32 %v1690_v17 }
 0x3f9   :  { %vm1877_vm9 = vcmp.eq.s32.totalorder %v3864_v24, %v1379_v21 }
 0x3fa   :  { %v1694_v60 = vadd.s32 %v1693_v10, %v1691_v20  ;;  %3265 = vmatpush.xpose.msk.msrb.mxu3 %vm562_vm1, %v3149_v43  ;;  %v5919_v48 = vsel %vm1877_vm9, 1.0, %v6708_v8 }
 0x3fb   :  { %v5910_v56 = vpop.f32.mrf.mxu3 }
 0x3fc   :  { %2480 = vst.msk [vmem:[%s6532_s3 + $0x150] sm:$0xff] %vm87_vm0, %v5910_v56  ;;  %v1390_v9 = vpop.xlane.xlu2 %1389  ;;  %vm1898_vm10 = vcmp.eq.s32.totalorder %v3864_v24, %v1694_v60  ;;  %v1723_v60 = vshll.u32 %v1722_v46, 16 }
 0x3fd   :  { %v1391_v52 = vcvt.f32.s32 %v1390_v9  ;;  %v5922_v43 = vsel %vm1898_vm10, 1.0, %v6708_v8 }
 0x3fe   :  { %3215 = vmatmul.msk.f32.gmra.mxu1 %vm562_vm1, %v5919_v48  ;;  %3236 = vmatmul.msk.f32.gmra.mxu3 %vm562_vm1, %v5922_v43 }
 0x3ff   :  { %v1394_v36 = vadd.s32 %v1393_v61, %v1391_v52  ;;  %3266 = vmatpush.xpose.msk.msrb.mxu3 %vm562_vm1, %v5726_v1  ;;  %v5930_v34 = vpop.xlane.xlu0 %1775  ;;  %v1737_v61 = vcvt.f32.s32 %v5661_v12 }
 0x400   :  { %vm1777_vm11 = vcmp.eq.f32.partialorder %v5663_v54, %v5930_v34 }
 0x401   :  { %v1778_v50 = vsel %vm1777_vm11, %v1773_v16, inf  ;;  %vm1878_vm12 = vcmp.eq.s32.totalorder %v3864_v24, %v1394_v36 }
 0x402   :  { %1779 = vmin.xlane.f32.xlu2 %v1778_v50  ;;  %v5946_v54 = vsel %vm1878_vm12, 1.0, %v6708_v8  ;;  %vm2801_vm12 = vcmask 122880  }
 0x403   :  { %3267 = vmatpush.xpose.msk.msrb.mxu3 %vm562_vm1, %v5707_v14  ;;  %v5937_v59 = vpop.f32.mrf.mxu3  ;;  %v3372_v14 = vld [vmem:[%s6529_s0 + $0xd0] sm:$0xff] }
 0x404   :  { %2481 = vst.msk [vmem:[%s6532_s3 + $0x158] sm:$0xff] %vm87_vm0, %v5937_v59  ;;  %v1735_v9 = vpop.xlane.xlu2 %1734 }
 0x405   :  { %v2324_v1 = vpop.f32.mrf.mxu1  ;;  %v1736_v36 = vcvt.f32.s32 %v1735_v9 }
 0x406   :  { %2464 = vst.msk [vmem:[%s6532_s3 + $0xd0] sm:$0xff] %vm87_vm0, %v2324_v1  ;;  %v2630_v7 = vsub.f32 %v2324_v1, %v3372_v14  ;;  %3216 = vmatmul.msk.f32.gmra.mxu1 %vm562_vm1, %v5946_v54  ;;  %v1738_v1 = vshll.u32 %v1737_v61, 16  ;;  %v1407_v14 = vcvt.f32.s32 %v5715_v39  ;;  %v1422_v39 = vcvt.f32.s32 %v5689_v41 }
 0x407   :  { %3268 = vmatpush.xpose.msk.msrb.mxu3 %vm562_vm1, %v5674_v6  ;;  %v1705_v37 = vpop.xlane.xlu1 %1704  ;;  %v1720_v3 = vpop.xlane.xlu0 %1719 }
 0x408   :  { %v2829_v31 = vmul.f32 %v2630_v7, %v2630_v7  ;;  %v1706_v13 = vcvt.f32.s32 %v1705_v37  ;;  %v1721_v10 = vcvt.f32.s32 %v1720_v3  ;;  %v1739_v12 = vadd.s32 %v1738_v1, %v1736_v36 }
 0x409   :  { %v1408_v37 = vshll.u32 %v1407_v14, 16 }
 0x40a   :  { %v2918_v21 = vsel %vm87_vm0, %v2829_v31, 0.0  ;;  %v1709_v17 = vadd.s32 %v1708_v44, %v1706_v13  ;;  %v1724_v57 = vadd.s32 %v1723_v60, %v1721_v10  ;;  %vm1901_vm15 = vcmp.eq.s32.totalorder %v3864_v24, %v1739_v12 }
 0x40b   :  { %v2919_v20 = vadd.f32 %v2918_v21, %v5870_v19  ;;  %3269 = vmatpush.xpose.msk.msrb.mxu3 %vm562_vm1, %v5646_v26  ;;  %v5964_v4 = vpop.f32.mrf.mxu3  ;;  %v3373_v26 = vld [vmem:[%s6529_s0 + $0xd8] sm:$0xff]  ;;  %v1423_v13 = vshll.u32 %v1422_v39, 16  ;;  %v6022_v21 = vsel %vm1901_vm15, 1.0, %v6708_v8  ;;  %vm3000_vm15 = vcmask 24576  }
 0x40c   :  { %2482 = vst.msk [vmem:[%s6532_s3 + $0x160] sm:$0xff] %vm87_vm0, %v5964_v4  ;;  %vm1899_vm13 = vcmp.eq.s32.totalorder %v3864_v24, %v1709_v17  ;;  %vm1900_vm14 = vcmp.eq.s32.totalorder %v3864_v24, %v1724_v57 }
 0x40d   :  { %v2327_v33 = vpop.f32.mrf.mxu1  ;;  %v5973_v6 = vsel %vm1899_vm13, 1.0, %v6708_v8 }
 0x40e   :  { %2465 = vst.msk [vmem:[%s6532_s3 + $0xd8] sm:$0xff] %vm87_vm0, %v2327_v33  ;;  %v2631_v19 = vsub.f32 %v2327_v33, %v3373_v26  ;;  %3237 = vmatmul.msk.f32.gmra.mxu3 %vm562_vm1, %v5973_v6  ;;  %v1752_v26 = vcvt.f32.s32 %v5746_v40 }
 0x40f   :  { %3270 = vmatpush.xpose.msk.msrb.mxu3 %vm562_vm1, %v5517_v23  ;;  %v6000_v23 = vsel %vm1900_vm14, 1.0, %v6708_v8  ;;  %v1420_v7 = vpop.xlane.xlu0 %1419 }
 0x410   :  { %v2830_v52 = vmul.f32 %v2631_v19, %v2631_v19  ;;  %v1421_v46 = vcvt.f32.s32 %v1420_v7  ;;  %v1753_v61 = vshll.u32 %v1752_v26, 16  ;;  %v1827_v7 = vcvt.f32.s32 %v5758_v5 }
 0x412   :  { %v2920_v16 = vsel %vm87_vm0, %v2830_v52, 0.0  ;;  %v1424_v17 = vadd.s32 %v1423_v13, %v1421_v46  ;;  %v2731_v13 = vsel %vm562_vm1, %v5919_v48, 0.0 }
 0x413   :  { %v2921_v50 = vadd.f32 %v2920_v16, %v2919_v20  ;;  %3271 = vmatpush.xpose.msk.msrb.mxu3 %vm562_vm1, %v5484_v18  ;;  %v5991_v30 = vpop.f32.mrf.mxu3  ;;  %v2732_v5 = vadd.f32 %v2731_v13, %v5904_v15 }
 0x414   :  { %2483 = vst.msk [vmem:[%s6532_s3 + $0x168] sm:$0xff] %vm87_vm0, %v5991_v30  ;;  %vm1880_vm3 = vcmp.eq.s32.totalorder %v3864_v24, %v1424_v17 }
 0x415   :  { %v6050_v19 = vsel %vm1880_vm3, 1.0, %v6708_v8  ;;  %vm2595_vm3 = vcmask 1042434  }
 0x416   :  { %3238 = vmatmul.msk.f32.gmra.mxu3 %vm562_vm1, %v6000_v23 }
 0x417   :  { %3272 = vmatpush.xpose.msk.msrb.mxu3 %vm562_vm1, %v6821_v47  ;;  %v1405_v18 = vpop.xlane.xlu1 %1404 }
 0x418   :  { %v1406_v3 = vcvt.f32.s32 %v1405_v18  ;;  %v1842_v18 = vcvt.f32.s32 %v5811_v62 }
 0x41a   :  { %v1409_v44 = vadd.s32 %v1408_v37, %v1406_v3  ;;  %v1828_v3 = vshll.u32 %v1827_v7, 16  ;;  %v1843_v46 = vshll.u32 %v1842_v18, 16 }
 0x41b   :  { %3273 = vmatpush.xpose.msk.msrb.mxu3 %vm562_vm1, %v6820_v27  ;;  %v6010_v31 = vpop.f32.mrf.mxu3  ;;  %v3374_v27 = vld [vmem:[%s6529_s0 + $0xe0] sm:$0xff] }
 0x41c   :  { %2484 = vst.msk [vmem:[%s6532_s3 + $0x170] sm:$0xff] %vm87_vm0, %v6010_v31  ;;  %vm1879_vm2 = vcmp.eq.s32.totalorder %v3864_v24, %v1409_v44 }
 0x41d   :  { %v2330_v41 = vpop.f32.mrf.mxu1  ;;  %v6019_v47 = vsel %vm1879_vm2, 1.0, %v6708_v8  ;;  %vm2593_vm2 = vcmask 1040384  }
 0x41e   :  { %2466 = vst.msk [vmem:[%s6532_s3 + $0xe0] sm:$0xff] %vm87_vm0, %v2330_v41  ;;  %v2632_v10 = vsub.f32 %v2330_v41, %v3374_v27  ;;  %3217 = vmatmul.msk.f32.gmra.mxu1 %vm562_vm1, %v6019_v47  ;;  %3239 = vmatmul.msk.f32.gmra.mxu3 %vm562_vm1, %v6022_v21  ;;  %v1767_v27 = vcvt.f32.s32 %v5820_v2 }
 0x41f   :  { %3274 = vmatpush.xpose.msk.msrb.mxu3 %vm562_vm1, %v6819_v0 }
 0x420   :  { %v2831_v20 = vmul.f32 %v2632_v10, %v2632_v10  ;;  %v1437_v10 = vcvt.f32.s32 %v5845_v28  ;;  %v1768_v26 = vshll.u32 %v1767_v27, 16 }
 0x422   :  { %v2922_v60 = vsel %vm87_vm0, %v2831_v20, 0.0  ;;  %v2733_v20 = vsel %vm562_vm1, %v5946_v54, 0.0 }
 0x423   :  { %v2923_v33 = vadd.f32 %v2922_v60, %v2921_v50  ;;  %3275 = vmatpush.xpose.msk.msrb.mxu3 %vm562_vm1, %v6818_v35  ;;  %v6041_v57 = vpop.f32.mrf.mxu3  ;;  %v3375_v35 = vld [vmem:[%s6529_s0 + $0xe8] sm:$0xff]  ;;  %v2735_v60 = vsel %vm562_vm1, %v6019_v47, 0.0  ;;  %v2734_v2 = vadd.f32 %v2733_v20, %v2732_v5  ;;  %v2743_v20 = vsel %vm562_vm1, %v5472_v63, 0.0 }
 0x424   :  { %2485 = vst.msk [vmem:[%s6532_s3 + $0x178] sm:$0xff] %vm87_vm0, %v6041_v57  ;;  %v2747_v63 = vsel %vm562_vm1, %v5520_v49, 0.0 }
 0x425   :  { %v2333_v0 = vpop.f32.mrf.mxu1 }
 0x426   :  { %2467 = vst.msk [vmem:[%s6532_s3 + $0xe8] sm:$0xff] %vm87_vm0, %v2333_v0  ;;  %v2633_v40 = vsub.f32 %v2333_v0, %v3375_v35  ;;  %3218 = vmatmul.msk.f32.gmra.mxu1 %vm562_vm1, %v6050_v19  ;;  %v1438_v0 = vshll.u32 %v1437_v10, 16 }
 0x427   :  { %3276 = vmatpush.xpose.msk.msrb.mxu3 %vm562_vm1, %v6817_v32  ;;  %v1750_v9 = vpop.xlane.xlu1 %1749 }
 0x428   :  { %v2832_v52 = vmul.f32 %v2633_v40, %v2633_v40  ;;  %v1751_v36 = vcvt.f32.s32 %v1750_v9  ;;  %v2736_v9 = vadd.f32 %v2735_v60, %v2734_v2 }
 0x42a   :  { %v2924_v16 = vsel %vm87_vm0, %v2832_v52, 0.0  ;;  %v1754_v50 = vadd.s32 %v1753_v61, %v1751_v36  ;;  %v1797_v36 = vcvt.f32.s32 %v5865_v45  ;;  %v2741_v45 = vsel %vm562_vm1, %v5454_v42, 0.0  ;;  %v3376_v42 = vld [vmem:[%s6529_s0 + $0xf0] sm:$0xff] }
 0x42b   :  { %v6064_v1 = vadd.f32 %v2924_v16, %v2923_v33  ;;  %3277 = vmatpush.xpose.msk.msrb.mxu3 %vm562_vm1, %v6816_v25  ;;  %v6068_v14 = vpop.f32.mrf.mxu3  ;;  %v1812_v16 = vcvt.f32.s32 %v5880_v22 }
 0x42c   :  { %2486 = vst.msk [vmem:[%s6532_s3 + $0x180] sm:$0xff] %vm87_vm0, %v6068_v14  ;;  %vm1902_vm4 = vcmp.eq.s32.totalorder %v3864_v24, %v1754_v50  ;;  %v2737_v50 = vsel %vm562_vm1, %v6050_v19, 0.0 }
 0x42d   :  { %v6077_v32 = vsel %vm1902_vm4, 1.0, %v6708_v8  ;;  %vm2597_vm4 = vcmask 1041408  }
 0x42e   :  { %3240 = vmatmul.msk.f32.gmra.mxu3 %vm562_vm1, %v6077_v32 }
 0x42f   :  { %3278 = vmatpush.xpose.msk.msrb.mxu3 %vm562_vm1, %v6814_v38 }
 0x433   :  { %3279 = vmatpush.xpose.msk.msrb.mxu3 %vm562_vm1, %v6813_v11  ;;  %v6085_v25 = vpop.f32.mrf.mxu3  ;;  %v1825_v11 = vpop.xlane.xlu0 %1824 }
 0x434   :  { %2487 = vst.msk [vmem:[%s6532_s3 + $0x188] sm:$0xff] %vm87_vm0, %v6085_v25  ;;  %v1826_v39 = vcvt.f32.s32 %v1825_v11  ;;  %v2738_v11 = vadd.f32 %v2737_v50, %v2736_v9 }
 0x436   :  { %v1829_v41 = vadd.s32 %v1828_v3, %v1826_v39 }
 0x438   :  { %vm1907_vm6 = vcmp.eq.s32.totalorder %v3864_v24, %v1829_v41 }
 0x439   :  { %v6125_v15 = vsel %vm1907_vm6, 1.0, %v6708_v8 }
 0x43b   :  { %v6092_v12 = vpop.f32.mrf.mxu3 }
 0x43c   :  { %2488 = vst.msk [vmem:[%s6532_s3 + $0x190] sm:$0xff] %vm87_vm0, %v6092_v12 }
 0x443   :  { %v6099_v38 = vpop.f32.mrf.mxu3 }
 0x444   :  { %2489 = vst.msk [vmem:[%s6532_s3 + $0x198] sm:$0xff] %vm87_vm0, %v6099_v38 }
 0x452   :  { %v1840_v37 = vpop.xlane.xlu2 %1839 }
 0x453   :  { %v1841_v44 = vcvt.f32.s32 %v1840_v37 }
 0x455   :  { %v1844_v17 = vadd.s32 %v1843_v46, %v1841_v44  ;;  %v1798_v46 = vshll.u32 %v1797_v36, 16  ;;  %v1813_v44 = vshll.u32 %v1812_v16, 16  ;;  %v6827_v36 = vld [vmem:[#allocation53_spill] sm:$0xff]  ;;  %v6828_v16 = vld [vmem:[#allocation54_spill] sm:$0xff] }
 0x456   :  { %v2751_v49 = vsel %vm562_vm1, %v6827_v36, 0.0 }
 0x457   :  { %vm1908_vm5 = vcmp.eq.s32.totalorder %v3864_v24, %v1844_v17 }
 0x458   :  { %v6117_v62 = vsel %vm1908_vm5, 1.0, %v6708_v8 }
 0x459   :  { %3298 = vmatpush.xpose.msk.msra.mxu3 %vm562_vm1, %v6117_v62 }
 0x45a   :  { %v1435_v28 = vpop.xlane.xlu1 %1434  ;;  %v1765_v33 = vpop.xlane.xlu2 %1764 }
 0x45b   :  { %v1436_v35 = vcvt.f32.s32 %v1435_v28  ;;  %v1766_v40 = vcvt.f32.s32 %v1765_v33  ;;  %v2745_v33 = vsel %vm562_vm1, %v5487_v55, 0.0  ;;  %v6826_v55 = vld [vmem:[#allocation45_spill] sm:$0xff] }
 0x45c   :  { %v2749_v9 = vsel %vm562_vm1, %v6826_v55, 0.0 }
 0x45d   :  { %v1439_v61 = vadd.s32 %v1438_v0, %v1436_v35  ;;  %v1769_v52 = vadd.s32 %v1768_v26, %v1766_v40  ;;  %3299 = vmatpush.xpose.msk.msra.mxu3 %vm562_vm1, %v6125_v15 }
 0x45f   :  { %vm1881_vm7 = vcmp.eq.s32.totalorder %v3864_v24, %v1439_v61  ;;  %vm1903_vm8 = vcmp.eq.s32.totalorder %v3864_v24, %v1769_v52 }
 0x460   :  { %v3155_v7 = vsel %vm1881_vm7, 1.0, %v6708_v8  ;;  %v6137_v18 = vsel %vm1903_vm8, 1.0, %v6708_v8 }
 0x461   :  { %3219 = vmatmul.msk.f32.gmra.mxu1 %vm562_vm1, %v3155_v7  ;;  %v2739_v39 = vsel %vm562_vm1, %v3155_v7, 0.0  ;;  %3241 = vmatmul.msk.f32.gmra.mxu3 %vm562_vm1, %v6137_v18 }
 0x462   :  { %v2740_v22 = vadd.f32 %v2739_v39, %v2738_v11  ;;  %3292 = vmatpush.xpose.msk.msra.mxu2 %vm562_vm1, %v3155_v7  ;;  %v1795_v37 = vpop.xlane.xlu1 %1794  ;;  %v1810_v3 = vpop.xlane.xlu0 %1809  ;;  %v6829_v11 = vld [vmem:[#allocation35_spill] sm:$0xff] }
 0x463   :  { %v1796_v13 = vcvt.f32.s32 %v1795_v37  ;;  %v1811_v41 = vcvt.f32.s32 %v1810_v3  ;;  %v2336_v17 = vpop.f32.mrf.mxu1  ;;  %v2755_v7 = vsel %vm562_vm1, %v6829_v11, 0.0 }
 0x464   :  { %v2742_v27 = vadd.f32 %v2741_v45, %v2740_v22  ;;  %2468 = vst.msk [vmem:[%s6532_s3 + $0xf0] sm:$0xff] %vm87_vm0, %v2336_v17  ;;  %v2634_v10 = vsub.f32 %v2336_v17, %v3376_v42  ;;  %v1782_v45 = vcvt.f32.s32 %v5930_v34  ;;  %v3377_v34 = vld [vmem:[%s6529_s0 + $0xf8] sm:$0xff] }
 0x465   :  { %v1799_v5 = vadd.s32 %v1798_v46, %v1796_v13  ;;  %v1814_v60 = vadd.s32 %v1813_v44, %v1811_v41  ;;  %v6831_v13 = vld [vmem:[#allocation27_spill] sm:$0xff] }
 0x466   :  { %v2744_v2 = vadd.f32 %v2743_v20, %v2742_v27  ;;  %v2833_v28 = vmul.f32 %v2634_v10, %v2634_v10  ;;  %3293 = vmatpush.xpose.msk.msra.mxu2 %vm562_vm1, %v6050_v19  ;;  %v2759_v41 = vsel %vm562_vm1, %v6831_v13, 0.0  ;;  %v6832_v20 = vld [vmem:[#allocation34_spill] sm:$0xff] }
 0x467   :  { %vm1906_vm9 = vcmp.eq.s32.totalorder %v3864_v24, %v1814_v60  ;;  %vm1905_vm10 = vcmp.eq.s32.totalorder %v3864_v24, %v1799_v5  ;;  %v2761_v5 = vsel %vm562_vm1, %v6832_v20, 0.0 }
 0x468   :  { %v2746_v26 = vadd.f32 %v2745_v33, %v2744_v2  ;;  %v2926_v0 = vsel %vm87_vm0, %v2833_v28, 0.0  ;;  %v6162_v35 = vsel %vm1906_vm9, 1.0, %v6708_v8  ;;  %v6175_v52 = vsel %vm1905_vm10, 1.0, %v6708_v8  ;;  %v6833_v33 = vld [vmem:[#allocation33_spill] sm:$0xff] }
 0x469   :  { %v2927_v40 = vadd.f32 %v2926_v0, %v6064_v1  ;;  %3300 = vmatpush.xpose.msk.msra.mxu3 %vm562_vm1, %v6162_v35 }
 0x46a   :  { %v2748_v19 = vadd.f32 %v2747_v63, %v2746_v26  ;;  %3294 = vmatpush.xpose.msk.msra.mxu2 %vm562_vm1, %v6019_v47  ;;  %v2753_v47 = vsel %vm562_vm1, %v6828_v16, 0.0  ;;  %v2763_v26 = vsel %vm562_vm1, %v6833_v33, 0.0 }
 0x46c   :  { %v2750_v61 = vadd.f32 %v2749_v9, %v2748_v19  ;;  %v6834_v19 = vld [vmem:[#allocation23_spill] sm:$0xff] }
 0x46d   :  { %3301 = vmatpush.xpose.msk.msra.mxu3 %vm562_vm1, %v6175_v52  ;;  %v2765_v55 = vsel %vm562_vm1, %v6834_v19, 0.0 }
 0x46e   :  { %v2752_v1 = vadd.f32 %v2751_v49, %v2750_v61  ;;  %3295 = vmatpush.xpose.msk.msra.mxu2 %vm562_vm1, %v5946_v54  ;;  %v6830_v54 = vld [vmem:[#allocation26_spill] sm:$0xff]  ;;  %v3378_v49 = vld [vmem:[%s6529_s0 + $0x100] sm:$0xff] }
 0x46f   :  { %v2757_v37 = vsel %vm562_vm1, %v6830_v54, 0.0 }
 0x470   :  { %v2754_v50 = vadd.f32 %v2753_v47, %v2752_v1  ;;  %v6835_v1 = vld [vmem:[#allocation42_spill] sm:$0xff] }
 0x471   :  { %v6187_v39 = vpop.f32.mrf.mxu3  ;;  %v2767_v16 = vsel %vm562_vm1, %v6835_v1, 0.0 }
 0x472   :  { %v2756_v22 = vadd.f32 %v2755_v7, %v2754_v50  ;;  %2490 = vst.msk [vmem:[%s6532_s3 + $0x1a0] sm:$0xff] %vm87_vm0, %v6187_v39  ;;  %3296 = vmatpush.xpose.msk.msra.mxu2 %vm562_vm1, %v5919_v48  ;;  %v1783_v48 = vshll.u32 %v1782_v45, 16  ;;  %v6836_v50 = vld [vmem:[#allocation29_spill] sm:$0xff] }
 0x473   :  { %v2339_v3 = vpop.f32.mrf.mxu1  ;;  %v2769_v11 = vsel %vm562_vm1, %v6836_v50, 0.0 }
 0x474   :  { %v2758_v46 = vadd.f32 %v2757_v37, %v2756_v22  ;;  %2469 = vst.msk [vmem:[%s6532_s3 + $0xf8] sm:$0xff] %vm87_vm0, %v2339_v3  ;;  %v2635_v44 = vsub.f32 %v2339_v3, %v3377_v34  ;;  %v2771_v22 = vsel %vm562_vm1, %v5886_v58, 0.0  ;;  %v2773_v34 = vsel %vm562_vm1, %v5922_v43, 0.0 }
 0x475   :  { %v1780_v17 = vpop.xlane.xlu2 %1779 }
 0x476   :  { %v2760_v27 = vadd.f32 %v2759_v41, %v2758_v46  ;;  %v2834_v42 = vmul.f32 %v2635_v44, %v2635_v44  ;;  %v1781_v10 = vcvt.f32.s32 %v1780_v17  ;;  %v6243_v46 = vcvt.s32.f32 %v3864_v24  ;;  %v3379_v41 = vld [vmem:[%s6529_s0 + $0x108] sm:$0xff] }
 0x478   :  { %v2762_v60 = vadd.f32 %v2761_v5, %v2760_v27  ;;  %v2928_v2 = vsel %vm87_vm0, %v2834_v42, 0.0  ;;  %v1784_v28 = vadd.s32 %v1783_v48, %v1781_v10  ;;  %3263 = vmatmul.msk.f32.vlgmr.msrb.gmra.mxu2 %vm562_vm1, %v6243_v46  ;;  %v2777_v42 = vsel %vm562_vm1, %v6000_v23, 0.0 }
 0x479   :  { %v2929_v0 = vadd.f32 %v2928_v2, %v2927_v40  ;;  %v2779_v5 = vsel %vm562_vm1, %v6022_v21, 0.0 }
 0x47a   :  { %v2764_v63 = vadd.f32 %v2763_v26, %v2762_v60  ;;  %vm1904_vm11 = vcmp.eq.s32.totalorder %v3864_v24, %v1784_v28  ;;  %v2775_v24 = vsel %vm562_vm1, %v5973_v6, 0.0  ;;  %v2781_v28 = vsel %vm562_vm1, %v6077_v32, 0.0 }
 0x47b   :  { %v2342_v9 = vpop.f32.mrf.mxu1  ;;  %v3178_v61 = vsel %vm1904_vm11, 1.0, %v6708_v8 }
 0x47c   :  { %v2766_v36 = vadd.f32 %v2765_v55, %v2764_v63  ;;  %2470 = vst.msk [vmem:[%s6532_s3 + $0x100] sm:$0xff] %vm87_vm0, %v2342_v9  ;;  %v2636_v40 = vsub.f32 %v2342_v9, %v3378_v49  ;;  %3242 = vmatmul.msk.f32.gmra.mxu3 %vm562_vm1, %v3178_v61 }
 0x47d   :  { %3302 = vmatpush.xpose.msk.msra.mxu3 %vm562_vm1, %v3178_v61 }
 0x47e   :  { %v2768_v47 = vadd.f32 %v2767_v16, %v2766_v36  ;;  %v2835_v8 = vmul.f32 %v2636_v40, %v2636_v40 }
 0x480   :  { %v2770_v7 = vadd.f32 %v2769_v11, %v2768_v47  ;;  %v2930_v45 = vsel %vm87_vm0, %v2835_v8, 0.0  ;;  %3297 = vmatmul.msk.f32.vlgmr.msra.gmra.mxu2 %vm562_vm1, %v6243_v46 }
 0x481   :  { %v2931_v54 = vadd.f32 %v2930_v45, %v2929_v0  ;;  %3303 = vmatpush.xpose.msk.msra.mxu3 %vm562_vm1, %v6137_v18  ;;  %v6235_v37 = vpop.f32.mrf.mxu3  ;;  %v2783_v0 = vsel %vm562_vm1, %v6137_v18, 0.0 }
 0x482   :  { %v2772_v3 = vadd.f32 %v2771_v22, %v2770_v7  ;;  %2491 = vst.msk [vmem:[%s6532_s3 + $0x1a8] sm:$0xff] %vm87_vm0, %v6235_v37 }
 0x483   :  { %v2345_v44 = vpop.f32.mrf.mxu1 }
 0x484   :  { %v2774_v13 = vadd.f32 %v2773_v34, %v2772_v3  ;;  %2471 = vst.msk [vmem:[%s6532_s3 + $0x108] sm:$0xff] %vm87_vm0, %v2345_v44  ;;  %v2637_v17 = vsub.f32 %v2345_v44, %v3379_v41  ;;  %3243 = vmatmul.msk.f32.gmra.mxu3 %vm562_vm1, %v6175_v52 }
 0x485   :  { %3304 = vmatpush.xpose.msk.msra.mxu3 %vm562_vm1, %v6077_v32  ;;  %v2787_v32 = vsel %vm562_vm1, %v6175_v52, 0.0  ;;  %v2791_v52 = vsel %vm562_vm1, %v6125_v15, 0.0 }
 0x486   :  { %v2776_v48 = vadd.f32 %v2775_v24, %v2774_v13  ;;  %v2836_v27 = vmul.f32 %v2637_v17, %v2637_v17  ;;  %v3383_v24 = vld [vmem:[%s6529_s0 + $0x130] sm:$0xff] }
 0x488   :  { %v2778_v10 = vadd.f32 %v2777_v42, %v2776_v48  ;;  %v2932_v20 = vsel %vm87_vm0, %v2836_v27, 0.0  ;;  %v6838_v48 = vld [vmem:[#allocation43_spill] sm:$0xff]  ;;  %v3384_v42 = vld [vmem:[%s6529_s0 + $0x120] sm:$0xff] }
 0x489   :  { %v2933_v60 = vadd.f32 %v2932_v20, %v2931_v54  ;;  %3305 = vmatpush.xpose.msk.msra.mxu3 %vm562_vm1, %v6022_v21  ;;  %v2785_v21 = vsel %vm562_vm1, %v3178_v61, 0.0  ;;  %v2793_v61 = vsel %vm562_vm1, %v6117_v62, 0.0  ;;  %v2642_v27 = vsub.f32 %v6838_v48, %v3383_v24  ;;  %v3394_v24 = vld [vmem:[%s6529_s0 + $0x180] sm:$0xff] }
 0x48a   :  { %v2780_v2 = vadd.f32 %v2779_v5, %v2778_v10  ;;  %v3385_v5 = vld [vmem:[%s6529_s0 + $0x138] sm:$0xff] }
 0x48c   :  { %v2782_v26 = vadd.f32 %v2781_v28, %v2780_v2  ;;  %3244 = vmatmul.msk.f32.gmra.mxu3 %vm562_vm1, %v6162_v35  ;;  %v2841_v28 = vmul.f32 %v2642_v27, %v2642_v27 }
 0x48d   :  { %3306 = vmatpush.xpose.msk.msra.mxu3 %vm562_vm1, %v6000_v23  ;;  %v2789_v23 = vsel %vm562_vm1, %v6162_v35, 0.0 }
 0x48e   :  { %v2784_v63 = vadd.f32 %v2783_v0, %v2782_v26  ;;  %v3386_v26 = vld [vmem:[%s6529_s0 + $0x140] sm:$0xff] }
 0x48f   :  { %v2644_v0 = vsub.f32 %v5872_v51, %v3386_v26 }
 0x490   :  { %v2786_v55 = vadd.f32 %v2785_v21, %v2784_v63 }
 0x491   :  { %3307 = vmatpush.xpose.msk.msra.mxu3 %vm562_vm1, %v5973_v6  ;;  %v6284_v9 = vpop.f32.mrf.mxu3 }
 0x492   :  { %v2788_v36 = vadd.f32 %v2787_v32, %v2786_v55  ;;  %2492 = vst.msk [vmem:[%s6532_s3 + $0x1b0] sm:$0xff] %vm87_vm0, %v6284_v9 }
 0x494   :  { %v2790_v18 = vadd.f32 %v2789_v23, %v2788_v36  ;;  %3245 = vmatmul.msk.f32.gmra.mxu3 %vm562_vm1, %v6125_v15 }
 0x495   :  { %3308 = vmatpush.xpose.msk.msra.mxu3 %vm562_vm1, %v5922_v43  ;;  %v3380_v43 = vld [vmem:[%s6529_s0 + $0x110] sm:$0xff] }
 0x496   :  { %v2792_v6 = vadd.f32 %v2791_v52, %v2790_v18  ;;  %v2942_v18 = vsel %vm87_vm0, %v2841_v28, 0.0  ;;  %v2843_v52 = vmul.f32 %v2644_v0, %v2644_v0 }
 0x498   :  { %v2794_v49 = vadd.f32 %v2793_v61, %v2792_v6  ;;  %v3388_v6 = vld [vmem:[%s6529_s0 + $0x150] sm:$0xff] }
 0x499   :  { %3309 = vmatpush.xpose.msk.msra.mxu3 %vm562_vm1, %v5886_v58  ;;  %v6303_v40 = vpop.f32.mrf.mxu3  ;;  %v2646_v61 = vsub.f32 %v5910_v56, %v3388_v6 }
 0x49a   :  { %2493 = vst.msk [vmem:[%s6532_s3 + $0x1b8] sm:$0xff] %vm87_vm0, %v6303_v40  ;;  %v2795_v15 = vrot.slane %v2794_v49, 4 }
 0x49b   :  { %v2348_v35 = vpop.f32.mrf.mxu1 }
 0x49c   :  { %2472 = vst.msk [vmem:[%s6532_s3 + $0x110] sm:$0xff] %vm87_vm0, %v2348_v35  ;;  %v2638_v58 = vsub.f32 %v2348_v35, %v3380_v43  ;;  %3246 = vmatmul.msk.f32.gmra.mxu3 %vm562_vm1, %v6117_v62  ;;  %v2796_v16 = vadd.f32 %v2795_v15, %v2794_v49  ;;  %v3389_v35 = vld [vmem:[%s6529_s0 + $0x158] sm:$0xff] }
 0x49d   :  { %3310 = vmatpush.xpose.msk.msra.mxu3 %vm562_vm1, %v6836_v50  ;;  %v2647_v43 = vsub.f32 %v5937_v59, %v3389_v35 }
 0x49e   :  { %v2837_v47 = vmul.f32 %v2638_v58, %v2638_v58  ;;  %v2797_v8 = vrot.slane %v2796_v16, 2 }
 0x4a0   :  { %v2934_v11 = vsel %vm87_vm0, %v2837_v47, 0.0  ;;  %v2798_v7 = vadd.f32 %v2797_v8, %v2796_v16  ;;  %v2946_v16 = vsel %vm87_vm0, %v2843_v52, 0.0  ;;  %v2845_v47 = vmul.f32 %v2646_v61, %v2646_v61  ;;  %v3390_v8 = vld [vmem:[%s6529_s0 + $0x160] sm:$0xff]  ;;  %v3399_v52 = vld [vmem:[%s6529_s0 + $0x1a8] sm:$0xff] }
 0x4a1   :  { %v2935_v45 = vadd.f32 %v2934_v11, %v2933_v60  ;;  %3311 = vmatpush.xpose.msk.msra.mxu3 %vm562_vm1, %v6835_v1  ;;  %v6324_v22 = vpop.f32.mrf.mxu3  ;;  %v3381_v1 = vld [vmem:[%s6529_s0 + $0x118] sm:$0xff]  ;;  %v2643_v60 = vsub.f32 %v5835_v53, %v3385_v5  ;;  %v3387_v53 = vld [vmem:[%s6529_s0 + $0x148] sm:$0xff]  ;;  %v2648_v56 = vsub.f32 %v5964_v4, %v3390_v8 }
 0x4a2   :  { %2494 = vst.msk [vmem:[%s6532_s3 + $0x1c0] sm:$0xff] %vm87_vm0, %v6324_v22  ;;  %v2799_v62 = vrot.slane %v2798_v7, 1  ;;  %v2645_v23 = vsub.f32 %v5891_v29, %v3387_v53  ;;  %v3398_v53 = vld [vmem:[%s6529_s0 + $0x1a0] sm:$0xff] }
 0x4a3   :  { %v2351_v54 = vpop.f32.mrf.mxu1  ;;  %v2842_v36 = vmul.f32 %v2643_v60, %v2643_v60 }
 0x4a4   :  { %2473 = vst.msk [vmem:[%s6532_s3 + $0x118] sm:$0xff] %vm87_vm0, %v2351_v54  ;;  %v2639_v50 = vsub.f32 %v2351_v54, %v3381_v1  ;;  %3280 = vmatmul.msk.f32.vlgmr.msrb.gmra.mxu3 %vm562_vm1, %v6243_v46  ;;  %v2800_v3 = vadd.f32 %v2799_v62, %v2798_v7  ;;  %v2844_v29 = vmul.f32 %v2645_v23, %v2645_v23  ;;  %v3391_v62 = vld [vmem:[%s6529_s0 + $0x168] sm:$0xff]  ;;  %v2950_v1 = vsel %vm87_vm0, %v2845_v47, 0.0 }
 0x4a5   :  { %3312 = vmatpush.xpose.msk.msra.mxu3 %vm562_vm1, %v6834_v19  ;;  %v6837_v19 = vld [vmem:[#allocation12_spill] sm:$0xff]  ;;  %v2944_v15 = vsel %vm87_vm0, %v2842_v36, 0.0  ;;  %v2649_v59 = vsub.f32 %v5991_v30, %v3391_v62 }
 0x4a6   :  { %v2838_v34 = vmul.f32 %v2639_v50, %v2639_v50  ;;  %2802 = vst.msk [vmem:[#allocation4] sm:$0x1] %vm2801_vm12, %v2800_v3  ;;  %v2948_v7 = vsel %vm87_vm0, %v2844_v29, 0.0  ;;  %v2847_v50 = vmul.f32 %v2648_v56, %v2648_v56  ;;  %v3392_v3 = vld [vmem:[%s6529_s0 + $0x170] sm:$0xff]  ;;  %v3402_v56 = vld [vmem:[%s6529_s0 + $0x1c0] sm:$0xff] }
 0x4a7   :  { %3025 = dma.vmem_to_hbm [thread:$0]  %s3021_s16, 16, %s3023_s14, [#allocation5]   ;;  %v2650_v4 = vsub.f32 %v6010_v31, %v3392_v3  ;;  %v2652_v31 = vsub.f32 %v6068_v14, %v3394_v24 }
 0x4a8   :  { %v2936_v44 = vsel %vm87_vm0, %v2838_v34, 0.0 }
 0x4a9   :  { %v2937_v13 = vadd.f32 %v2936_v44, %v2935_v45  ;;  %3313 = vmatpush.xpose.msk.msra.mxu3 %vm562_vm1, %v6833_v33  ;;  %v3382_v33 = vld [vmem:[%s6529_s0 + $0x128] sm:$0xff]  ;;  %v2846_v45 = vmul.f32 %v2647_v43, %v2647_v43  ;;  %v2851_v60 = vmul.f32 %v2652_v31, %v2652_v31  ;;  %v3405_v31 = vld [vmem:[%s6529_s0 + $0x1d8] sm:$0xff] }
 0x4ab   :  { %v2952_v44 = vsel %vm87_vm0, %v2846_v45, 0.0 }
 0x4ac   :  { %3314 = vmatmul.msk.f32.vlgmr.msra.gmra.mxu3 %vm562_vm1, %v6243_v46  ;;  %v2641_v46 = vsub.f32 %v6837_v19, %v3382_v33  ;;  %v3393_v33 = vld [vmem:[%s6529_s0 + $0x178] sm:$0xff] }
 0x4ad   :  { %v2651_v30 = vsub.f32 %v6041_v57, %v3393_v33 }
 0x4ae   :  { %v2840_v20 = vmul.f32 %v2641_v46, %v2641_v46  ;;  %v2954_v46 = vsel %vm87_vm0, %v2847_v50, 0.0 }
 0x4b0   :  { %v2940_v32 = vsel %vm87_vm0, %v2840_v20, 0.0 }
 0x4b1   :  { %v6347_v41 = vpop.f32.mrf.mxu3 }
 0x4b2   :  { %2495 = vst.msk [vmem:[%s6532_s3 + $0x1c8] sm:$0xff] %vm87_vm0, %v6347_v41 }
 0x4de   :  { %v2354_v17 = vpop.f32.mrf.mxu1 }
 0x4df   :  { %2474 = vst.msk [vmem:[%s6532_s3 + $0x120] sm:$0xff] %vm87_vm0, %v2354_v17  ;;  %v2640_v10 = vsub.f32 %v2354_v17, %v3384_v42  ;;  %v2849_v17 = vmul.f32 %v2650_v4, %v2650_v4  ;;  %v2850_v42 = vmul.f32 %v2651_v30, %v2651_v30 }
 0x4e1   :  { %v2839_v2 = vmul.f32 %v2640_v10, %v2640_v10  ;;  %v3395_v10 = vld [vmem:[%s6529_s0 + $0x188] sm:$0xff]  ;;  %v2958_v5 = vsel %vm87_vm0, %v2849_v17, 0.0  ;;  %v2960_v26 = vsel %vm87_vm0, %v2850_v42, 0.0 }
 0x4e2   :  { %v2653_v57 = vsub.f32 %v6085_v25, %v3395_v10 }
 0x4e3   :  { %v2938_v63 = vsel %vm87_vm0, %v2839_v2, 0.0  ;;  %v3396_v2 = vld [vmem:[%s6529_s0 + $0x190] sm:$0xff] }
 0x4e4   :  { %v2939_v21 = vadd.f32 %v2938_v63, %v2937_v13  ;;  %v6381_v55 = vpop.f32.mrf.mxu3  ;;  %v2848_v13 = vmul.f32 %v2649_v59, %v2649_v59  ;;  %v2654_v14 = vsub.f32 %v6092_v12, %v3396_v2  ;;  %v2852_v0 = vmul.f32 %v2653_v57, %v2653_v57  ;;  %v3397_v63 = vld [vmem:[%s6529_s0 + $0x198] sm:$0xff]  ;;  %v3403_v59 = vld [vmem:[%s6529_s0 + $0x1c8] sm:$0xff] }
 0x4e5   :  { %2496 = vst.msk [vmem:[%s6532_s3 + $0x1d0] sm:$0xff] %vm87_vm0, %v6381_v55  ;;  %v2655_v25 = vsub.f32 %v6099_v38, %v3397_v63  ;;  %v2656_v12 = vsub.f32 %v6187_v39, %v3398_v53  ;;  %v2657_v38 = vsub.f32 %v6235_v37, %v3399_v52 }
 0x4e6   :  { %v2941_v51 = vadd.f32 %v2940_v32, %v2939_v21  ;;  %v2956_v27 = vsel %vm87_vm0, %v2848_v13, 0.0  ;;  %v2962_v32 = vsel %vm87_vm0, %v2851_v60, 0.0  ;;  %v2853_v36 = vmul.f32 %v2654_v14, %v2654_v14 }
 0x4e7   :  { %v2856_v37 = vmul.f32 %v2657_v38, %v2657_v38 }
 0x4e8   :  { %v2943_v49 = vadd.f32 %v2942_v18, %v2941_v51  ;;  %v2964_v51 = vsel %vm87_vm0, %v2852_v0, 0.0  ;;  %v2854_v18 = vmul.f32 %v2655_v25, %v2655_v25  ;;  %v2966_v61 = vsel %vm87_vm0, %v2853_v36, 0.0 }
 0x4e9   :  { %v2972_v45 = vsel %vm87_vm0, %v2856_v37, 0.0 }
 0x4ea   :  { %v2945_v58 = vadd.f32 %v2944_v15, %v2943_v49  ;;  %v2855_v49 = vmul.f32 %v2656_v12, %v2656_v12  ;;  %v3400_v15 = vld [vmem:[%s6529_s0 + $0x1b0] sm:$0xff]  ;;  %v2968_v43 = vsel %vm87_vm0, %v2854_v18, 0.0 }
 0x4eb   :  { %v2658_v39 = vsub.f32 %v6284_v9, %v3400_v15 }
 0x4ec   :  { %v2947_v11 = vadd.f32 %v2946_v16, %v2945_v58  ;;  %v3401_v58 = vld [vmem:[%s6529_s0 + $0x1b8] sm:$0xff]  ;;  %v2970_v8 = vsel %vm87_vm0, %v2855_v49, 0.0 }
 0x4ed   :  { %v2659_v16 = vsub.f32 %v6303_v40, %v3401_v58  ;;  %v2857_v9 = vmul.f32 %v2658_v39, %v2658_v39  ;;  %v2661_v40 = vsub.f32 %v6347_v41, %v3403_v59  ;;  %v3404_v41 = vld [vmem:[%s6529_s0 + $0x1d0] sm:$0xff] }
 0x4ee   :  { %v2949_v54 = vadd.f32 %v2948_v7, %v2947_v11  ;;  %v2660_v11 = vsub.f32 %v6324_v22, %v3402_v56  ;;  %v2662_v33 = vsub.f32 %v6381_v55, %v3404_v41  ;;  %v3406_v55 = vld [vmem:[%s6529_s0 + $0x1e0] sm:$0xff] }
 0x4ef   :  { %v2858_v62 = vmul.f32 %v2659_v16, %v2659_v16 }
 0x4f0   :  { %v2951_v34 = vadd.f32 %v2950_v1, %v2949_v54  ;;  %v2974_v1 = vsel %vm87_vm0, %v2857_v9, 0.0  ;;  %v2859_v50 = vmul.f32 %v2660_v11, %v2660_v11  ;;  %v2861_v24 = vmul.f32 %v2662_v33, %v2662_v33 }
 0x4f1   :  { %v2976_v22 = vsel %vm87_vm0, %v2858_v62, 0.0  ;;  %v6839_v33 = vlaneseq }
 0x4f2   :  { %v2953_v19 = vadd.f32 %v2952_v44, %v2951_v34  ;;  %v2860_v34 = vmul.f32 %v2661_v40, %v2661_v40  ;;  %v2978_v13 = vsel %vm87_vm0, %v2859_v50, 0.0 }
 0x4f3   :  { %vm2601_vm5 = vcmp.lt.s32.totalorder %v6839_v33, 512 }
 0x4f4   :  { %v2955_v48 = vadd.f32 %v2954_v46, %v2953_v19  ;;  %v2980_v19 = vsel %vm87_vm0, %v2860_v34, 0.0 }
 0x4f6   :  { %v2957_v20 = vadd.f32 %v2956_v27, %v2955_v48  ;;  %v2982_v27 = vsel %vm87_vm0, %v2861_v24, 0.0 }
 0x4f8   :  { %v2959_v28 = vadd.f32 %v2958_v5, %v2957_v20  ;;  %v3407_v20 = vld [vmem:[%s6529_s0 + $0x1e8] sm:$0xff] }
 0x4fa   :  { %v2961_v21 = vadd.f32 %v2960_v26, %v2959_v28  ;;  %v3408_v28 = vld [vmem:[%s6529_s0 + $0x1f0] sm:$0xff] }
 0x4fb   :  { %v2523_v25 = vpop.f32.mrf.mxu2 }
 0x4fc   :  { %v2963_v23 = vadd.f32 %v2962_v32, %v2961_v21  ;;  %v3320_v11 = vceil.f32 %v2523_v25 }
 0x4fe   :  { %v2965_v6 = vadd.f32 %v2964_v51, %v2963_v23  ;;  %v3409_v51 = vld [vmem:[%s6529_s0 + $0x1f8] sm:$0xff]  ;;  %s3488_s0 = smov [#allocation6]  }
 0x4ff   :  { %v2423_v29 = vpop.f32.mrf.mxu3 }
 0x500   :  { %v2967_v35 = vadd.f32 %v2966_v61, %v2965_v6  ;;  %2497 = vst.msk [vmem:[%s6532_s3 + $0x1d8] sm:$0xff] %vm87_vm0, %v2423_v29  ;;  %v2663_v48 = vsub.f32 %v2423_v29, %v3405_v31 }
 0x502   :  { %v2969_v47 = vadd.f32 %v2968_v43, %v2967_v35  ;;  %v2862_v42 = vmul.f32 %v2663_v48, %v2663_v48 }
 0x503   :  { %v2563_v15 = vpop.f32.mrf.mxu2 }
 0x504   :  { %v2971_v7 = vadd.f32 %v2970_v8, %v2969_v47  ;;  %v2984_v2 = vsel %vm87_vm0, %v2862_v42, 0.0  ;;  %v3330_v37 = vceil.f32 %v2563_v15  ;;  %v3331_v58 = vfloor.f32 %v2563_v15 }
 0x505   :  { %vm3329_vm13 = vcmp.lt.s32.totalorder %v2563_v15, 0 }
 0x506   :  { %v2973_v54 = vadd.f32 %v2972_v45, %v2971_v7  ;;  %v3332_v9 = vsel %vm3329_vm13, %v3330_v37, %v3331_v58  ;;  %v3321_v7 = vfloor.f32 %v2523_v25 }
 0x507   :  { %v2426_v3 = vpop.f32.mrf.mxu3  ;;  %v3333_v62 = vcvt.f32.s32 %v3332_v9 }
 0x508   :  { %v2975_v4 = vadd.f32 %v2974_v1, %v2973_v54  ;;  %2498 = vst.msk [vmem:[%s6532_s3 + $0x1e0] sm:$0xff] %vm87_vm0, %v2426_v3  ;;  %v2664_v10 = vsub.f32 %v2426_v3, %v3406_v55 }
 0x509   :  { %v2591_v34 = vrot.slane %v3333_v62, 6 }
 0x50a   :  { %v2977_v44 = vadd.f32 %v2976_v22, %v2975_v4  ;;  %v2863_v14 = vmul.f32 %v2664_v10, %v2664_v10 }
 0x50c   :  { %v2979_v30 = vadd.f32 %v2978_v13, %v2977_v44  ;;  %v2986_v21 = vsel %vm87_vm0, %v2863_v14, 0.0 }
 0x50e   :  { %v2981_v46 = vadd.f32 %v2980_v19, %v2979_v30 }
 0x50f   :  { %v2429_v17 = vpop.f32.mrf.mxu3 }
 0x510   :  { %2499 = vst.msk [vmem:[%s6532_s3 + $0x1e8] sm:$0xff] %vm87_vm0, %v2429_v17  ;;  %v2983_v57 = vadd.f32 %v2982_v27, %v2981_v46  ;;  %v2665_v5 = vsub.f32 %v2429_v17, %v3407_v20 }
 0x512   :  { %v2985_v0 = vadd.f32 %v2984_v2, %v2983_v57  ;;  %v2864_v63 = vmul.f32 %v2665_v5, %v2665_v5 }
 0x514   :  { %v2987_v36 = vadd.f32 %v2986_v21, %v2985_v0  ;;  %v2988_v53 = vsel %vm87_vm0, %v2864_v63, 0.0 }
 0x516   :  { %v2989_v52 = vadd.f32 %v2988_v53, %v2987_v36 }
 0x517   :  { %v2432_v60 = vpop.f32.mrf.mxu3 }
 0x518   :  { %2500 = vst.msk [vmem:[%s6532_s3 + $0x1f0] sm:$0xff] %vm87_vm0, %v2432_v60  ;;  %v2666_v26 = vsub.f32 %v2432_v60, %v3408_v28 }
 0x51a   :  { %v2865_v32 = vmul.f32 %v2666_v26, %v2666_v26 }
 0x51c   :  { %v2990_v23 = vsel %vm87_vm0, %v2865_v32, 0.0 }
 0x51d   :  { %v2991_v6 = vadd.f32 %v2990_v23, %v2989_v52 }
 0x51f   :  { %v2435_v12 = vpop.f32.mrf.mxu3 }
 0x520   :  { %2501 = vst.msk [vmem:[%s6532_s3 + $0x1f8] sm:$0xff] %vm87_vm0, %v2435_v12  ;;  %v2667_v18 = vsub.f32 %v2435_v12, %v3409_v51  ;;  %s3031_s3 = sshll.u32 %s3488_s0, 4  ;;  %s3032_s3 = int_to_ptr.vmem [resolvable:$true] %s3031_s3 }
 0x522   :  { %v2866_v38 = vmul.f32 %v2667_v18, %v2667_v18 }
 0x524   :  { %v2992_v61 = vsel %vm87_vm0, %v2866_v38, 0.0  ;;  %vm3319_vm0 = vcmp.lt.s32.totalorder %v2523_v25, 0 }
 0x525   :  { %v2993_v49 = vadd.f32 %v2992_v61, %v2991_v6  ;;  %v3322_v3 = vsel %vm3319_vm0, %v3320_v11, %v3321_v7 }
 0x526   :  { %v3323_v13 = vcvt.f32.s32 %v3322_v3 }
 0x527   :  { %v2994_v39 = vrot.slane %v2993_v49, 4  ;;  %v2543_v29 = vpop.f32.mrf.mxu3 }
 0x528   :  { %v3325_v35 = vceil.f32 %v2543_v29  ;;  %v3326_v43 = vfloor.f32 %v2543_v29  ;;  %vm3324_vm1 = vcmp.lt.s32.totalorder %v2543_v29, 0 }
 0x529   :  { %v2995_v16 = vadd.f32 %v2994_v39, %v2993_v49 }
 0x52a   :  { %v3327_v8 = vsel %vm3324_vm1, %v3325_v35, %v3326_v43 }
 0x52b   :  { %v2996_v47 = vrot.slane %v2995_v16, 2  ;;  %v3328_v45 = vcvt.f32.s32 %v3327_v8 }
 0x52d   :  { %v2997_v56 = vadd.f32 %v2996_v47, %v2995_v16  ;;  %v2590_v22 = vrot.slane %v3328_v45, 7 }
 0x52f   :  { %v2583_v59 = vpop.f32.mrf.mxu3  ;;  %v2998_v40 = vrot.slane %v2997_v56, 1  ;;  %v2594_v30 = vsel %vm2593_vm2, %v3323_v13, %v2590_v22 }
 0x530   :  { %vm3334_vm14 = vcmp.lt.s32.totalorder %v2583_v59, 0  ;;  %v3335_v54 = vceil.f32 %v2583_v59  ;;  %v3336_v1 = vfloor.f32 %v2583_v59 }
 0x531   :  { %v2999_v50 = vadd.f32 %v2998_v40, %v2997_v56 }
 0x532   :  { %v3337_v4 = vsel %vm3334_vm14, %v3335_v54, %v3336_v1 }
 0x533   :  { %v3338_v44 = vcvt.f32.s32 %v3337_v4  ;;  %3001 = vst.msk [vmem:[#allocation6] sm:$0x1] %vm3000_vm15, %v2999_v50 }
 0x534   :  { %3036 = dma.vmem_to_hbm [thread:$0]  %s3032_s3, 16, %s3034_s9, [#allocation5]  }
 0x535   :  { %v2592_v41 = vrot.slane %v3338_v44, 5 }
 0x537   :  { %v2596_v19 = vsel %vm2595_vm3, %v2591_v34, %v2592_v41 }
 0x538   :  { %v2598_v46 = vsel %vm2597_vm4, %v2594_v30, %v2596_v19 }
 0x539   :  { %2603 = vst.msk [vmem:[#allocation2] sm:$0xf] %vm2601_vm5, %v2598_v46 }
 0x53a   :  { %3014 = dma.vmem_to_hbm [thread:$0]  %s3010_s2, 64, %s3012_s12, [#allocation3]  }
 0x53b   :  { %3482 = dma.done.wait [#allocation3], 64  }
 0x53c   :  { %3483 = vsyncadd [#allocation3], 4294967232 }
 0x53d   :  { %3484 = dma.done.wait [#allocation5], 32  }
 0x53e   :  { %3485 = vsyncadd [#allocation5], 4294967264 }
 0x53f   :  { %3051 = vsyncpa [#allocation3], 1 }
 0x540   :  { %3052 = vsyncpa [#allocation5], 1 }

</bundles_post_ra>
